<compile_context>
chip_gen: v6e
topology: v6e:2x2x1
jax: 0.10.0
libtpu: 0.0.40
codegen_flags: <defaults>
</compile_context>

<pallas_src>
import jax
import jax.numpy as jnp
from jax.experimental import pallas as pl
from jax.experimental.pallas import tpu as pltpu


def _make_spatial_attention_kernel(C, TH, RH, W, K, P, has_halo):
    """Fused mean/max -> KxK conv (2->1 ch, pad P, no bias) -> sigmoid -> x*gate."""

    def kernel(*refs):
        if has_halo:
            w_ref, x_ref, xt_ref, xb_ref, o_ref, pad_ref, shift_ref = refs
        else:
            w_ref, x_ref, o_ref, pad_ref, shift_ref = refs
        # w_ref:     (2*K*K,)            SMEM flat conv weight, [c, kh, kw] order
        # x_ref:     (1, C, TH, W)       current H-tile (VMEM)
        # xt_ref/xb_ref: (1, C, RH, W)   8-row slabs just above / below the tile
        # o_ref:     (1, C, TH, W)
        # pad_ref:   (2, TH+2P, W+2P)    f32 padded [mean, max] planes
        # shift_ref: (2*K, TH+2P, W)     f32 lane-shifted planes (kw hoisted)

        x = x_ref[0]                                           # (C, TH, W) native dtype

        # ---- channel statistics: reduce over the leading axis (pure VPU, f32 acc,
        #      no full f32 copy of x, no cross-lane reduce) --------------------------
        x_mean = jnp.mean(x, axis=0, dtype=jnp.float32)        # (TH, W)
        x_max = jnp.max(x, axis=0).astype(jnp.float32)         # (TH, W)

        # ---- assemble zero-padded [mean, max] planes in VMEM -----------------------
        # Only the P-wide borders get zeros; every region is rewritten every grid
        # step (safe under "parallel" megacore sharding of both grid axes).
        zcol = jnp.zeros((TH + 2 * P, P), jnp.float32)
        for c in range(2):
            pad_ref[c, :, :P] = zcol                           # left halo columns
            pad_ref[c, :, P + W:] = zcol                       # right halo columns
        pad_ref[0, P:P + TH, P:P + W] = x_mean
        pad_ref[1, P:P + TH, P:P + W] = x_max

        zrow = jnp.zeros((P, W), jnp.float32)
        if has_halo:
            i = pl.program_id(1)
            last = pl.num_programs(1) - 1

            @pl.when(i == 0)                                   # image top border
            def _():
                pad_ref[0, :P, P:P + W] = zrow
                pad_ref[1, :P, P:P + W] = zrow

            @pl.when(i > 0)                                    # interior seam: real rows
            def _():
                xt = xt_ref[0, :, RH - P:, :]                  # (C, P, W) rows above tile
                pad_ref[0, :P, P:P + W] = jnp.mean(xt, axis=0, dtype=jnp.float32)
                pad_ref[1, :P, P:P + W] = jnp.max(xt, axis=0).astype(jnp.float32)

            @pl.when(i == last)                                # image bottom border
            def _():
                pad_ref[0, P + TH:, P:P + W] = zrow
                pad_ref[1, P + TH:, P:P + W] = zrow

            @pl.when(i < last)
            def _():
                xb = xb_ref[0, :, :P, :]                       # (C, P, W) rows below tile
                pad_ref[0, P + TH:, P:P + W] = jnp.mean(xb, axis=0, dtype=jnp.float32)
                pad_ref[1, P + TH:, P:P + W] = jnp.max(xb, axis=0).astype(jnp.float32)
        else:
            pad_ref[0, :P, P:P + W] = zrow
            pad_ref[1, :P, P:P + W] = zrow
            pad_ref[0, P + TH:, P:P + W] = zrow
            pad_ref[1, P + TH:, P:P + W] = zrow

        # ---- hoisted lane shifts: 2*K shifted planes, computed ONCE ----------------
        # (was 2*K*K unaligned lane slices; now the tap loop is row-offset loads
        #  plus scalar*plane FMAs only, keeping the XLU free)
        for c in range(2):
            plane = pad_ref[c]                                 # (TH+2P, W+2P)
            for kw in range(K):
                shift_ref[c * K + kw] = plane[:, kw:kw + W]

        # ---- KxK cross-correlation, 2 in-ch -> 1 out-ch: 98 VPU FMAs ---------------
        acc = jnp.zeros((TH, W), jnp.float32)
        for c in range(2):
            for kw in range(K):
                for kh in range(K):
                    wv = w_ref[c * K * K + kh * K + kw]        # scalar from SMEM
                    acc = acc + wv * shift_ref[c * K + kw, kh:kh + TH, :]

        # sigmoid gate: exp on the EUP + explicit reciprocal (exact).
        gate = pl.reciprocal(1.0 + jnp.exp(-acc), approx=False)   # (TH, W)

        # broadcast multiply over the leading channel axis (no relayout), store.
        o_ref[0] = (x * gate.astype(x.dtype)).astype(o_ref.dtype)

    return kernel


def _choose_tiling(H, W, C, itemsize):
    """Pick TH so 2 buffers x (in+out) tiles + f32 scratch fit comfortably in VMEM
    on every generation (v7x: 64 MiB/TC, v5e/v6e: 128 MiB)."""
    try:
        vmem_cap = int(pltpu.get_tpu_info().vmem_capacity_bytes)
    except Exception:  # conservative fallback if the query is unavailable
        vmem_cap = 64 * 1024 * 1024
    vmem_limit = min(vmem_cap * 3 // 4, 100 * 1024 * 1024)

    if H % 8 != 0 or H <= 8:
        return H, vmem_limit                                   # too small / ragged: 1 tile

    block_budget = vmem_cap // 8                               # per main (1,C,TH,W) block
    row_bytes = max(C * W * itemsize, 1)
    th = (block_budget // row_bytes) // 8 * 8
    th = min(th, max(8, (262144 // max(W, 1)) // 8 * 8))       # bound f32 conv acc/scratch
    th = max(8, min(th, H))
    while H % th:                                              # TH must divide H
        th -= 8
    return th, vmem_limit


def spatial_attention(x, conv_weight, padding=3, tile_h=None):
    """Forward pass matching SpatialAttention.forward.

    x:           (N, C, H, W)   kept in NCHW (no wrapper transposes; W on lanes)
    conv_weight: (1, 2, K, K)   PyTorch OIHW layout, bias-free.
    """
    N, C, H, W = x.shape
    K = conv_weight.shape[-1]
    P = padding
    itemsize = jnp.dtype(x.dtype).itemsize

    TH, vmem_limit = _choose_tiling(H, W, C, itemsize)
    if tile_h is not None:
        TH = tile_h
    if H % TH != 0 or (TH != H and TH % 8 != 0):
        TH = H                                                 # keep blocks legal
    n_h = H // TH
    has_halo = n_h > 1

    RH = 8 if H >= 8 else H                                    # halo row-block (>= P)
    TPR = max(TH // RH, 1)                                     # TH in units of RH blocks
    NRH = pl.cdiv(H, RH)

    w_flat = conv_weight.reshape(-1).astype(jnp.float32)       # (2*K*K,) [c, kh, kw]

    main_in_spec = pl.BlockSpec((1, C, TH, W), lambda n, i: (n, 0, i, 0))
    out_spec = pl.BlockSpec((1, C, TH, W), lambda n, i: (n, 0, i, 0))
    in_specs = [pl.BlockSpec(memory_space=pltpu.MemorySpace.SMEM), main_in_spec]
    args = [w_flat, x]
    if has_halo:
        in_specs += [
            # 8-row slab ending just above the tile (clamped at the top border)
            pl.BlockSpec((1, C, RH, W),
                         lambda n, i: (n, 0, jnp.maximum(i * TPR - 1, 0), 0)),
            # 8-row slab starting just below the tile (clamped at the bottom border)
            pl.BlockSpec((1, C, RH, W),
                         lambda n, i: (n, 0, jnp.minimum((i + 1) * TPR, NRH - 1), 0)),
        ]
        args += [x, x]

    cost = pl.CostEstimate(
        flops=int(N * H * W * (3 * C + 2 * 2 * K * K + 3)),
        transcendentals=int(N * H * W),
        bytes_accessed=int((2 * N * H * W * C + 2 * N * n_h * RH * W * C) * itemsize
                           + w_flat.size * 4),
    )

    return pl.pallas_call(
        _make_spatial_attention_kernel(C, TH, RH, W, K, P, has_halo),
        out_shape=jax.ShapeDtypeStruct((N, C, H, W), x.dtype),
        grid_spec=pltpu.PrefetchScalarGridSpec(
            num_scalar_prefetch=0,
            grid=(N, n_h),
            in_specs=in_specs,
            out_specs=out_spec,
            scratch_shapes=[
                pltpu.VMEM((2, TH + 2 * P, W + 2 * P), jnp.float32),   # padded planes
                pltpu.VMEM((2 * K, TH + 2 * P, W), jnp.float32),       # hoisted kw shifts
            ],
        ),
        compiler_params=pltpu.CompilerParams(
            dimension_semantics=("parallel", "parallel"),
            vmem_limit_bytes=int(vmem_limit),
        ),
        cost_estimate=cost,
    )(*args)


def _reference(x, w, padding=3):
    """Pure-JAX reference mirroring the PyTorch module."""
    x1 = jnp.mean(x, axis=1, keepdims=True)
    x2 = jnp.max(x, axis=1, keepdims=True)
    feats = jnp.concatenate([x1, x2], axis=1)
    conv = jax.lax.conv_general_dilated(
        feats, w, window_strides=(1, 1),
        padding=((padding, padding), (padding, padding)),
        dimension_numbers=("NCHW", "OIHW", "NCHW"))
    return x * jax.nn.sigmoid(conv)


def init_spatial_attention_params(key, kernel_size=7, dtype=jnp.float32):
    """Conv2d(2, 1, k, bias=False) weight with PyTorch-like uniform init."""
    fan_in = 2 * kernel_size * kernel_size
    bound = 1.0 / (fan_in ** 0.5)
    return jax.random.uniform(key, (1, 2, kernel_size, kernel_size), dtype,
                              minval=-bound, maxval=bound)


if __name__ == "__main__":
    key = jax.random.PRNGKey(0)
    k_x, k_w = jax.random.split(key)

    # small shapes: batch=2, channels=4, spatial=16x16
    N, C, H, W = 2, 4, 16, 16
    x = jax.random.normal(k_x, (N, C, H, W), jnp.float32)
    w = init_spatial_attention_params(k_w, kernel_size=7)

    # tile_h=8 forces two H-tiles so the conv-halo seam path is exercised even
    # at this small test size.
    out = jax.block_until_ready(spatial_attention(x, w, padding=3, tile_h=8))
    assert out.shape == (N, C, H, W), out.shape

    ref = jax.block_until_ready(_reference(x, w, padding=3))
    assert jnp.allclose(out, ref, atol=1e-4, rtol=1e-4), \
        float(jnp.max(jnp.abs(out - ref)))

    # also exercise the auto-tiled (single H-tile) path
    out2 = jax.block_until_ready(spatial_attention(x, w, padding=3))
    assert jnp.allclose(out2, ref, atol=1e-4, rtol=1e-4), \
        float(jnp.max(jnp.abs(out2 - ref)))

    print("KERNEL_OK")
</pallas_src>

<mosaic_0001>
module attributes {stable_mosaic.version = 11 : i64} {
  func.func @kernel(%arg0: i32, %arg1: i32, %arg2: memref<98xf32, #tpu.memory_space<smem>>, %arg3: memref<1x4x8x16xf32, #tpu.memory_space<vmem>>, %arg4: memref<1x4x8x16xf32, #tpu.memory_space<vmem>>, %arg5: memref<1x4x8x16xf32, #tpu.memory_space<vmem>>, %arg6: memref<1x4x8x16xf32, #tpu.memory_space<vmem>>, %arg7: memref<2x14x22xf32, #tpu.memory_space<vmem>>, %arg8: memref<14x14x16xf32, #tpu.memory_space<vmem>>) attributes {dimension_semantics = [#tpu.dimension_semantics<parallel>, #tpu.dimension_semantics<parallel>], iteration_bounds = array<i64: 2, 2>, scalar_prefetch = 0 : i64, scratch_operands = 2 : i64, tpu.core_type = #tpu.core_type<tc>, window_params = [{transform_indices = @transform_0, window_bounds = array<i64: 98>}, {transform_indices = @transform_1, window_bounds = array<i64: 1, 4, 8, 16>}, {transform_indices = @transform_2, window_bounds = array<i64: 1, 4, 8, 16>}, {transform_indices = @transform_3, window_bounds = array<i64: 1, 4, 8, 16>}, {transform_indices = @transform_4, window_bounds = array<i64: 1, 4, 8, 16>}]} {
    %c0 = arith.constant 0 : index
    %c0_0 = arith.constant 0 : index
    %c0_1 = arith.constant 0 : index
    %c0_2 = arith.constant 0 : index
    %0 = vector.load %arg3[%c0, %c0_0, %c0_1, %c0_2] : memref<1x4x8x16xf32, #tpu.memory_space<vmem>>, vector<1x4x8x16xf32>
    %1 = vector.shape_cast %0 : vector<1x4x8x16xf32> to vector<4x8x16xf32>
    %cst = arith.constant dense<0.000000e+00> : vector<8x16xf32>
    %2 = vector.multi_reduction <add>, %1, %cst [0] : vector<4x8x16xf32> to vector<8x16xf32>
    %cst_3 = arith.constant 4.000000e+00 : f32
    %3 = vector.broadcast %cst_3 : f32 to vector<8x16xf32>
    %4 = arith.divf %2, %3 : vector<8x16xf32>
    %cst_4 = arith.constant dense<0xFF800000> : vector<8x16xf32>
    %5 = vector.multi_reduction <maximumf>, %1, %cst_4 [0] : vector<4x8x16xf32> to vector<8x16xf32>
    %cst_5 = arith.constant 0.000000e+00 : f32
    %6 = vector.broadcast %cst_5 : f32 to vector<14x3xf32>
    %c0_6 = arith.constant 0 : index
    %c0_7 = arith.constant 0 : index
    %c0_8 = arith.constant 0 : index
    %7 = vector.load %arg7[%c0_6, %c0_7, %c0_8] : memref<2x14x22xf32, #tpu.memory_space<vmem>>, vector<1x14x3xf32>
    %8 = vector.shape_cast %7 : vector<1x14x3xf32> to vector<14x3xf32>
    %9 = vector.shape_cast %6 : vector<14x3xf32> to vector<1x14x3xf32>
    tpu.vector_store %arg7[%c0_6, %c0_7, %c0_8], %9 {strides = array<i32>} : memref<2x14x22xf32, #tpu.memory_space<vmem>>, vector<1x14x3xf32>,
    %c0_9 = arith.constant 0 : index
    %c0_10 = arith.constant 0 : index
    %c19 = arith.constant 19 : index
    %10 = vector.load %arg7[%c0_9, %c0_10, %c19] : memref<2x14x22xf32, #tpu.memory_space<vmem>>, vector<1x14x3xf32>
    %11 = vector.shape_cast %10 : vector<1x14x3xf32> to vector<14x3xf32>
    %12 = vector.shape_cast %6 : vector<14x3xf32> to vector<1x14x3xf32>
    tpu.vector_store %arg7[%c0_9, %c0_10, %c19], %12 {strides = array<i32>} : memref<2x14x22xf32, #tpu.memory_space<vmem>>, vector<1x14x3xf32>,
    %c1 = arith.constant 1 : index
    %c0_11 = arith.constant 0 : index
    %c0_12 = arith.constant 0 : index
    %13 = vector.load %arg7[%c1, %c0_11, %c0_12] : memref<2x14x22xf32, #tpu.memory_space<vmem>>, vector<1x14x3xf32>
    %14 = vector.shape_cast %13 : vector<1x14x3xf32> to vector<14x3xf32>
    %15 = vector.shape_cast %6 : vector<14x3xf32> to vector<1x14x3xf32>
    tpu.vector_store %arg7[%c1, %c0_11, %c0_12], %15 {strides = array<i32>} : memref<2x14x22xf32, #tpu.memory_space<vmem>>, vector<1x14x3xf32>,
    %c1_13 = arith.constant 1 : index
    %c0_14 = arith.constant 0 : index
    %c19_15 = arith.constant 19 : index
    %16 = vector.load %arg7[%c1_13, %c0_14, %c19_15] : memref<2x14x22xf32, #tpu.memory_space<vmem>>, vector<1x14x3xf32>
    %17 = vector.shape_cast %16 : vector<1x14x3xf32> to vector<14x3xf32>
    %18 = vector.shape_cast %6 : vector<14x3xf32> to vector<1x14x3xf32>
    tpu.vector_store %arg7[%c1_13, %c0_14, %c19_15], %18 {strides = array<i32>} : memref<2x14x22xf32, #tpu.memory_space<vmem>>, vector<1x14x3xf32>,
    %c0_16 = arith.constant 0 : index
    %c3 = arith.constant 3 : index
    %c3_17 = arith.constant 3 : index
    %19 = vector.load %arg7[%c0_16, %c3, %c3_17] : memref<2x14x22xf32, #tpu.memory_space<vmem>>, vector<1x8x16xf32>
    %20 = vector.shape_cast %19 : vector<1x8x16xf32> to vector<8x16xf32>
    %21 = vector.shape_cast %4 : vector<8x16xf32> to vector<1x8x16xf32>
    tpu.vector_store %arg7[%c0_16, %c3, %c3_17], %21 {strides = array<i32>} : memref<2x14x22xf32, #tpu.memory_space<vmem>>, vector<1x8x16xf32>,
    %c1_18 = arith.constant 1 : index
    %c3_19 = arith.constant 3 : index
    %c3_20 = arith.constant 3 : index
    %22 = vector.load %arg7[%c1_18, %c3_19, %c3_20] : memref<2x14x22xf32, #tpu.memory_space<vmem>>, vector<1x8x16xf32>
    %23 = vector.shape_cast %22 : vector<1x8x16xf32> to vector<8x16xf32>
    %24 = vector.shape_cast %5 : vector<8x16xf32> to vector<1x8x16xf32>
    tpu.vector_store %arg7[%c1_18, %c3_19, %c3_20], %24 {strides = array<i32>} : memref<2x14x22xf32, #tpu.memory_space<vmem>>, vector<1x8x16xf32>,
    %cst_21 = arith.constant 0.000000e+00 : f32
    %25 = vector.broadcast %cst_21 : f32 to vector<3x16xf32>
    %c0_i32 = arith.constant 0 : i32
    %26 = arith.cmpi eq, %arg1, %c0_i32 : i32
    %27 = arith.extui %26 : i1 to i32
    %c0_i32_22 = arith.constant 0 : i32
    %28 = arith.cmpi ne, %27, %c0_i32_22 : i32
    scf.if %28 {
      %c0_381 = arith.constant 0 : index
      %c0_382 = arith.constant 0 : index
      %c3_383 = arith.constant 3 : index
      %699 = vector.load %arg7[%c0_381, %c0_382, %c3_383] : memref<2x14x22xf32, #tpu.memory_space<vmem>>, vector<1x3x16xf32>
      %700 = vector.shape_cast %699 : vector<1x3x16xf32> to vector<3x16xf32>
      %701 = vector.shape_cast %25 : vector<3x16xf32> to vector<1x3x16xf32>
      tpu.vector_store %arg7[%c0_381, %c0_382, %c3_383], %701 {strides = array<i32>} : memref<2x14x22xf32, #tpu.memory_space<vmem>>, vector<1x3x16xf32>,
      %c1_384 = arith.constant 1 : index
      %c0_385 = arith.constant 0 : index
      %c3_386 = arith.constant 3 : index
      %702 = vector.load %arg7[%c1_384, %c0_385, %c3_386] : memref<2x14x22xf32, #tpu.memory_space<vmem>>, vector<1x3x16xf32>
      %703 = vector.shape_cast %702 : vector<1x3x16xf32> to vector<3x16xf32>
      %704 = vector.shape_cast %25 : vector<3x16xf32> to vector<1x3x16xf32>
      tpu.vector_store %arg7[%c1_384, %c0_385, %c3_386], %704 {strides = array<i32>} : memref<2x14x22xf32, #tpu.memory_space<vmem>>, vector<1x3x16xf32>,
    } else {
    }
    %c0_i32_23 = arith.constant 0 : i32
    %29 = arith.cmpi sgt, %arg1, %c0_i32_23 : i32
    %30 = arith.extui %29 : i1 to i32
    %c0_i32_24 = arith.constant 0 : i32
    %31 = arith.cmpi ne, %30, %c0_i32_24 : i32
    scf.if %31 {
      %c0_381 = arith.constant 0 : index
      %c0_382 = arith.constant 0 : index
      %c5_383 = arith.constant 5 : index
      %c0_384 = arith.constant 0 : index
      %699 = vector.load %arg4[%c0_381, %c0_382, %c5_383, %c0_384] : memref<1x4x8x16xf32, #tpu.memory_space<vmem>>, vector<1x4x3x16xf32>
      %700 = vector.shape_cast %699 : vector<1x4x3x16xf32> to vector<4x3x16xf32>
      %cst_385 = arith.constant dense<0.000000e+00> : vector<3x16xf32>
      %701 = vector.multi_reduction <add>, %700, %cst_385 [0] : vector<4x3x16xf32> to vector<3x16xf32>
      %cst_386 = arith.constant 4.000000e+00 : f32
      %702 = vector.broadcast %cst_386 : f32 to vector<3x16xf32>
      %703 = arith.divf %701, %702 : vector<3x16xf32>
      %c0_387 = arith.constant 0 : index
      %c0_388 = arith.constant 0 : index
      %c3_389 = arith.constant 3 : index
      %704 = vector.load %arg7[%c0_387, %c0_388, %c3_389] : memref<2x14x22xf32, #tpu.memory_space<vmem>>, vector<1x3x16xf32>
      %705 = vector.shape_cast %704 : vector<1x3x16xf32> to vector<3x16xf32>
      %706 = vector.shape_cast %703 : vector<3x16xf32> to vector<1x3x16xf32>
      tpu.vector_store %arg7[%c0_387, %c0_388, %c3_389], %706 {strides = array<i32>} : memref<2x14x22xf32, #tpu.memory_space<vmem>>, vector<1x3x16xf32>,
      %cst_390 = arith.constant dense<0xFF800000> : vector<3x16xf32>
      %707 = vector.multi_reduction <maximumf>, %700, %cst_390 [0] : vector<4x3x16xf32> to vector<3x16xf32>
      %c1_391 = arith.constant 1 : index
      %c0_392 = arith.constant 0 : index
      %c3_393 = arith.constant 3 : index
      %708 = vector.load %arg7[%c1_391, %c0_392, %c3_393] : memref<2x14x22xf32, #tpu.memory_space<vmem>>, vector<1x3x16xf32>
      %709 = vector.shape_cast %708 : vector<1x3x16xf32> to vector<3x16xf32>
      %710 = vector.shape_cast %707 : vector<3x16xf32> to vector<1x3x16xf32>
      tpu.vector_store %arg7[%c1_391, %c0_392, %c3_393], %710 {strides = array<i32>} : memref<2x14x22xf32, #tpu.memory_space<vmem>>, vector<1x3x16xf32>,
    } else {
    }
    %c1_i32 = arith.constant 1 : i32
    %32 = arith.cmpi eq, %arg1, %c1_i32 : i32
    %33 = arith.extui %32 : i1 to i32
    %c0_i32_25 = arith.constant 0 : i32
    %34 = arith.cmpi ne, %33, %c0_i32_25 : i32
    scf.if %34 {
      %c0_381 = arith.constant 0 : index
      %c11_382 = arith.constant 11 : index
      %c3_383 = arith.constant 3 : index
      %699 = vector.load %arg7[%c0_381, %c11_382, %c3_383] : memref<2x14x22xf32, #tpu.memory_space<vmem>>, vector<1x3x16xf32>
      %700 = vector.shape_cast %699 : vector<1x3x16xf32> to vector<3x16xf32>
      %701 = vector.shape_cast %25 : vector<3x16xf32> to vector<1x3x16xf32>
      tpu.vector_store %arg7[%c0_381, %c11_382, %c3_383], %701 {strides = array<i32>} : memref<2x14x22xf32, #tpu.memory_space<vmem>>, vector<1x3x16xf32>,
      %c1_384 = arith.constant 1 : index
      %c11_385 = arith.constant 11 : index
      %c3_386 = arith.constant 3 : index
      %702 = vector.load %arg7[%c1_384, %c11_385, %c3_386] : memref<2x14x22xf32, #tpu.memory_space<vmem>>, vector<1x3x16xf32>
      %703 = vector.shape_cast %702 : vector<1x3x16xf32> to vector<3x16xf32>
      %704 = vector.shape_cast %25 : vector<3x16xf32> to vector<1x3x16xf32>
      tpu.vector_store %arg7[%c1_384, %c11_385, %c3_386], %704 {strides = array<i32>} : memref<2x14x22xf32, #tpu.memory_space<vmem>>, vector<1x3x16xf32>,
    } else {
    }
    %c1_i32_26 = arith.constant 1 : i32
    %35 = arith.cmpi slt, %arg1, %c1_i32_26 : i32
    %36 = arith.extui %35 : i1 to i32
    %c0_i32_27 = arith.constant 0 : i32
    %37 = arith.cmpi ne, %36, %c0_i32_27 : i32
    scf.if %37 {
      %c0_381 = arith.constant 0 : index
      %c0_382 = arith.constant 0 : index
      %c0_383 = arith.constant 0 : index
      %c0_384 = arith.constant 0 : index
      %699 = vector.load %arg5[%c0_381, %c0_382, %c0_383, %c0_384] : memref<1x4x8x16xf32, #tpu.memory_space<vmem>>, vector<1x4x3x16xf32>
      %700 = vector.shape_cast %699 : vector<1x4x3x16xf32> to vector<4x3x16xf32>
      %cst_385 = arith.constant dense<0.000000e+00> : vector<3x16xf32>
      %701 = vector.multi_reduction <add>, %700, %cst_385 [0] : vector<4x3x16xf32> to vector<3x16xf32>
      %cst_386 = arith.constant 4.000000e+00 : f32
      %702 = vector.broadcast %cst_386 : f32 to vector<3x16xf32>
      %703 = arith.divf %701, %702 : vector<3x16xf32>
      %c0_387 = arith.constant 0 : index
      %c11_388 = arith.constant 11 : index
      %c3_389 = arith.constant 3 : index
      %704 = vector.load %arg7[%c0_387, %c11_388, %c3_389] : memref<2x14x22xf32, #tpu.memory_space<vmem>>, vector<1x3x16xf32>
      %705 = vector.shape_cast %704 : vector<1x3x16xf32> to vector<3x16xf32>
      %706 = vector.shape_cast %703 : vector<3x16xf32> to vector<1x3x16xf32>
      tpu.vector_store %arg7[%c0_387, %c11_388, %c3_389], %706 {strides = array<i32>} : memref<2x14x22xf32, #tpu.memory_space<vmem>>, vector<1x3x16xf32>,
      %cst_390 = arith.constant dense<0xFF800000> : vector<3x16xf32>
      %707 = vector.multi_reduction <maximumf>, %700, %cst_390 [0] : vector<4x3x16xf32> to vector<3x16xf32>
      %c1_391 = arith.constant 1 : index
      %c11_392 = arith.constant 11 : index
      %c3_393 = arith.constant 3 : index
      %708 = vector.load %arg7[%c1_391, %c11_392, %c3_393] : memref<2x14x22xf32, #tpu.memory_space<vmem>>, vector<1x3x16xf32>
      %709 = vector.shape_cast %708 : vector<1x3x16xf32> to vector<3x16xf32>
      %710 = vector.shape_cast %707 : vector<3x16xf32> to vector<1x3x16xf32>
      tpu.vector_store %arg7[%c1_391, %c11_392, %c3_393], %710 {strides = array<i32>} : memref<2x14x22xf32, #tpu.memory_space<vmem>>, vector<1x3x16xf32>,
    } else {
    }
    %c0_28 = arith.constant 0 : index
    %c0_29 = arith.constant 0 : index
    %c0_30 = arith.constant 0 : index
    %38 = vector.load %arg7[%c0_28, %c0_29, %c0_30] : memref<2x14x22xf32, #tpu.memory_space<vmem>>, vector<1x14x22xf32>
    %39 = vector.shape_cast %38 : vector<1x14x22xf32> to vector<14x22xf32>
    %40 = vector.extract_strided_slice %39 {offsets = [0, 0], sizes = [14, 16], strides = [1, 1]} : vector<14x22xf32> to vector<14x16xf32>
    %c0_31 = arith.constant 0 : index
    %c0_32 = arith.constant 0 : index
    %c0_33 = arith.constant 0 : index
    %41 = vector.load %arg8[%c0_31, %c0_32, %c0_33] : memref<14x14x16xf32, #tpu.memory_space<vmem>>, vector<1x14x16xf32>
    %42 = vector.shape_cast %41 : vector<1x14x16xf32> to vector<14x16xf32>
    %43 = vector.shape_cast %40 : vector<14x16xf32> to vector<1x14x16xf32>
    tpu.vector_store %arg8[%c0_31, %c0_32, %c0_33], %43 {strides = array<i32>} : memref<14x14x16xf32, #tpu.memory_space<vmem>>, vector<1x14x16xf32>,
    %44 = vector.extract_strided_slice %39 {offsets = [0, 1], sizes = [14, 16], strides = [1, 1]} : vector<14x22xf32> to vector<14x16xf32>
    %c1_34 = arith.constant 1 : index
    %c0_35 = arith.constant 0 : index
    %c0_36 = arith.constant 0 : index
    %45 = vector.load %arg8[%c1_34, %c0_35, %c0_36] : memref<14x14x16xf32, #tpu.memory_space<vmem>>, vector<1x14x16xf32>
    %46 = vector.shape_cast %45 : vector<1x14x16xf32> to vector<14x16xf32>
    %47 = vector.shape_cast %44 : vector<14x16xf32> to vector<1x14x16xf32>
    tpu.vector_store %arg8[%c1_34, %c0_35, %c0_36], %47 {strides = array<i32>} : memref<14x14x16xf32, #tpu.memory_space<vmem>>, vector<1x14x16xf32>,
    %48 = vector.extract_strided_slice %39 {offsets = [0, 2], sizes = [14, 16], strides = [1, 1]} : vector<14x22xf32> to vector<14x16xf32>
    %c2 = arith.constant 2 : index
    %c0_37 = arith.constant 0 : index
    %c0_38 = arith.constant 0 : index
    %49 = vector.load %arg8[%c2, %c0_37, %c0_38] : memref<14x14x16xf32, #tpu.memory_space<vmem>>, vector<1x14x16xf32>
    %50 = vector.shape_cast %49 : vector<1x14x16xf32> to vector<14x16xf32>
    %51 = vector.shape_cast %48 : vector<14x16xf32> to vector<1x14x16xf32>
    tpu.vector_store %arg8[%c2, %c0_37, %c0_38], %51 {strides = array<i32>} : memref<14x14x16xf32, #tpu.memory_space<vmem>>, vector<1x14x16xf32>,
    %52 = vector.extract_strided_slice %39 {offsets = [0, 3], sizes = [14, 16], strides = [1, 1]} : vector<14x22xf32> to vector<14x16xf32>
    %c3_39 = arith.constant 3 : index
    %c0_40 = arith.constant 0 : index
    %c0_41 = arith.constant 0 : index
    %53 = vector.load %arg8[%c3_39, %c0_40, %c0_41] : memref<14x14x16xf32, #tpu.memory_space<vmem>>, vector<1x14x16xf32>
    %54 = vector.shape_cast %53 : vector<1x14x16xf32> to vector<14x16xf32>
    %55 = vector.shape_cast %52 : vector<14x16xf32> to vector<1x14x16xf32>
    tpu.vector_store %arg8[%c3_39, %c0_40, %c0_41], %55 {strides = array<i32>} : memref<14x14x16xf32, #tpu.memory_space<vmem>>, vector<1x14x16xf32>,
    %56 = vector.extract_strided_slice %39 {offsets = [0, 4], sizes = [14, 16], strides = [1, 1]} : vector<14x22xf32> to vector<14x16xf32>
    %c4 = arith.constant 4 : index
    %c0_42 = arith.constant 0 : index
    %c0_43 = arith.constant 0 : index
    %57 = vector.load %arg8[%c4, %c0_42, %c0_43] : memref<14x14x16xf32, #tpu.memory_space<vmem>>, vector<1x14x16xf32>
    %58 = vector.shape_cast %57 : vector<1x14x16xf32> to vector<14x16xf32>
    %59 = vector.shape_cast %56 : vector<14x16xf32> to vector<1x14x16xf32>
    tpu.vector_store %arg8[%c4, %c0_42, %c0_43], %59 {strides = array<i32>} : memref<14x14x16xf32, #tpu.memory_space<vmem>>, vector<1x14x16xf32>,
    %60 = vector.extract_strided_slice %39 {offsets = [0, 5], sizes = [14, 16], strides = [1, 1]} : vector<14x22xf32> to vector<14x16xf32>
    %c5 = arith.constant 5 : index
    %c0_44 = arith.constant 0 : index
    %c0_45 = arith.constant 0 : index
    %61 = vector.load %arg8[%c5, %c0_44, %c0_45] : memref<14x14x16xf32, #tpu.memory_space<vmem>>, vector<1x14x16xf32>
    %62 = vector.shape_cast %61 : vector<1x14x16xf32> to vector<14x16xf32>
    %63 = vector.shape_cast %60 : vector<14x16xf32> to vector<1x14x16xf32>
    tpu.vector_store %arg8[%c5, %c0_44, %c0_45], %63 {strides = array<i32>} : memref<14x14x16xf32, #tpu.memory_space<vmem>>, vector<1x14x16xf32>,
    %64 = vector.extract_strided_slice %39 {offsets = [0, 6], sizes = [14, 16], strides = [1, 1]} : vector<14x22xf32> to vector<14x16xf32>
    %c6 = arith.constant 6 : index
    %c0_46 = arith.constant 0 : index
    %c0_47 = arith.constant 0 : index
    %65 = vector.load %arg8[%c6, %c0_46, %c0_47] : memref<14x14x16xf32, #tpu.memory_space<vmem>>, vector<1x14x16xf32>
    %66 = vector.shape_cast %65 : vector<1x14x16xf32> to vector<14x16xf32>
    %67 = vector.shape_cast %64 : vector<14x16xf32> to vector<1x14x16xf32>
    tpu.vector_store %arg8[%c6, %c0_46, %c0_47], %67 {strides = array<i32>} : memref<14x14x16xf32, #tpu.memory_space<vmem>>, vector<1x14x16xf32>,
    %c1_48 = arith.constant 1 : index
    %c0_49 = arith.constant 0 : index
    %c0_50 = arith.constant 0 : index
    %68 = vector.load %arg7[%c1_48, %c0_49, %c0_50] : memref<2x14x22xf32, #tpu.memory_space<vmem>>, vector<1x14x22xf32>
    %69 = vector.shape_cast %68 : vector<1x14x22xf32> to vector<14x22xf32>
    %70 = vector.extract_strided_slice %69 {offsets = [0, 0], sizes = [14, 16], strides = [1, 1]} : vector<14x22xf32> to vector<14x16xf32>
    %c7 = arith.constant 7 : index
    %c0_51 = arith.constant 0 : index
    %c0_52 = arith.constant 0 : index
    %71 = vector.load %arg8[%c7, %c0_51, %c0_52] : memref<14x14x16xf32, #tpu.memory_space<vmem>>, vector<1x14x16xf32>
    %72 = vector.shape_cast %71 : vector<1x14x16xf32> to vector<14x16xf32>
    %73 = vector.shape_cast %70 : vector<14x16xf32> to vector<1x14x16xf32>
    tpu.vector_store %arg8[%c7, %c0_51, %c0_52], %73 {strides = array<i32>} : memref<14x14x16xf32, #tpu.memory_space<vmem>>, vector<1x14x16xf32>,
    %74 = vector.extract_strided_slice %69 {offsets = [0, 1], sizes = [14, 16], strides = [1, 1]} : vector<14x22xf32> to vector<14x16xf32>
    %c8 = arith.constant 8 : index
    %c0_53 = arith.constant 0 : index
    %c0_54 = arith.constant 0 : index
    %75 = vector.load %arg8[%c8, %c0_53, %c0_54] : memref<14x14x16xf32, #tpu.memory_space<vmem>>, vector<1x14x16xf32>
    %76 = vector.shape_cast %75 : vector<1x14x16xf32> to vector<14x16xf32>
    %77 = vector.shape_cast %74 : vector<14x16xf32> to vector<1x14x16xf32>
    tpu.vector_store %arg8[%c8, %c0_53, %c0_54], %77 {strides = array<i32>} : memref<14x14x16xf32, #tpu.memory_space<vmem>>, vector<1x14x16xf32>,
    %78 = vector.extract_strided_slice %69 {offsets = [0, 2], sizes = [14, 16], strides = [1, 1]} : vector<14x22xf32> to vector<14x16xf32>
    %c9 = arith.constant 9 : index
    %c0_55 = arith.constant 0 : index
    %c0_56 = arith.constant 0 : index
    %79 = vector.load %arg8[%c9, %c0_55, %c0_56] : memref<14x14x16xf32, #tpu.memory_space<vmem>>, vector<1x14x16xf32>
    %80 = vector.shape_cast %79 : vector<1x14x16xf32> to vector<14x16xf32>
    %81 = vector.shape_cast %78 : vector<14x16xf32> to vector<1x14x16xf32>
    tpu.vector_store %arg8[%c9, %c0_55, %c0_56], %81 {strides = array<i32>} : memref<14x14x16xf32, #tpu.memory_space<vmem>>, vector<1x14x16xf32>,
    %82 = vector.extract_strided_slice %69 {offsets = [0, 3], sizes = [14, 16], strides = [1, 1]} : vector<14x22xf32> to vector<14x16xf32>
    %c10 = arith.constant 10 : index
    %c0_57 = arith.constant 0 : index
    %c0_58 = arith.constant 0 : index
    %83 = vector.load %arg8[%c10, %c0_57, %c0_58] : memref<14x14x16xf32, #tpu.memory_space<vmem>>, vector<1x14x16xf32>
    %84 = vector.shape_cast %83 : vector<1x14x16xf32> to vector<14x16xf32>
    %85 = vector.shape_cast %82 : vector<14x16xf32> to vector<1x14x16xf32>
    tpu.vector_store %arg8[%c10, %c0_57, %c0_58], %85 {strides = array<i32>} : memref<14x14x16xf32, #tpu.memory_space<vmem>>, vector<1x14x16xf32>,
    %86 = vector.extract_strided_slice %69 {offsets = [0, 4], sizes = [14, 16], strides = [1, 1]} : vector<14x22xf32> to vector<14x16xf32>
    %c11 = arith.constant 11 : index
    %c0_59 = arith.constant 0 : index
    %c0_60 = arith.constant 0 : index
    %87 = vector.load %arg8[%c11, %c0_59, %c0_60] : memref<14x14x16xf32, #tpu.memory_space<vmem>>, vector<1x14x16xf32>
    %88 = vector.shape_cast %87 : vector<1x14x16xf32> to vector<14x16xf32>
    %89 = vector.shape_cast %86 : vector<14x16xf32> to vector<1x14x16xf32>
    tpu.vector_store %arg8[%c11, %c0_59, %c0_60], %89 {strides = array<i32>} : memref<14x14x16xf32, #tpu.memory_space<vmem>>, vector<1x14x16xf32>,
    %90 = vector.extract_strided_slice %69 {offsets = [0, 5], sizes = [14, 16], strides = [1, 1]} : vector<14x22xf32> to vector<14x16xf32>
    %c12 = arith.constant 12 : index
    %c0_61 = arith.constant 0 : index
    %c0_62 = arith.constant 0 : index
    %91 = vector.load %arg8[%c12, %c0_61, %c0_62] : memref<14x14x16xf32, #tpu.memory_space<vmem>>, vector<1x14x16xf32>
    %92 = vector.shape_cast %91 : vector<1x14x16xf32> to vector<14x16xf32>
    %93 = vector.shape_cast %90 : vector<14x16xf32> to vector<1x14x16xf32>
    tpu.vector_store %arg8[%c12, %c0_61, %c0_62], %93 {strides = array<i32>} : memref<14x14x16xf32, #tpu.memory_space<vmem>>, vector<1x14x16xf32>,
    %94 = vector.extract_strided_slice %69 {offsets = [0, 6], sizes = [14, 16], strides = [1, 1]} : vector<14x22xf32> to vector<14x16xf32>
    %c13 = arith.constant 13 : index
    %c0_63 = arith.constant 0 : index
    %c0_64 = arith.constant 0 : index
    %95 = vector.load %arg8[%c13, %c0_63, %c0_64] : memref<14x14x16xf32, #tpu.memory_space<vmem>>, vector<1x14x16xf32>
    %96 = vector.shape_cast %95 : vector<1x14x16xf32> to vector<14x16xf32>
    %97 = vector.shape_cast %94 : vector<14x16xf32> to vector<1x14x16xf32>
    tpu.vector_store %arg8[%c13, %c0_63, %c0_64], %97 {strides = array<i32>} : memref<14x14x16xf32, #tpu.memory_space<vmem>>, vector<1x14x16xf32>,
    %cst_65 = arith.constant 0.000000e+00 : f32
    %98 = vector.broadcast %cst_65 : f32 to vector<8x16xf32>
    %c0_66 = arith.constant 0 : index
    %99 = memref.load %arg2[%c0_66] : memref<98xf32, #tpu.memory_space<smem>>
    %c0_67 = arith.constant 0 : index
    %c0_68 = arith.constant 0 : index
    %c0_69 = arith.constant 0 : index
    %100 = vector.load %arg8[%c0_67, %c0_68, %c0_69] : memref<14x14x16xf32, #tpu.memory_space<vmem>>, vector<1x8x16xf32>
    %101 = vector.shape_cast %100 : vector<1x8x16xf32> to vector<8x16xf32>
    %102 = vector.broadcast %99 : f32 to vector<8x16xf32>
    %103 = arith.mulf %102, %101 : vector<8x16xf32>
    %104 = arith.addf %98, %103 : vector<8x16xf32>
    %c7_70 = arith.constant 7 : index
    %105 = memref.load %arg2[%c7_70] : memref<98xf32, #tpu.memory_space<smem>>
    %c0_71 = arith.constant 0 : index
    %c1_72 = arith.constant 1 : index
    %c0_73 = arith.constant 0 : index
    %106 = vector.load %arg8[%c0_71, %c1_72, %c0_73] : memref<14x14x16xf32, #tpu.memory_space<vmem>>, vector<1x8x16xf32>
    %107 = vector.shape_cast %106 : vector<1x8x16xf32> to vector<8x16xf32>
    %108 = vector.broadcast %105 : f32 to vector<8x16xf32>
    %109 = arith.mulf %108, %107 : vector<8x16xf32>
    %110 = arith.addf %104, %109 : vector<8x16xf32>
    %c14 = arith.constant 14 : index
    %111 = memref.load %arg2[%c14] : memref<98xf32, #tpu.memory_space<smem>>
    %c0_74 = arith.constant 0 : index
    %c2_75 = arith.constant 2 : index
    %c0_76 = arith.constant 0 : index
    %112 = vector.load %arg8[%c0_74, %c2_75, %c0_76] : memref<14x14x16xf32, #tpu.memory_space<vmem>>, vector<1x8x16xf32>
    %113 = vector.shape_cast %112 : vector<1x8x16xf32> to vector<8x16xf32>
    %114 = vector.broadcast %111 : f32 to vector<8x16xf32>
    %115 = arith.mulf %114, %113 : vector<8x16xf32>
    %116 = arith.addf %110, %115 : vector<8x16xf32>
    %c21 = arith.constant 21 : index
    %117 = memref.load %arg2[%c21] : memref<98xf32, #tpu.memory_space<smem>>
    %c0_77 = arith.constant 0 : index
    %c3_78 = arith.constant 3 : index
    %c0_79 = arith.constant 0 : index
    %118 = vector.load %arg8[%c0_77, %c3_78, %c0_79] : memref<14x14x16xf32, #tpu.memory_space<vmem>>, vector<1x8x16xf32>
    %119 = vector.shape_cast %118 : vector<1x8x16xf32> to vector<8x16xf32>
    %120 = vector.broadcast %117 : f32 to vector<8x16xf32>
    %121 = arith.mulf %120, %119 : vector<8x16xf32>
    %122 = arith.addf %116, %121 : vector<8x16xf32>
    %c28 = arith.constant 28 : index
    %123 = memref.load %arg2[%c28] : memref<98xf32, #tpu.memory_space<smem>>
    %c0_80 = arith.constant 0 : index
    %c4_81 = arith.constant 4 : index
    %c0_82 = arith.constant 0 : index
    %124 = vector.load %arg8[%c0_80, %c4_81, %c0_82] : memref<14x14x16xf32, #tpu.memory_space<vmem>>, vector<1x8x16xf32>
    %125 = vector.shape_cast %124 : vector<1x8x16xf32> to vector<8x16xf32>
    %126 = vector.broadcast %123 : f32 to vector<8x16xf32>
    %127 = arith.mulf %126, %125 : vector<8x16xf32>
    %128 = arith.addf %122, %127 : vector<8x16xf32>
    %c35 = arith.constant 35 : index
    %129 = memref.load %arg2[%c35] : memref<98xf32, #tpu.memory_space<smem>>
    %c0_83 = arith.constant 0 : index
    %c5_84 = arith.constant 5 : index
    %c0_85 = arith.constant 0 : index
    %130 = vector.load %arg8[%c0_83, %c5_84, %c0_85] : memref<14x14x16xf32, #tpu.memory_space<vmem>>, vector<1x8x16xf32>
    %131 = vector.shape_cast %130 : vector<1x8x16xf32> to vector<8x16xf32>
    %132 = vector.broadcast %129 : f32 to vector<8x16xf32>
    %133 = arith.mulf %132, %131 : vector<8x16xf32>
    %134 = arith.addf %128, %133 : vector<8x16xf32>
    %c42 = arith.constant 42 : index
    %135 = memref.load %arg2[%c42] : memref<98xf32, #tpu.memory_space<smem>>
    %c0_86 = arith.constant 0 : index
    %c6_87 = arith.constant 6 : index
    %c0_88 = arith.constant 0 : index
    %136 = vector.load %arg8[%c0_86, %c6_87, %c0_88] : memref<14x14x16xf32, #tpu.memory_space<vmem>>, vector<1x8x16xf32>
    %137 = vector.shape_cast %136 : vector<1x8x16xf32> to vector<8x16xf32>
    %138 = vector.broadcast %135 : f32 to vector<8x16xf32>
    %139 = arith.mulf %138, %137 : vector<8x16xf32>
    %140 = arith.addf %134, %139 : vector<8x16xf32>
    %c1_89 = arith.constant 1 : index
    %141 = memref.load %arg2[%c1_89] : memref<98xf32, #tpu.memory_space<smem>>
    %c1_90 = arith.constant 1 : index
    %c0_91 = arith.constant 0 : index
    %c0_92 = arith.constant 0 : index
    %142 = vector.load %arg8[%c1_90, %c0_91, %c0_92] : memref<14x14x16xf32, #tpu.memory_space<vmem>>, vector<1x8x16xf32>
    %143 = vector.shape_cast %142 : vector<1x8x16xf32> to vector<8x16xf32>
    %144 = vector.broadcast %141 : f32 to vector<8x16xf32>
    %145 = arith.mulf %144, %143 : vector<8x16xf32>
    %146 = arith.addf %140, %145 : vector<8x16xf32>
    %c8_93 = arith.constant 8 : index
    %147 = memref.load %arg2[%c8_93] : memref<98xf32, #tpu.memory_space<smem>>
    %c1_94 = arith.constant 1 : index
    %c1_95 = arith.constant 1 : index
    %c0_96 = arith.constant 0 : index
    %148 = vector.load %arg8[%c1_94, %c1_95, %c0_96] : memref<14x14x16xf32, #tpu.memory_space<vmem>>, vector<1x8x16xf32>
    %149 = vector.shape_cast %148 : vector<1x8x16xf32> to vector<8x16xf32>
    %150 = vector.broadcast %147 : f32 to vector<8x16xf32>
    %151 = arith.mulf %150, %149 : vector<8x16xf32>
    %152 = arith.addf %146, %151 : vector<8x16xf32>
    %c15 = arith.constant 15 : index
    %153 = memref.load %arg2[%c15] : memref<98xf32, #tpu.memory_space<smem>>
    %c1_97 = arith.constant 1 : index
    %c2_98 = arith.constant 2 : index
    %c0_99 = arith.constant 0 : index
    %154 = vector.load %arg8[%c1_97, %c2_98, %c0_99] : memref<14x14x16xf32, #tpu.memory_space<vmem>>, vector<1x8x16xf32>
    %155 = vector.shape_cast %154 : vector<1x8x16xf32> to vector<8x16xf32>
    %156 = vector.broadcast %153 : f32 to vector<8x16xf32>
    %157 = arith.mulf %156, %155 : vector<8x16xf32>
    %158 = arith.addf %152, %157 : vector<8x16xf32>
    %c22 = arith.constant 22 : index
    %159 = memref.load %arg2[%c22] : memref<98xf32, #tpu.memory_space<smem>>
    %c1_100 = arith.constant 1 : index
    %c3_101 = arith.constant 3 : index
    %c0_102 = arith.constant 0 : index
    %160 = vector.load %arg8[%c1_100, %c3_101, %c0_102] : memref<14x14x16xf32, #tpu.memory_space<vmem>>, vector<1x8x16xf32>
    %161 = vector.shape_cast %160 : vector<1x8x16xf32> to vector<8x16xf32>
    %162 = vector.broadcast %159 : f32 to vector<8x16xf32>
    %163 = arith.mulf %162, %161 : vector<8x16xf32>
    %164 = arith.addf %158, %163 : vector<8x16xf32>
    %c29 = arith.constant 29 : index
    %165 = memref.load %arg2[%c29] : memref<98xf32, #tpu.memory_space<smem>>
    %c1_103 = arith.constant 1 : index
    %c4_104 = arith.constant 4 : index
    %c0_105 = arith.constant 0 : index
    %166 = vector.load %arg8[%c1_103, %c4_104, %c0_105] : memref<14x14x16xf32, #tpu.memory_space<vmem>>, vector<1x8x16xf32>
    %167 = vector.shape_cast %166 : vector<1x8x16xf32> to vector<8x16xf32>
    %168 = vector.broadcast %165 : f32 to vector<8x16xf32>
    %169 = arith.mulf %168, %167 : vector<8x16xf32>
    %170 = arith.addf %164, %169 : vector<8x16xf32>
    %c36 = arith.constant 36 : index
    %171 = memref.load %arg2[%c36] : memref<98xf32, #tpu.memory_space<smem>>
    %c1_106 = arith.constant 1 : index
    %c5_107 = arith.constant 5 : index
    %c0_108 = arith.constant 0 : index
    %172 = vector.load %arg8[%c1_106, %c5_107, %c0_108] : memref<14x14x16xf32, #tpu.memory_space<vmem>>, vector<1x8x16xf32>
    %173 = vector.shape_cast %172 : vector<1x8x16xf32> to vector<8x16xf32>
    %174 = vector.broadcast %171 : f32 to vector<8x16xf32>
    %175 = arith.mulf %174, %173 : vector<8x16xf32>
    %176 = arith.addf %170, %175 : vector<8x16xf32>
    %c43 = arith.constant 43 : index
    %177 = memref.load %arg2[%c43] : memref<98xf32, #tpu.memory_space<smem>>
    %c1_109 = arith.constant 1 : index
    %c6_110 = arith.constant 6 : index
    %c0_111 = arith.constant 0 : index
    %178 = vector.load %arg8[%c1_109, %c6_110, %c0_111] : memref<14x14x16xf32, #tpu.memory_space<vmem>>, vector<1x8x16xf32>
    %179 = vector.shape_cast %178 : vector<1x8x16xf32> to vector<8x16xf32>
    %180 = vector.broadcast %177 : f32 to vector<8x16xf32>
    %181 = arith.mulf %180, %179 : vector<8x16xf32>
    %182 = arith.addf %176, %181 : vector<8x16xf32>
    %c2_112 = arith.constant 2 : index
    %183 = memref.load %arg2[%c2_112] : memref<98xf32, #tpu.memory_space<smem>>
    %c2_113 = arith.constant 2 : index
    %c0_114 = arith.constant 0 : index
    %c0_115 = arith.constant 0 : index
    %184 = vector.load %arg8[%c2_113, %c0_114, %c0_115] : memref<14x14x16xf32, #tpu.memory_space<vmem>>, vector<1x8x16xf32>
    %185 = vector.shape_cast %184 : vector<1x8x16xf32> to vector<8x16xf32>
    %186 = vector.broadcast %183 : f32 to vector<8x16xf32>
    %187 = arith.mulf %186, %185 : vector<8x16xf32>
    %188 = arith.addf %182, %187 : vector<8x16xf32>
    %c9_116 = arith.constant 9 : index
    %189 = memref.load %arg2[%c9_116] : memref<98xf32, #tpu.memory_space<smem>>
    %c2_117 = arith.constant 2 : index
    %c1_118 = arith.constant 1 : index
    %c0_119 = arith.constant 0 : index
    %190 = vector.load %arg8[%c2_117, %c1_118, %c0_119] : memref<14x14x16xf32, #tpu.memory_space<vmem>>, vector<1x8x16xf32>
    %191 = vector.shape_cast %190 : vector<1x8x16xf32> to vector<8x16xf32>
    %192 = vector.broadcast %189 : f32 to vector<8x16xf32>
    %193 = arith.mulf %192, %191 : vector<8x16xf32>
    %194 = arith.addf %188, %193 : vector<8x16xf32>
    %c16 = arith.constant 16 : index
    %195 = memref.load %arg2[%c16] : memref<98xf32, #tpu.memory_space<smem>>
    %c2_120 = arith.constant 2 : index
    %c2_121 = arith.constant 2 : index
    %c0_122 = arith.constant 0 : index
    %196 = vector.load %arg8[%c2_120, %c2_121, %c0_122] : memref<14x14x16xf32, #tpu.memory_space<vmem>>, vector<1x8x16xf32>
    %197 = vector.shape_cast %196 : vector<1x8x16xf32> to vector<8x16xf32>
    %198 = vector.broadcast %195 : f32 to vector<8x16xf32>
    %199 = arith.mulf %198, %197 : vector<8x16xf32>
    %200 = arith.addf %194, %199 : vector<8x16xf32>
    %c23 = arith.constant 23 : index
    %201 = memref.load %arg2[%c23] : memref<98xf32, #tpu.memory_space<smem>>
    %c2_123 = arith.constant 2 : index
    %c3_124 = arith.constant 3 : index
    %c0_125 = arith.constant 0 : index
    %202 = vector.load %arg8[%c2_123, %c3_124, %c0_125] : memref<14x14x16xf32, #tpu.memory_space<vmem>>, vector<1x8x16xf32>
    %203 = vector.shape_cast %202 : vector<1x8x16xf32> to vector<8x16xf32>
    %204 = vector.broadcast %201 : f32 to vector<8x16xf32>
    %205 = arith.mulf %204, %203 : vector<8x16xf32>
    %206 = arith.addf %200, %205 : vector<8x16xf32>
    %c30 = arith.constant 30 : index
    %207 = memref.load %arg2[%c30] : memref<98xf32, #tpu.memory_space<smem>>
    %c2_126 = arith.constant 2 : index
    %c4_127 = arith.constant 4 : index
    %c0_128 = arith.constant 0 : index
    %208 = vector.load %arg8[%c2_126, %c4_127, %c0_128] : memref<14x14x16xf32, #tpu.memory_space<vmem>>, vector<1x8x16xf32>
    %209 = vector.shape_cast %208 : vector<1x8x16xf32> to vector<8x16xf32>
    %210 = vector.broadcast %207 : f32 to vector<8x16xf32>
    %211 = arith.mulf %210, %209 : vector<8x16xf32>
    %212 = arith.addf %206, %211 : vector<8x16xf32>
    %c37 = arith.constant 37 : index
    %213 = memref.load %arg2[%c37] : memref<98xf32, #tpu.memory_space<smem>>
    %c2_129 = arith.constant 2 : index
    %c5_130 = arith.constant 5 : index
    %c0_131 = arith.constant 0 : index
    %214 = vector.load %arg8[%c2_129, %c5_130, %c0_131] : memref<14x14x16xf32, #tpu.memory_space<vmem>>, vector<1x8x16xf32>
    %215 = vector.shape_cast %214 : vector<1x8x16xf32> to vector<8x16xf32>
    %216 = vector.broadcast %213 : f32 to vector<8x16xf32>
    %217 = arith.mulf %216, %215 : vector<8x16xf32>
    %218 = arith.addf %212, %217 : vector<8x16xf32>
    %c44 = arith.constant 44 : index
    %219 = memref.load %arg2[%c44] : memref<98xf32, #tpu.memory_space<smem>>
    %c2_132 = arith.constant 2 : index
    %c6_133 = arith.constant 6 : index
    %c0_134 = arith.constant 0 : index
    %220 = vector.load %arg8[%c2_132, %c6_133, %c0_134] : memref<14x14x16xf32, #tpu.memory_space<vmem>>, vector<1x8x16xf32>
    %221 = vector.shape_cast %220 : vector<1x8x16xf32> to vector<8x16xf32>
    %222 = vector.broadcast %219 : f32 to vector<8x16xf32>
    %223 = arith.mulf %222, %221 : vector<8x16xf32>
    %224 = arith.addf %218, %223 : vector<8x16xf32>
    %c3_135 = arith.constant 3 : index
    %225 = memref.load %arg2[%c3_135] : memref<98xf32, #tpu.memory_space<smem>>
    %c3_136 = arith.constant 3 : index
    %c0_137 = arith.constant 0 : index
    %c0_138 = arith.constant 0 : index
    %226 = vector.load %arg8[%c3_136, %c0_137, %c0_138] : memref<14x14x16xf32, #tpu.memory_space<vmem>>, vector<1x8x16xf32>
    %227 = vector.shape_cast %226 : vector<1x8x16xf32> to vector<8x16xf32>
    %228 = vector.broadcast %225 : f32 to vector<8x16xf32>
    %229 = arith.mulf %228, %227 : vector<8x16xf32>
    %230 = arith.addf %224, %229 : vector<8x16xf32>
    %c10_139 = arith.constant 10 : index
    %231 = memref.load %arg2[%c10_139] : memref<98xf32, #tpu.memory_space<smem>>
    %c3_140 = arith.constant 3 : index
    %c1_141 = arith.constant 1 : index
    %c0_142 = arith.constant 0 : index
    %232 = vector.load %arg8[%c3_140, %c1_141, %c0_142] : memref<14x14x16xf32, #tpu.memory_space<vmem>>, vector<1x8x16xf32>
    %233 = vector.shape_cast %232 : vector<1x8x16xf32> to vector<8x16xf32>
    %234 = vector.broadcast %231 : f32 to vector<8x16xf32>
    %235 = arith.mulf %234, %233 : vector<8x16xf32>
    %236 = arith.addf %230, %235 : vector<8x16xf32>
    %c17 = arith.constant 17 : index
    %237 = memref.load %arg2[%c17] : memref<98xf32, #tpu.memory_space<smem>>
    %c3_143 = arith.constant 3 : index
    %c2_144 = arith.constant 2 : index
    %c0_145 = arith.constant 0 : index
    %238 = vector.load %arg8[%c3_143, %c2_144, %c0_145] : memref<14x14x16xf32, #tpu.memory_space<vmem>>, vector<1x8x16xf32>
    %239 = vector.shape_cast %238 : vector<1x8x16xf32> to vector<8x16xf32>
    %240 = vector.broadcast %237 : f32 to vector<8x16xf32>
    %241 = arith.mulf %240, %239 : vector<8x16xf32>
    %242 = arith.addf %236, %241 : vector<8x16xf32>
    %c24 = arith.constant 24 : index
    %243 = memref.load %arg2[%c24] : memref<98xf32, #tpu.memory_space<smem>>
    %c3_146 = arith.constant 3 : index
    %c3_147 = arith.constant 3 : index
    %c0_148 = arith.constant 0 : index
    %244 = vector.load %arg8[%c3_146, %c3_147, %c0_148] : memref<14x14x16xf32, #tpu.memory_space<vmem>>, vector<1x8x16xf32>
    %245 = vector.shape_cast %244 : vector<1x8x16xf32> to vector<8x16xf32>
    %246 = vector.broadcast %243 : f32 to vector<8x16xf32>
    %247 = arith.mulf %246, %245 : vector<8x16xf32>
    %248 = arith.addf %242, %247 : vector<8x16xf32>
    %c31 = arith.constant 31 : index
    %249 = memref.load %arg2[%c31] : memref<98xf32, #tpu.memory_space<smem>>
    %c3_149 = arith.constant 3 : index
    %c4_150 = arith.constant 4 : index
    %c0_151 = arith.constant 0 : index
    %250 = vector.load %arg8[%c3_149, %c4_150, %c0_151] : memref<14x14x16xf32, #tpu.memory_space<vmem>>, vector<1x8x16xf32>
    %251 = vector.shape_cast %250 : vector<1x8x16xf32> to vector<8x16xf32>
    %252 = vector.broadcast %249 : f32 to vector<8x16xf32>
    %253 = arith.mulf %252, %251 : vector<8x16xf32>
    %254 = arith.addf %248, %253 : vector<8x16xf32>
    %c38 = arith.constant 38 : index
    %255 = memref.load %arg2[%c38] : memref<98xf32, #tpu.memory_space<smem>>
    %c3_152 = arith.constant 3 : index
    %c5_153 = arith.constant 5 : index
    %c0_154 = arith.constant 0 : index
    %256 = vector.load %arg8[%c3_152, %c5_153, %c0_154] : memref<14x14x16xf32, #tpu.memory_space<vmem>>, vector<1x8x16xf32>
    %257 = vector.shape_cast %256 : vector<1x8x16xf32> to vector<8x16xf32>
    %258 = vector.broadcast %255 : f32 to vector<8x16xf32>
    %259 = arith.mulf %258, %257 : vector<8x16xf32>
    %260 = arith.addf %254, %259 : vector<8x16xf32>
    %c45 = arith.constant 45 : index
    %261 = memref.load %arg2[%c45] : memref<98xf32, #tpu.memory_space<smem>>
    %c3_155 = arith.constant 3 : index
    %c6_156 = arith.constant 6 : index
    %c0_157 = arith.constant 0 : index
    %262 = vector.load %arg8[%c3_155, %c6_156, %c0_157] : memref<14x14x16xf32, #tpu.memory_space<vmem>>, vector<1x8x16xf32>
    %263 = vector.shape_cast %262 : vector<1x8x16xf32> to vector<8x16xf32>
    %264 = vector.broadcast %261 : f32 to vector<8x16xf32>
    %265 = arith.mulf %264, %263 : vector<8x16xf32>
    %266 = arith.addf %260, %265 : vector<8x16xf32>
    %c4_158 = arith.constant 4 : index
    %267 = memref.load %arg2[%c4_158] : memref<98xf32, #tpu.memory_space<smem>>
    %c4_159 = arith.constant 4 : index
    %c0_160 = arith.constant 0 : index
    %c0_161 = arith.constant 0 : index
    %268 = vector.load %arg8[%c4_159, %c0_160, %c0_161] : memref<14x14x16xf32, #tpu.memory_space<vmem>>, vector<1x8x16xf32>
    %269 = vector.shape_cast %268 : vector<1x8x16xf32> to vector<8x16xf32>
    %270 = vector.broadcast %267 : f32 to vector<8x16xf32>
    %271 = arith.mulf %270, %269 : vector<8x16xf32>
    %272 = arith.addf %266, %271 : vector<8x16xf32>
    %c11_162 = arith.constant 11 : index
    %273 = memref.load %arg2[%c11_162] : memref<98xf32, #tpu.memory_space<smem>>
    %c4_163 = arith.constant 4 : index
    %c1_164 = arith.constant 1 : index
    %c0_165 = arith.constant 0 : index
    %274 = vector.load %arg8[%c4_163, %c1_164, %c0_165] : memref<14x14x16xf32, #tpu.memory_space<vmem>>, vector<1x8x16xf32>
    %275 = vector.shape_cast %274 : vector<1x8x16xf32> to vector<8x16xf32>
    %276 = vector.broadcast %273 : f32 to vector<8x16xf32>
    %277 = arith.mulf %276, %275 : vector<8x16xf32>
    %278 = arith.addf %272, %277 : vector<8x16xf32>
    %c18 = arith.constant 18 : index
    %279 = memref.load %arg2[%c18] : memref<98xf32, #tpu.memory_space<smem>>
    %c4_166 = arith.constant 4 : index
    %c2_167 = arith.constant 2 : index
    %c0_168 = arith.constant 0 : index
    %280 = vector.load %arg8[%c4_166, %c2_167, %c0_168] : memref<14x14x16xf32, #tpu.memory_space<vmem>>, vector<1x8x16xf32>
    %281 = vector.shape_cast %280 : vector<1x8x16xf32> to vector<8x16xf32>
    %282 = vector.broadcast %279 : f32 to vector<8x16xf32>
    %283 = arith.mulf %282, %281 : vector<8x16xf32>
    %284 = arith.addf %278, %283 : vector<8x16xf32>
    %c25 = arith.constant 25 : index
    %285 = memref.load %arg2[%c25] : memref<98xf32, #tpu.memory_space<smem>>
    %c4_169 = arith.constant 4 : index
    %c3_170 = arith.constant 3 : index
    %c0_171 = arith.constant 0 : index
    %286 = vector.load %arg8[%c4_169, %c3_170, %c0_171] : memref<14x14x16xf32, #tpu.memory_space<vmem>>, vector<1x8x16xf32>
    %287 = vector.shape_cast %286 : vector<1x8x16xf32> to vector<8x16xf32>
    %288 = vector.broadcast %285 : f32 to vector<8x16xf32>
    %289 = arith.mulf %288, %287 : vector<8x16xf32>
    %290 = arith.addf %284, %289 : vector<8x16xf32>
    %c32 = arith.constant 32 : index
    %291 = memref.load %arg2[%c32] : memref<98xf32, #tpu.memory_space<smem>>
    %c4_172 = arith.constant 4 : index
    %c4_173 = arith.constant 4 : index
    %c0_174 = arith.constant 0 : index
    %292 = vector.load %arg8[%c4_172, %c4_173, %c0_174] : memref<14x14x16xf32, #tpu.memory_space<vmem>>, vector<1x8x16xf32>
    %293 = vector.shape_cast %292 : vector<1x8x16xf32> to vector<8x16xf32>
    %294 = vector.broadcast %291 : f32 to vector<8x16xf32>
    %295 = arith.mulf %294, %293 : vector<8x16xf32>
    %296 = arith.addf %290, %295 : vector<8x16xf32>
    %c39 = arith.constant 39 : index
    %297 = memref.load %arg2[%c39] : memref<98xf32, #tpu.memory_space<smem>>
    %c4_175 = arith.constant 4 : index
    %c5_176 = arith.constant 5 : index
    %c0_177 = arith.constant 0 : index
    %298 = vector.load %arg8[%c4_175, %c5_176, %c0_177] : memref<14x14x16xf32, #tpu.memory_space<vmem>>, vector<1x8x16xf32>
    %299 = vector.shape_cast %298 : vector<1x8x16xf32> to vector<8x16xf32>
    %300 = vector.broadcast %297 : f32 to vector<8x16xf32>
    %301 = arith.mulf %300, %299 : vector<8x16xf32>
    %302 = arith.addf %296, %301 : vector<8x16xf32>
    %c46 = arith.constant 46 : index
    %303 = memref.load %arg2[%c46] : memref<98xf32, #tpu.memory_space<smem>>
    %c4_178 = arith.constant 4 : index
    %c6_179 = arith.constant 6 : index
    %c0_180 = arith.constant 0 : index
    %304 = vector.load %arg8[%c4_178, %c6_179, %c0_180] : memref<14x14x16xf32, #tpu.memory_space<vmem>>, vector<1x8x16xf32>
    %305 = vector.shape_cast %304 : vector<1x8x16xf32> to vector<8x16xf32>
    %306 = vector.broadcast %303 : f32 to vector<8x16xf32>
    %307 = arith.mulf %306, %305 : vector<8x16xf32>
    %308 = arith.addf %302, %307 : vector<8x16xf32>
    %c5_181 = arith.constant 5 : index
    %309 = memref.load %arg2[%c5_181] : memref<98xf32, #tpu.memory_space<smem>>
    %c5_182 = arith.constant 5 : index
    %c0_183 = arith.constant 0 : index
    %c0_184 = arith.constant 0 : index
    %310 = vector.load %arg8[%c5_182, %c0_183, %c0_184] : memref<14x14x16xf32, #tpu.memory_space<vmem>>, vector<1x8x16xf32>
    %311 = vector.shape_cast %310 : vector<1x8x16xf32> to vector<8x16xf32>
    %312 = vector.broadcast %309 : f32 to vector<8x16xf32>
    %313 = arith.mulf %312, %311 : vector<8x16xf32>
    %314 = arith.addf %308, %313 : vector<8x16xf32>
    %c12_185 = arith.constant 12 : index
    %315 = memref.load %arg2[%c12_185] : memref<98xf32, #tpu.memory_space<smem>>
    %c5_186 = arith.constant 5 : index
    %c1_187 = arith.constant 1 : index
    %c0_188 = arith.constant 0 : index
    %316 = vector.load %arg8[%c5_186, %c1_187, %c0_188] : memref<14x14x16xf32, #tpu.memory_space<vmem>>, vector<1x8x16xf32>
    %317 = vector.shape_cast %316 : vector<1x8x16xf32> to vector<8x16xf32>
    %318 = vector.broadcast %315 : f32 to vector<8x16xf32>
    %319 = arith.mulf %318, %317 : vector<8x16xf32>
    %320 = arith.addf %314, %319 : vector<8x16xf32>
    %c19_189 = arith.constant 19 : index
    %321 = memref.load %arg2[%c19_189] : memref<98xf32, #tpu.memory_space<smem>>
    %c5_190 = arith.constant 5 : index
    %c2_191 = arith.constant 2 : index
    %c0_192 = arith.constant 0 : index
    %322 = vector.load %arg8[%c5_190, %c2_191, %c0_192] : memref<14x14x16xf32, #tpu.memory_space<vmem>>, vector<1x8x16xf32>
    %323 = vector.shape_cast %322 : vector<1x8x16xf32> to vector<8x16xf32>
    %324 = vector.broadcast %321 : f32 to vector<8x16xf32>
    %325 = arith.mulf %324, %323 : vector<8x16xf32>
    %326 = arith.addf %320, %325 : vector<8x16xf32>
    %c26 = arith.constant 26 : index
    %327 = memref.load %arg2[%c26] : memref<98xf32, #tpu.memory_space<smem>>
    %c5_193 = arith.constant 5 : index
    %c3_194 = arith.constant 3 : index
    %c0_195 = arith.constant 0 : index
    %328 = vector.load %arg8[%c5_193, %c3_194, %c0_195] : memref<14x14x16xf32, #tpu.memory_space<vmem>>, vector<1x8x16xf32>
    %329 = vector.shape_cast %328 : vector<1x8x16xf32> to vector<8x16xf32>
    %330 = vector.broadcast %327 : f32 to vector<8x16xf32>
    %331 = arith.mulf %330, %329 : vector<8x16xf32>
    %332 = arith.addf %326, %331 : vector<8x16xf32>
    %c33 = arith.constant 33 : index
    %333 = memref.load %arg2[%c33] : memref<98xf32, #tpu.memory_space<smem>>
    %c5_196 = arith.constant 5 : index
    %c4_197 = arith.constant 4 : index
    %c0_198 = arith.constant 0 : index
    %334 = vector.load %arg8[%c5_196, %c4_197, %c0_198] : memref<14x14x16xf32, #tpu.memory_space<vmem>>, vector<1x8x16xf32>
    %335 = vector.shape_cast %334 : vector<1x8x16xf32> to vector<8x16xf32>
    %336 = vector.broadcast %333 : f32 to vector<8x16xf32>
    %337 = arith.mulf %336, %335 : vector<8x16xf32>
    %338 = arith.addf %332, %337 : vector<8x16xf32>
    %c40 = arith.constant 40 : index
    %339 = memref.load %arg2[%c40] : memref<98xf32, #tpu.memory_space<smem>>
    %c5_199 = arith.constant 5 : index
    %c5_200 = arith.constant 5 : index
    %c0_201 = arith.constant 0 : index
    %340 = vector.load %arg8[%c5_199, %c5_200, %c0_201] : memref<14x14x16xf32, #tpu.memory_space<vmem>>, vector<1x8x16xf32>
    %341 = vector.shape_cast %340 : vector<1x8x16xf32> to vector<8x16xf32>
    %342 = vector.broadcast %339 : f32 to vector<8x16xf32>
    %343 = arith.mulf %342, %341 : vector<8x16xf32>
    %344 = arith.addf %338, %343 : vector<8x16xf32>
    %c47 = arith.constant 47 : index
    %345 = memref.load %arg2[%c47] : memref<98xf32, #tpu.memory_space<smem>>
    %c5_202 = arith.constant 5 : index
    %c6_203 = arith.constant 6 : index
    %c0_204 = arith.constant 0 : index
    %346 = vector.load %arg8[%c5_202, %c6_203, %c0_204] : memref<14x14x16xf32, #tpu.memory_space<vmem>>, vector<1x8x16xf32>
    %347 = vector.shape_cast %346 : vector<1x8x16xf32> to vector<8x16xf32>
    %348 = vector.broadcast %345 : f32 to vector<8x16xf32>
    %349 = arith.mulf %348, %347 : vector<8x16xf32>
    %350 = arith.addf %344, %349 : vector<8x16xf32>
    %c6_205 = arith.constant 6 : index
    %351 = memref.load %arg2[%c6_205] : memref<98xf32, #tpu.memory_space<smem>>
    %c6_206 = arith.constant 6 : index
    %c0_207 = arith.constant 0 : index
    %c0_208 = arith.constant 0 : index
    %352 = vector.load %arg8[%c6_206, %c0_207, %c0_208] : memref<14x14x16xf32, #tpu.memory_space<vmem>>, vector<1x8x16xf32>
    %353 = vector.shape_cast %352 : vector<1x8x16xf32> to vector<8x16xf32>
    %354 = vector.broadcast %351 : f32 to vector<8x16xf32>
    %355 = arith.mulf %354, %353 : vector<8x16xf32>
    %356 = arith.addf %350, %355 : vector<8x16xf32>
    %c13_209 = arith.constant 13 : index
    %357 = memref.load %arg2[%c13_209] : memref<98xf32, #tpu.memory_space<smem>>
    %c6_210 = arith.constant 6 : index
    %c1_211 = arith.constant 1 : index
    %c0_212 = arith.constant 0 : index
    %358 = vector.load %arg8[%c6_210, %c1_211, %c0_212] : memref<14x14x16xf32, #tpu.memory_space<vmem>>, vector<1x8x16xf32>
    %359 = vector.shape_cast %358 : vector<1x8x16xf32> to vector<8x16xf32>
    %360 = vector.broadcast %357 : f32 to vector<8x16xf32>
    %361 = arith.mulf %360, %359 : vector<8x16xf32>
    %362 = arith.addf %356, %361 : vector<8x16xf32>
    %c20 = arith.constant 20 : index
    %363 = memref.load %arg2[%c20] : memref<98xf32, #tpu.memory_space<smem>>
    %c6_213 = arith.constant 6 : index
    %c2_214 = arith.constant 2 : index
    %c0_215 = arith.constant 0 : index
    %364 = vector.load %arg8[%c6_213, %c2_214, %c0_215] : memref<14x14x16xf32, #tpu.memory_space<vmem>>, vector<1x8x16xf32>
    %365 = vector.shape_cast %364 : vector<1x8x16xf32> to vector<8x16xf32>
    %366 = vector.broadcast %363 : f32 to vector<8x16xf32>
    %367 = arith.mulf %366, %365 : vector<8x16xf32>
    %368 = arith.addf %362, %367 : vector<8x16xf32>
    %c27 = arith.constant 27 : index
    %369 = memref.load %arg2[%c27] : memref<98xf32, #tpu.memory_space<smem>>
    %c6_216 = arith.constant 6 : index
    %c3_217 = arith.constant 3 : index
    %c0_218 = arith.constant 0 : index
    %370 = vector.load %arg8[%c6_216, %c3_217, %c0_218] : memref<14x14x16xf32, #tpu.memory_space<vmem>>, vector<1x8x16xf32>
    %371 = vector.shape_cast %370 : vector<1x8x16xf32> to vector<8x16xf32>
    %372 = vector.broadcast %369 : f32 to vector<8x16xf32>
    %373 = arith.mulf %372, %371 : vector<8x16xf32>
    %374 = arith.addf %368, %373 : vector<8x16xf32>
    %c34 = arith.constant 34 : index
    %375 = memref.load %arg2[%c34] : memref<98xf32, #tpu.memory_space<smem>>
    %c6_219 = arith.constant 6 : index
    %c4_220 = arith.constant 4 : index
    %c0_221 = arith.constant 0 : index
    %376 = vector.load %arg8[%c6_219, %c4_220, %c0_221] : memref<14x14x16xf32, #tpu.memory_space<vmem>>, vector<1x8x16xf32>
    %377 = vector.shape_cast %376 : vector<1x8x16xf32> to vector<8x16xf32>
    %378 = vector.broadcast %375 : f32 to vector<8x16xf32>
    %379 = arith.mulf %378, %377 : vector<8x16xf32>
    %380 = arith.addf %374, %379 : vector<8x16xf32>
    %c41 = arith.constant 41 : index
    %381 = memref.load %arg2[%c41] : memref<98xf32, #tpu.memory_space<smem>>
    %c6_222 = arith.constant 6 : index
    %c5_223 = arith.constant 5 : index
    %c0_224 = arith.constant 0 : index
    %382 = vector.load %arg8[%c6_222, %c5_223, %c0_224] : memref<14x14x16xf32, #tpu.memory_space<vmem>>, vector<1x8x16xf32>
    %383 = vector.shape_cast %382 : vector<1x8x16xf32> to vector<8x16xf32>
    %384 = vector.broadcast %381 : f32 to vector<8x16xf32>
    %385 = arith.mulf %384, %383 : vector<8x16xf32>
    %386 = arith.addf %380, %385 : vector<8x16xf32>
    %c48 = arith.constant 48 : index
    %387 = memref.load %arg2[%c48] : memref<98xf32, #tpu.memory_space<smem>>
    %c6_225 = arith.constant 6 : index
    %c6_226 = arith.constant 6 : index
    %c0_227 = arith.constant 0 : index
    %388 = vector.load %arg8[%c6_225, %c6_226, %c0_227] : memref<14x14x16xf32, #tpu.memory_space<vmem>>, vector<1x8x16xf32>
    %389 = vector.shape_cast %388 : vector<1x8x16xf32> to vector<8x16xf32>
    %390 = vector.broadcast %387 : f32 to vector<8x16xf32>
    %391 = arith.mulf %390, %389 : vector<8x16xf32>
    %392 = arith.addf %386, %391 : vector<8x16xf32>
    %c49 = arith.constant 49 : index
    %393 = memref.load %arg2[%c49] : memref<98xf32, #tpu.memory_space<smem>>
    %c7_228 = arith.constant 7 : index
    %c0_229 = arith.constant 0 : index
    %c0_230 = arith.constant 0 : index
    %394 = vector.load %arg8[%c7_228, %c0_229, %c0_230] : memref<14x14x16xf32, #tpu.memory_space<vmem>>, vector<1x8x16xf32>
    %395 = vector.shape_cast %394 : vector<1x8x16xf32> to vector<8x16xf32>
    %396 = vector.broadcast %393 : f32 to vector<8x16xf32>
    %397 = arith.mulf %396, %395 : vector<8x16xf32>
    %398 = arith.addf %392, %397 : vector<8x16xf32>
    %c56 = arith.constant 56 : index
    %399 = memref.load %arg2[%c56] : memref<98xf32, #tpu.memory_space<smem>>
    %c7_231 = arith.constant 7 : index
    %c1_232 = arith.constant 1 : index
    %c0_233 = arith.constant 0 : index
    %400 = vector.load %arg8[%c7_231, %c1_232, %c0_233] : memref<14x14x16xf32, #tpu.memory_space<vmem>>, vector<1x8x16xf32>
    %401 = vector.shape_cast %400 : vector<1x8x16xf32> to vector<8x16xf32>
    %402 = vector.broadcast %399 : f32 to vector<8x16xf32>
    %403 = arith.mulf %402, %401 : vector<8x16xf32>
    %404 = arith.addf %398, %403 : vector<8x16xf32>
    %c63 = arith.constant 63 : index
    %405 = memref.load %arg2[%c63] : memref<98xf32, #tpu.memory_space<smem>>
    %c7_234 = arith.constant 7 : index
    %c2_235 = arith.constant 2 : index
    %c0_236 = arith.constant 0 : index
    %406 = vector.load %arg8[%c7_234, %c2_235, %c0_236] : memref<14x14x16xf32, #tpu.memory_space<vmem>>, vector<1x8x16xf32>
    %407 = vector.shape_cast %406 : vector<1x8x16xf32> to vector<8x16xf32>
    %408 = vector.broadcast %405 : f32 to vector<8x16xf32>
    %409 = arith.mulf %408, %407 : vector<8x16xf32>
    %410 = arith.addf %404, %409 : vector<8x16xf32>
    %c70 = arith.constant 70 : index
    %411 = memref.load %arg2[%c70] : memref<98xf32, #tpu.memory_space<smem>>
    %c7_237 = arith.constant 7 : index
    %c3_238 = arith.constant 3 : index
    %c0_239 = arith.constant 0 : index
    %412 = vector.load %arg8[%c7_237, %c3_238, %c0_239] : memref<14x14x16xf32, #tpu.memory_space<vmem>>, vector<1x8x16xf32>
    %413 = vector.shape_cast %412 : vector<1x8x16xf32> to vector<8x16xf32>
    %414 = vector.broadcast %411 : f32 to vector<8x16xf32>
    %415 = arith.mulf %414, %413 : vector<8x16xf32>
    %416 = arith.addf %410, %415 : vector<8x16xf32>
    %c77 = arith.constant 77 : index
    %417 = memref.load %arg2[%c77] : memref<98xf32, #tpu.memory_space<smem>>
    %c7_240 = arith.constant 7 : index
    %c4_241 = arith.constant 4 : index
    %c0_242 = arith.constant 0 : index
    %418 = vector.load %arg8[%c7_240, %c4_241, %c0_242] : memref<14x14x16xf32, #tpu.memory_space<vmem>>, vector<1x8x16xf32>
    %419 = vector.shape_cast %418 : vector<1x8x16xf32> to vector<8x16xf32>
    %420 = vector.broadcast %417 : f32 to vector<8x16xf32>
    %421 = arith.mulf %420, %419 : vector<8x16xf32>
    %422 = arith.addf %416, %421 : vector<8x16xf32>
    %c84 = arith.constant 84 : index
    %423 = memref.load %arg2[%c84] : memref<98xf32, #tpu.memory_space<smem>>
    %c7_243 = arith.constant 7 : index
    %c5_244 = arith.constant 5 : index
    %c0_245 = arith.constant 0 : index
    %424 = vector.load %arg8[%c7_243, %c5_244, %c0_245] : memref<14x14x16xf32, #tpu.memory_space<vmem>>, vector<1x8x16xf32>
    %425 = vector.shape_cast %424 : vector<1x8x16xf32> to vector<8x16xf32>
    %426 = vector.broadcast %423 : f32 to vector<8x16xf32>
    %427 = arith.mulf %426, %425 : vector<8x16xf32>
    %428 = arith.addf %422, %427 : vector<8x16xf32>
    %c91 = arith.constant 91 : index
    %429 = memref.load %arg2[%c91] : memref<98xf32, #tpu.memory_space<smem>>
    %c7_246 = arith.constant 7 : index
    %c6_247 = arith.constant 6 : index
    %c0_248 = arith.constant 0 : index
    %430 = vector.load %arg8[%c7_246, %c6_247, %c0_248] : memref<14x14x16xf32, #tpu.memory_space<vmem>>, vector<1x8x16xf32>
    %431 = vector.shape_cast %430 : vector<1x8x16xf32> to vector<8x16xf32>
    %432 = vector.broadcast %429 : f32 to vector<8x16xf32>
    %433 = arith.mulf %432, %431 : vector<8x16xf32>
    %434 = arith.addf %428, %433 : vector<8x16xf32>
    %c50 = arith.constant 50 : index
    %435 = memref.load %arg2[%c50] : memref<98xf32, #tpu.memory_space<smem>>
    %c8_249 = arith.constant 8 : index
    %c0_250 = arith.constant 0 : index
    %c0_251 = arith.constant 0 : index
    %436 = vector.load %arg8[%c8_249, %c0_250, %c0_251] : memref<14x14x16xf32, #tpu.memory_space<vmem>>, vector<1x8x16xf32>
    %437 = vector.shape_cast %436 : vector<1x8x16xf32> to vector<8x16xf32>
    %438 = vector.broadcast %435 : f32 to vector<8x16xf32>
    %439 = arith.mulf %438, %437 : vector<8x16xf32>
    %440 = arith.addf %434, %439 : vector<8x16xf32>
    %c57 = arith.constant 57 : index
    %441 = memref.load %arg2[%c57] : memref<98xf32, #tpu.memory_space<smem>>
    %c8_252 = arith.constant 8 : index
    %c1_253 = arith.constant 1 : index
    %c0_254 = arith.constant 0 : index
    %442 = vector.load %arg8[%c8_252, %c1_253, %c0_254] : memref<14x14x16xf32, #tpu.memory_space<vmem>>, vector<1x8x16xf32>
    %443 = vector.shape_cast %442 : vector<1x8x16xf32> to vector<8x16xf32>
    %444 = vector.broadcast %441 : f32 to vector<8x16xf32>
    %445 = arith.mulf %444, %443 : vector<8x16xf32>
    %446 = arith.addf %440, %445 : vector<8x16xf32>
    %c64 = arith.constant 64 : index
    %447 = memref.load %arg2[%c64] : memref<98xf32, #tpu.memory_space<smem>>
    %c8_255 = arith.constant 8 : index
    %c2_256 = arith.constant 2 : index
    %c0_257 = arith.constant 0 : index
    %448 = vector.load %arg8[%c8_255, %c2_256, %c0_257] : memref<14x14x16xf32, #tpu.memory_space<vmem>>, vector<1x8x16xf32>
    %449 = vector.shape_cast %448 : vector<1x8x16xf32> to vector<8x16xf32>
    %450 = vector.broadcast %447 : f32 to vector<8x16xf32>
    %451 = arith.mulf %450, %449 : vector<8x16xf32>
    %452 = arith.addf %446, %451 : vector<8x16xf32>
    %c71 = arith.constant 71 : index
    %453 = memref.load %arg2[%c71] : memref<98xf32, #tpu.memory_space<smem>>
    %c8_258 = arith.constant 8 : index
    %c3_259 = arith.constant 3 : index
    %c0_260 = arith.constant 0 : index
    %454 = vector.load %arg8[%c8_258, %c3_259, %c0_260] : memref<14x14x16xf32, #tpu.memory_space<vmem>>, vector<1x8x16xf32>
    %455 = vector.shape_cast %454 : vector<1x8x16xf32> to vector<8x16xf32>
    %456 = vector.broadcast %453 : f32 to vector<8x16xf32>
    %457 = arith.mulf %456, %455 : vector<8x16xf32>
    %458 = arith.addf %452, %457 : vector<8x16xf32>
    %c78 = arith.constant 78 : index
    %459 = memref.load %arg2[%c78] : memref<98xf32, #tpu.memory_space<smem>>
    %c8_261 = arith.constant 8 : index
    %c4_262 = arith.constant 4 : index
    %c0_263 = arith.constant 0 : index
    %460 = vector.load %arg8[%c8_261, %c4_262, %c0_263] : memref<14x14x16xf32, #tpu.memory_space<vmem>>, vector<1x8x16xf32>
    %461 = vector.shape_cast %460 : vector<1x8x16xf32> to vector<8x16xf32>
    %462 = vector.broadcast %459 : f32 to vector<8x16xf32>
    %463 = arith.mulf %462, %461 : vector<8x16xf32>
    %464 = arith.addf %458, %463 : vector<8x16xf32>
    %c85 = arith.constant 85 : index
    %465 = memref.load %arg2[%c85] : memref<98xf32, #tpu.memory_space<smem>>
    %c8_264 = arith.constant 8 : index
    %c5_265 = arith.constant 5 : index
    %c0_266 = arith.constant 0 : index
    %466 = vector.load %arg8[%c8_264, %c5_265, %c0_266] : memref<14x14x16xf32, #tpu.memory_space<vmem>>, vector<1x8x16xf32>
    %467 = vector.shape_cast %466 : vector<1x8x16xf32> to vector<8x16xf32>
    %468 = vector.broadcast %465 : f32 to vector<8x16xf32>
    %469 = arith.mulf %468, %467 : vector<8x16xf32>
    %470 = arith.addf %464, %469 : vector<8x16xf32>
    %c92 = arith.constant 92 : index
    %471 = memref.load %arg2[%c92] : memref<98xf32, #tpu.memory_space<smem>>
    %c8_267 = arith.constant 8 : index
    %c6_268 = arith.constant 6 : index
    %c0_269 = arith.constant 0 : index
    %472 = vector.load %arg8[%c8_267, %c6_268, %c0_269] : memref<14x14x16xf32, #tpu.memory_space<vmem>>, vector<1x8x16xf32>
    %473 = vector.shape_cast %472 : vector<1x8x16xf32> to vector<8x16xf32>
    %474 = vector.broadcast %471 : f32 to vector<8x16xf32>
    %475 = arith.mulf %474, %473 : vector<8x16xf32>
    %476 = arith.addf %470, %475 : vector<8x16xf32>
    %c51 = arith.constant 51 : index
    %477 = memref.load %arg2[%c51] : memref<98xf32, #tpu.memory_space<smem>>
    %c9_270 = arith.constant 9 : index
    %c0_271 = arith.constant 0 : index
    %c0_272 = arith.constant 0 : index
    %478 = vector.load %arg8[%c9_270, %c0_271, %c0_272] : memref<14x14x16xf32, #tpu.memory_space<vmem>>, vector<1x8x16xf32>
    %479 = vector.shape_cast %478 : vector<1x8x16xf32> to vector<8x16xf32>
    %480 = vector.broadcast %477 : f32 to vector<8x16xf32>
    %481 = arith.mulf %480, %479 : vector<8x16xf32>
    %482 = arith.addf %476, %481 : vector<8x16xf32>
    %c58 = arith.constant 58 : index
    %483 = memref.load %arg2[%c58] : memref<98xf32, #tpu.memory_space<smem>>
    %c9_273 = arith.constant 9 : index
    %c1_274 = arith.constant 1 : index
    %c0_275 = arith.constant 0 : index
    %484 = vector.load %arg8[%c9_273, %c1_274, %c0_275] : memref<14x14x16xf32, #tpu.memory_space<vmem>>, vector<1x8x16xf32>
    %485 = vector.shape_cast %484 : vector<1x8x16xf32> to vector<8x16xf32>
    %486 = vector.broadcast %483 : f32 to vector<8x16xf32>
    %487 = arith.mulf %486, %485 : vector<8x16xf32>
    %488 = arith.addf %482, %487 : vector<8x16xf32>
    %c65 = arith.constant 65 : index
    %489 = memref.load %arg2[%c65] : memref<98xf32, #tpu.memory_space<smem>>
    %c9_276 = arith.constant 9 : index
    %c2_277 = arith.constant 2 : index
    %c0_278 = arith.constant 0 : index
    %490 = vector.load %arg8[%c9_276, %c2_277, %c0_278] : memref<14x14x16xf32, #tpu.memory_space<vmem>>, vector<1x8x16xf32>
    %491 = vector.shape_cast %490 : vector<1x8x16xf32> to vector<8x16xf32>
    %492 = vector.broadcast %489 : f32 to vector<8x16xf32>
    %493 = arith.mulf %492, %491 : vector<8x16xf32>
    %494 = arith.addf %488, %493 : vector<8x16xf32>
    %c72 = arith.constant 72 : index
    %495 = memref.load %arg2[%c72] : memref<98xf32, #tpu.memory_space<smem>>
    %c9_279 = arith.constant 9 : index
    %c3_280 = arith.constant 3 : index
    %c0_281 = arith.constant 0 : index
    %496 = vector.load %arg8[%c9_279, %c3_280, %c0_281] : memref<14x14x16xf32, #tpu.memory_space<vmem>>, vector<1x8x16xf32>
    %497 = vector.shape_cast %496 : vector<1x8x16xf32> to vector<8x16xf32>
    %498 = vector.broadcast %495 : f32 to vector<8x16xf32>
    %499 = arith.mulf %498, %497 : vector<8x16xf32>
    %500 = arith.addf %494, %499 : vector<8x16xf32>
    %c79 = arith.constant 79 : index
    %501 = memref.load %arg2[%c79] : memref<98xf32, #tpu.memory_space<smem>>
    %c9_282 = arith.constant 9 : index
    %c4_283 = arith.constant 4 : index
    %c0_284 = arith.constant 0 : index
    %502 = vector.load %arg8[%c9_282, %c4_283, %c0_284] : memref<14x14x16xf32, #tpu.memory_space<vmem>>, vector<1x8x16xf32>
    %503 = vector.shape_cast %502 : vector<1x8x16xf32> to vector<8x16xf32>
    %504 = vector.broadcast %501 : f32 to vector<8x16xf32>
    %505 = arith.mulf %504, %503 : vector<8x16xf32>
    %506 = arith.addf %500, %505 : vector<8x16xf32>
    %c86 = arith.constant 86 : index
    %507 = memref.load %arg2[%c86] : memref<98xf32, #tpu.memory_space<smem>>
    %c9_285 = arith.constant 9 : index
    %c5_286 = arith.constant 5 : index
    %c0_287 = arith.constant 0 : index
    %508 = vector.load %arg8[%c9_285, %c5_286, %c0_287] : memref<14x14x16xf32, #tpu.memory_space<vmem>>, vector<1x8x16xf32>
    %509 = vector.shape_cast %508 : vector<1x8x16xf32> to vector<8x16xf32>
    %510 = vector.broadcast %507 : f32 to vector<8x16xf32>
    %511 = arith.mulf %510, %509 : vector<8x16xf32>
    %512 = arith.addf %506, %511 : vector<8x16xf32>
    %c93 = arith.constant 93 : index
    %513 = memref.load %arg2[%c93] : memref<98xf32, #tpu.memory_space<smem>>
    %c9_288 = arith.constant 9 : index
    %c6_289 = arith.constant 6 : index
    %c0_290 = arith.constant 0 : index
    %514 = vector.load %arg8[%c9_288, %c6_289, %c0_290] : memref<14x14x16xf32, #tpu.memory_space<vmem>>, vector<1x8x16xf32>
    %515 = vector.shape_cast %514 : vector<1x8x16xf32> to vector<8x16xf32>
    %516 = vector.broadcast %513 : f32 to vector<8x16xf32>
    %517 = arith.mulf %516, %515 : vector<8x16xf32>
    %518 = arith.addf %512, %517 : vector<8x16xf32>
    %c52 = arith.constant 52 : index
    %519 = memref.load %arg2[%c52] : memref<98xf32, #tpu.memory_space<smem>>
    %c10_291 = arith.constant 10 : index
    %c0_292 = arith.constant 0 : index
    %c0_293 = arith.constant 0 : index
    %520 = vector.load %arg8[%c10_291, %c0_292, %c0_293] : memref<14x14x16xf32, #tpu.memory_space<vmem>>, vector<1x8x16xf32>
    %521 = vector.shape_cast %520 : vector<1x8x16xf32> to vector<8x16xf32>
    %522 = vector.broadcast %519 : f32 to vector<8x16xf32>
    %523 = arith.mulf %522, %521 : vector<8x16xf32>
    %524 = arith.addf %518, %523 : vector<8x16xf32>
    %c59 = arith.constant 59 : index
    %525 = memref.load %arg2[%c59] : memref<98xf32, #tpu.memory_space<smem>>
    %c10_294 = arith.constant 10 : index
    %c1_295 = arith.constant 1 : index
    %c0_296 = arith.constant 0 : index
    %526 = vector.load %arg8[%c10_294, %c1_295, %c0_296] : memref<14x14x16xf32, #tpu.memory_space<vmem>>, vector<1x8x16xf32>
    %527 = vector.shape_cast %526 : vector<1x8x16xf32> to vector<8x16xf32>
    %528 = vector.broadcast %525 : f32 to vector<8x16xf32>
    %529 = arith.mulf %528, %527 : vector<8x16xf32>
    %530 = arith.addf %524, %529 : vector<8x16xf32>
    %c66 = arith.constant 66 : index
    %531 = memref.load %arg2[%c66] : memref<98xf32, #tpu.memory_space<smem>>
    %c10_297 = arith.constant 10 : index
    %c2_298 = arith.constant 2 : index
    %c0_299 = arith.constant 0 : index
    %532 = vector.load %arg8[%c10_297, %c2_298, %c0_299] : memref<14x14x16xf32, #tpu.memory_space<vmem>>, vector<1x8x16xf32>
    %533 = vector.shape_cast %532 : vector<1x8x16xf32> to vector<8x16xf32>
    %534 = vector.broadcast %531 : f32 to vector<8x16xf32>
    %535 = arith.mulf %534, %533 : vector<8x16xf32>
    %536 = arith.addf %530, %535 : vector<8x16xf32>
    %c73 = arith.constant 73 : index
    %537 = memref.load %arg2[%c73] : memref<98xf32, #tpu.memory_space<smem>>
    %c10_300 = arith.constant 10 : index
    %c3_301 = arith.constant 3 : index
    %c0_302 = arith.constant 0 : index
    %538 = vector.load %arg8[%c10_300, %c3_301, %c0_302] : memref<14x14x16xf32, #tpu.memory_space<vmem>>, vector<1x8x16xf32>
    %539 = vector.shape_cast %538 : vector<1x8x16xf32> to vector<8x16xf32>
    %540 = vector.broadcast %537 : f32 to vector<8x16xf32>
    %541 = arith.mulf %540, %539 : vector<8x16xf32>
    %542 = arith.addf %536, %541 : vector<8x16xf32>
    %c80 = arith.constant 80 : index
    %543 = memref.load %arg2[%c80] : memref<98xf32, #tpu.memory_space<smem>>
    %c10_303 = arith.constant 10 : index
    %c4_304 = arith.constant 4 : index
    %c0_305 = arith.constant 0 : index
    %544 = vector.load %arg8[%c10_303, %c4_304, %c0_305] : memref<14x14x16xf32, #tpu.memory_space<vmem>>, vector<1x8x16xf32>
    %545 = vector.shape_cast %544 : vector<1x8x16xf32> to vector<8x16xf32>
    %546 = vector.broadcast %543 : f32 to vector<8x16xf32>
    %547 = arith.mulf %546, %545 : vector<8x16xf32>
    %548 = arith.addf %542, %547 : vector<8x16xf32>
    %c87 = arith.constant 87 : index
    %549 = memref.load %arg2[%c87] : memref<98xf32, #tpu.memory_space<smem>>
    %c10_306 = arith.constant 10 : index
    %c5_307 = arith.constant 5 : index
    %c0_308 = arith.constant 0 : index
    %550 = vector.load %arg8[%c10_306, %c5_307, %c0_308] : memref<14x14x16xf32, #tpu.memory_space<vmem>>, vector<1x8x16xf32>
    %551 = vector.shape_cast %550 : vector<1x8x16xf32> to vector<8x16xf32>
    %552 = vector.broadcast %549 : f32 to vector<8x16xf32>
    %553 = arith.mulf %552, %551 : vector<8x16xf32>
    %554 = arith.addf %548, %553 : vector<8x16xf32>
    %c94 = arith.constant 94 : index
    %555 = memref.load %arg2[%c94] : memref<98xf32, #tpu.memory_space<smem>>
    %c10_309 = arith.constant 10 : index
    %c6_310 = arith.constant 6 : index
    %c0_311 = arith.constant 0 : index
    %556 = vector.load %arg8[%c10_309, %c6_310, %c0_311] : memref<14x14x16xf32, #tpu.memory_space<vmem>>, vector<1x8x16xf32>
    %557 = vector.shape_cast %556 : vector<1x8x16xf32> to vector<8x16xf32>
    %558 = vector.broadcast %555 : f32 to vector<8x16xf32>
    %559 = arith.mulf %558, %557 : vector<8x16xf32>
    %560 = arith.addf %554, %559 : vector<8x16xf32>
    %c53 = arith.constant 53 : index
    %561 = memref.load %arg2[%c53] : memref<98xf32, #tpu.memory_space<smem>>
    %c11_312 = arith.constant 11 : index
    %c0_313 = arith.constant 0 : index
    %c0_314 = arith.constant 0 : index
    %562 = vector.load %arg8[%c11_312, %c0_313, %c0_314] : memref<14x14x16xf32, #tpu.memory_space<vmem>>, vector<1x8x16xf32>
    %563 = vector.shape_cast %562 : vector<1x8x16xf32> to vector<8x16xf32>
    %564 = vector.broadcast %561 : f32 to vector<8x16xf32>
    %565 = arith.mulf %564, %563 : vector<8x16xf32>
    %566 = arith.addf %560, %565 : vector<8x16xf32>
    %c60 = arith.constant 60 : index
    %567 = memref.load %arg2[%c60] : memref<98xf32, #tpu.memory_space<smem>>
    %c11_315 = arith.constant 11 : index
    %c1_316 = arith.constant 1 : index
    %c0_317 = arith.constant 0 : index
    %568 = vector.load %arg8[%c11_315, %c1_316, %c0_317] : memref<14x14x16xf32, #tpu.memory_space<vmem>>, vector<1x8x16xf32>
    %569 = vector.shape_cast %568 : vector<1x8x16xf32> to vector<8x16xf32>
    %570 = vector.broadcast %567 : f32 to vector<8x16xf32>
    %571 = arith.mulf %570, %569 : vector<8x16xf32>
    %572 = arith.addf %566, %571 : vector<8x16xf32>
    %c67 = arith.constant 67 : index
    %573 = memref.load %arg2[%c67] : memref<98xf32, #tpu.memory_space<smem>>
    %c11_318 = arith.constant 11 : index
    %c2_319 = arith.constant 2 : index
    %c0_320 = arith.constant 0 : index
    %574 = vector.load %arg8[%c11_318, %c2_319, %c0_320] : memref<14x14x16xf32, #tpu.memory_space<vmem>>, vector<1x8x16xf32>
    %575 = vector.shape_cast %574 : vector<1x8x16xf32> to vector<8x16xf32>
    %576 = vector.broadcast %573 : f32 to vector<8x16xf32>
    %577 = arith.mulf %576, %575 : vector<8x16xf32>
    %578 = arith.addf %572, %577 : vector<8x16xf32>
    %c74 = arith.constant 74 : index
    %579 = memref.load %arg2[%c74] : memref<98xf32, #tpu.memory_space<smem>>
    %c11_321 = arith.constant 11 : index
    %c3_322 = arith.constant 3 : index
    %c0_323 = arith.constant 0 : index
    %580 = vector.load %arg8[%c11_321, %c3_322, %c0_323] : memref<14x14x16xf32, #tpu.memory_space<vmem>>, vector<1x8x16xf32>
    %581 = vector.shape_cast %580 : vector<1x8x16xf32> to vector<8x16xf32>
    %582 = vector.broadcast %579 : f32 to vector<8x16xf32>
    %583 = arith.mulf %582, %581 : vector<8x16xf32>
    %584 = arith.addf %578, %583 : vector<8x16xf32>
    %c81 = arith.constant 81 : index
    %585 = memref.load %arg2[%c81] : memref<98xf32, #tpu.memory_space<smem>>
    %c11_324 = arith.constant 11 : index
    %c4_325 = arith.constant 4 : index
    %c0_326 = arith.constant 0 : index
    %586 = vector.load %arg8[%c11_324, %c4_325, %c0_326] : memref<14x14x16xf32, #tpu.memory_space<vmem>>, vector<1x8x16xf32>
    %587 = vector.shape_cast %586 : vector<1x8x16xf32> to vector<8x16xf32>
    %588 = vector.broadcast %585 : f32 to vector<8x16xf32>
    %589 = arith.mulf %588, %587 : vector<8x16xf32>
    %590 = arith.addf %584, %589 : vector<8x16xf32>
    %c88 = arith.constant 88 : index
    %591 = memref.load %arg2[%c88] : memref<98xf32, #tpu.memory_space<smem>>
    %c11_327 = arith.constant 11 : index
    %c5_328 = arith.constant 5 : index
    %c0_329 = arith.constant 0 : index
    %592 = vector.load %arg8[%c11_327, %c5_328, %c0_329] : memref<14x14x16xf32, #tpu.memory_space<vmem>>, vector<1x8x16xf32>
    %593 = vector.shape_cast %592 : vector<1x8x16xf32> to vector<8x16xf32>
    %594 = vector.broadcast %591 : f32 to vector<8x16xf32>
    %595 = arith.mulf %594, %593 : vector<8x16xf32>
    %596 = arith.addf %590, %595 : vector<8x16xf32>
    %c95 = arith.constant 95 : index
    %597 = memref.load %arg2[%c95] : memref<98xf32, #tpu.memory_space<smem>>
    %c11_330 = arith.constant 11 : index
    %c6_331 = arith.constant 6 : index
    %c0_332 = arith.constant 0 : index
    %598 = vector.load %arg8[%c11_330, %c6_331, %c0_332] : memref<14x14x16xf32, #tpu.memory_space<vmem>>, vector<1x8x16xf32>
    %599 = vector.shape_cast %598 : vector<1x8x16xf32> to vector<8x16xf32>
    %600 = vector.broadcast %597 : f32 to vector<8x16xf32>
    %601 = arith.mulf %600, %599 : vector<8x16xf32>
    %602 = arith.addf %596, %601 : vector<8x16xf32>
    %c54 = arith.constant 54 : index
    %603 = memref.load %arg2[%c54] : memref<98xf32, #tpu.memory_space<smem>>
    %c12_333 = arith.constant 12 : index
    %c0_334 = arith.constant 0 : index
    %c0_335 = arith.constant 0 : index
    %604 = vector.load %arg8[%c12_333, %c0_334, %c0_335] : memref<14x14x16xf32, #tpu.memory_space<vmem>>, vector<1x8x16xf32>
    %605 = vector.shape_cast %604 : vector<1x8x16xf32> to vector<8x16xf32>
    %606 = vector.broadcast %603 : f32 to vector<8x16xf32>
    %607 = arith.mulf %606, %605 : vector<8x16xf32>
    %608 = arith.addf %602, %607 : vector<8x16xf32>
    %c61 = arith.constant 61 : index
    %609 = memref.load %arg2[%c61] : memref<98xf32, #tpu.memory_space<smem>>
    %c12_336 = arith.constant 12 : index
    %c1_337 = arith.constant 1 : index
    %c0_338 = arith.constant 0 : index
    %610 = vector.load %arg8[%c12_336, %c1_337, %c0_338] : memref<14x14x16xf32, #tpu.memory_space<vmem>>, vector<1x8x16xf32>
    %611 = vector.shape_cast %610 : vector<1x8x16xf32> to vector<8x16xf32>
    %612 = vector.broadcast %609 : f32 to vector<8x16xf32>
    %613 = arith.mulf %612, %611 : vector<8x16xf32>
    %614 = arith.addf %608, %613 : vector<8x16xf32>
    %c68 = arith.constant 68 : index
    %615 = memref.load %arg2[%c68] : memref<98xf32, #tpu.memory_space<smem>>
    %c12_339 = arith.constant 12 : index
    %c2_340 = arith.constant 2 : index
    %c0_341 = arith.constant 0 : index
    %616 = vector.load %arg8[%c12_339, %c2_340, %c0_341] : memref<14x14x16xf32, #tpu.memory_space<vmem>>, vector<1x8x16xf32>
    %617 = vector.shape_cast %616 : vector<1x8x16xf32> to vector<8x16xf32>
    %618 = vector.broadcast %615 : f32 to vector<8x16xf32>
    %619 = arith.mulf %618, %617 : vector<8x16xf32>
    %620 = arith.addf %614, %619 : vector<8x16xf32>
    %c75 = arith.constant 75 : index
    %621 = memref.load %arg2[%c75] : memref<98xf32, #tpu.memory_space<smem>>
    %c12_342 = arith.constant 12 : index
    %c3_343 = arith.constant 3 : index
    %c0_344 = arith.constant 0 : index
    %622 = vector.load %arg8[%c12_342, %c3_343, %c0_344] : memref<14x14x16xf32, #tpu.memory_space<vmem>>, vector<1x8x16xf32>
    %623 = vector.shape_cast %622 : vector<1x8x16xf32> to vector<8x16xf32>
    %624 = vector.broadcast %621 : f32 to vector<8x16xf32>
    %625 = arith.mulf %624, %623 : vector<8x16xf32>
    %626 = arith.addf %620, %625 : vector<8x16xf32>
    %c82 = arith.constant 82 : index
    %627 = memref.load %arg2[%c82] : memref<98xf32, #tpu.memory_space<smem>>
    %c12_345 = arith.constant 12 : index
    %c4_346 = arith.constant 4 : index
    %c0_347 = arith.constant 0 : index
    %628 = vector.load %arg8[%c12_345, %c4_346, %c0_347] : memref<14x14x16xf32, #tpu.memory_space<vmem>>, vector<1x8x16xf32>
    %629 = vector.shape_cast %628 : vector<1x8x16xf32> to vector<8x16xf32>
    %630 = vector.broadcast %627 : f32 to vector<8x16xf32>
    %631 = arith.mulf %630, %629 : vector<8x16xf32>
    %632 = arith.addf %626, %631 : vector<8x16xf32>
    %c89 = arith.constant 89 : index
    %633 = memref.load %arg2[%c89] : memref<98xf32, #tpu.memory_space<smem>>
    %c12_348 = arith.constant 12 : index
    %c5_349 = arith.constant 5 : index
    %c0_350 = arith.constant 0 : index
    %634 = vector.load %arg8[%c12_348, %c5_349, %c0_350] : memref<14x14x16xf32, #tpu.memory_space<vmem>>, vector<1x8x16xf32>
    %635 = vector.shape_cast %634 : vector<1x8x16xf32> to vector<8x16xf32>
    %636 = vector.broadcast %633 : f32 to vector<8x16xf32>
    %637 = arith.mulf %636, %635 : vector<8x16xf32>
    %638 = arith.addf %632, %637 : vector<8x16xf32>
    %c96 = arith.constant 96 : index
    %639 = memref.load %arg2[%c96] : memref<98xf32, #tpu.memory_space<smem>>
    %c12_351 = arith.constant 12 : index
    %c6_352 = arith.constant 6 : index
    %c0_353 = arith.constant 0 : index
    %640 = vector.load %arg8[%c12_351, %c6_352, %c0_353] : memref<14x14x16xf32, #tpu.memory_space<vmem>>, vector<1x8x16xf32>
    %641 = vector.shape_cast %640 : vector<1x8x16xf32> to vector<8x16xf32>
    %642 = vector.broadcast %639 : f32 to vector<8x16xf32>
    %643 = arith.mulf %642, %641 : vector<8x16xf32>
    %644 = arith.addf %638, %643 : vector<8x16xf32>
    %c55 = arith.constant 55 : index
    %645 = memref.load %arg2[%c55] : memref<98xf32, #tpu.memory_space<smem>>
    %c13_354 = arith.constant 13 : index
    %c0_355 = arith.constant 0 : index
    %c0_356 = arith.constant 0 : index
    %646 = vector.load %arg8[%c13_354, %c0_355, %c0_356] : memref<14x14x16xf32, #tpu.memory_space<vmem>>, vector<1x8x16xf32>
    %647 = vector.shape_cast %646 : vector<1x8x16xf32> to vector<8x16xf32>
    %648 = vector.broadcast %645 : f32 to vector<8x16xf32>
    %649 = arith.mulf %648, %647 : vector<8x16xf32>
    %650 = arith.addf %644, %649 : vector<8x16xf32>
    %c62 = arith.constant 62 : index
    %651 = memref.load %arg2[%c62] : memref<98xf32, #tpu.memory_space<smem>>
    %c13_357 = arith.constant 13 : index
    %c1_358 = arith.constant 1 : index
    %c0_359 = arith.constant 0 : index
    %652 = vector.load %arg8[%c13_357, %c1_358, %c0_359] : memref<14x14x16xf32, #tpu.memory_space<vmem>>, vector<1x8x16xf32>
    %653 = vector.shape_cast %652 : vector<1x8x16xf32> to vector<8x16xf32>
    %654 = vector.broadcast %651 : f32 to vector<8x16xf32>
    %655 = arith.mulf %654, %653 : vector<8x16xf32>
    %656 = arith.addf %650, %655 : vector<8x16xf32>
    %c69 = arith.constant 69 : index
    %657 = memref.load %arg2[%c69] : memref<98xf32, #tpu.memory_space<smem>>
    %c13_360 = arith.constant 13 : index
    %c2_361 = arith.constant 2 : index
    %c0_362 = arith.constant 0 : index
    %658 = vector.load %arg8[%c13_360, %c2_361, %c0_362] : memref<14x14x16xf32, #tpu.memory_space<vmem>>, vector<1x8x16xf32>
    %659 = vector.shape_cast %658 : vector<1x8x16xf32> to vector<8x16xf32>
    %660 = vector.broadcast %657 : f32 to vector<8x16xf32>
    %661 = arith.mulf %660, %659 : vector<8x16xf32>
    %662 = arith.addf %656, %661 : vector<8x16xf32>
    %c76 = arith.constant 76 : index
    %663 = memref.load %arg2[%c76] : memref<98xf32, #tpu.memory_space<smem>>
    %c13_363 = arith.constant 13 : index
    %c3_364 = arith.constant 3 : index
    %c0_365 = arith.constant 0 : index
    %664 = vector.load %arg8[%c13_363, %c3_364, %c0_365] : memref<14x14x16xf32, #tpu.memory_space<vmem>>, vector<1x8x16xf32>
    %665 = vector.shape_cast %664 : vector<1x8x16xf32> to vector<8x16xf32>
    %666 = vector.broadcast %663 : f32 to vector<8x16xf32>
    %667 = arith.mulf %666, %665 : vector<8x16xf32>
    %668 = arith.addf %662, %667 : vector<8x16xf32>
    %c83 = arith.constant 83 : index
    %669 = memref.load %arg2[%c83] : memref<98xf32, #tpu.memory_space<smem>>
    %c13_366 = arith.constant 13 : index
    %c4_367 = arith.constant 4 : index
    %c0_368 = arith.constant 0 : index
    %670 = vector.load %arg8[%c13_366, %c4_367, %c0_368] : memref<14x14x16xf32, #tpu.memory_space<vmem>>, vector<1x8x16xf32>
    %671 = vector.shape_cast %670 : vector<1x8x16xf32> to vector<8x16xf32>
    %672 = vector.broadcast %669 : f32 to vector<8x16xf32>
    %673 = arith.mulf %672, %671 : vector<8x16xf32>
    %674 = arith.addf %668, %673 : vector<8x16xf32>
    %c90 = arith.constant 90 : index
    %675 = memref.load %arg2[%c90] : memref<98xf32, #tpu.memory_space<smem>>
    %c13_369 = arith.constant 13 : index
    %c5_370 = arith.constant 5 : index
    %c0_371 = arith.constant 0 : index
    %676 = vector.load %arg8[%c13_369, %c5_370, %c0_371] : memref<14x14x16xf32, #tpu.memory_space<vmem>>, vector<1x8x16xf32>
    %677 = vector.shape_cast %676 : vector<1x8x16xf32> to vector<8x16xf32>
    %678 = vector.broadcast %675 : f32 to vector<8x16xf32>
    %679 = arith.mulf %678, %677 : vector<8x16xf32>
    %680 = arith.addf %674, %679 : vector<8x16xf32>
    %c97 = arith.constant 97 : index
    %681 = memref.load %arg2[%c97] : memref<98xf32, #tpu.memory_space<smem>>
    %c13_372 = arith.constant 13 : index
    %c6_373 = arith.constant 6 : index
    %c0_374 = arith.constant 0 : index
    %682 = vector.load %arg8[%c13_372, %c6_373, %c0_374] : memref<14x14x16xf32, #tpu.memory_space<vmem>>, vector<1x8x16xf32>
    %683 = vector.shape_cast %682 : vector<1x8x16xf32> to vector<8x16xf32>
    %684 = vector.broadcast %681 : f32 to vector<8x16xf32>
    %685 = arith.mulf %684, %683 : vector<8x16xf32>
    %686 = arith.addf %680, %685 : vector<8x16xf32>
    %cst_375 = arith.constant 0.000000e+00 : f32
    %687 = vector.broadcast %cst_375 : f32 to vector<8x16xf32>
    %688 = arith.subf %687, %686 : vector<8x16xf32>
    %689 = math.exp %688 : vector<8x16xf32>
    %cst_376 = arith.constant 1.000000e+00 : f32
    %690 = vector.broadcast %cst_376 : f32 to vector<8x16xf32>
    %691 = arith.addf %690, %689 : vector<8x16xf32>
    %692 = tpu.reciprocal %691 : vector<8x16xf32> -> vector<8x16xf32>
    %693 = vector.shape_cast %692 : vector<8x16xf32> to vector<1x8x16xf32>
    %694 = vector.broadcast %693 : vector<1x8x16xf32> to vector<4x8x16xf32>
    %695 = arith.mulf %1, %694 : vector<4x8x16xf32>
    %c0_377 = arith.constant 0 : index
    %c0_378 = arith.constant 0 : index
    %c0_379 = arith.constant 0 : index
    %c0_380 = arith.constant 0 : index
    %696 = vector.load %arg6[%c0_377, %c0_378, %c0_379, %c0_380] : memref<1x4x8x16xf32, #tpu.memory_space<vmem>>, vector<1x4x8x16xf32>
    %697 = vector.shape_cast %696 : vector<1x4x8x16xf32> to vector<4x8x16xf32>
    %698 = vector.shape_cast %695 : vector<4x8x16xf32> to vector<1x4x8x16xf32>
    tpu.vector_store %arg6[%c0_377, %c0_378, %c0_379, %c0_380], %698 {strides = array<i32>} : memref<1x4x8x16xf32, #tpu.memory_space<vmem>>, vector<1x4x8x16xf32>,
    return
  }
  func.func @transform_0(%arg0: i32, %arg1: i32) -> i32 {
    %c0_i32 = arith.constant 0 : i32
    %c0_i32_0 = arith.constant 0 : i32
    return %c0_i32 : i32
  }
  func.func @transform_1(%arg0: i32, %arg1: i32) -> (i32, i32, i32, i32) {
    %c0_i32 = arith.constant 0 : i32
    %c0_i32_0 = arith.constant 0 : i32
    %c0_i32_1 = arith.constant 0 : i32
    return %arg0, %c0_i32, %arg1, %c0_i32_0 : i32, i32, i32, i32
  }
  func.func @transform_2(%arg0: i32, %arg1: i32) -> (i32, i32, i32, i32) {
    %c1_i32 = arith.constant 1 : i32
    %0 = arith.muli %arg1, %c1_i32 : i32
    %c1_i32_0 = arith.constant 1 : i32
    %1 = arith.subi %0, %c1_i32_0 : i32
    %c0_i32 = arith.constant 0 : i32
    %2 = arith.maxsi %1, %c0_i32 : i32
    %c0_i32_1 = arith.constant 0 : i32
    %c0_i32_2 = arith.constant 0 : i32
    %c0_i32_3 = arith.constant 0 : i32
    return %arg0, %c0_i32_1, %2, %c0_i32_2 : i32, i32, i32, i32
  }
  func.func @transform_3(%arg0: i32, %arg1: i32) -> (i32, i32, i32, i32) {
    %c1_i32 = arith.constant 1 : i32
    %0 = arith.addi %arg1, %c1_i32 : i32
    %c1_i32_0 = arith.constant 1 : i32
    %1 = arith.muli %0, %c1_i32_0 : i32
    %c1_i32_1 = arith.constant 1 : i32
    %2 = arith.minsi %1, %c1_i32_1 : i32
    %c0_i32 = arith.constant 0 : i32
    %c0_i32_2 = arith.constant 0 : i32
    %c0_i32_3 = arith.constant 0 : i32
    return %arg0, %c0_i32, %2, %c0_i32_2 : i32, i32, i32, i32
  }
  func.func @transform_4(%arg0: i32, %arg1: i32) -> (i32, i32, i32, i32) {
    %c0_i32 = arith.constant 0 : i32
    %c0_i32_0 = arith.constant 0 : i32
    %c0_i32_1 = arith.constant 0 : i32
    return %arg0, %c0_i32, %arg1, %c0_i32_0 : i32, i32, i32, i32
  }
}

</mosaic_0001>

<bundles_post_ra>
// kernel: tpu_custom_call.1
= control target key start
LH: loop header
LB: loop body
LE: loop exit
PB: predicated region body
PF: predicated region fallthrough
CT: control target
= control target key end

     0   :  { %s2409_s0 = inlined_call_operand.hbm [shape: f32[98], index: 0, kind: input, shape index: {}]   ;;  %s2410_s1 = inlined_call_operand.hbm [shape: f32[2,4,16,16], index: 1, kind: input, shape index: {}]   ;;  %s2411_s2 = inlined_call_operand.hbm [shape: f32[2,4,16,16], index: 2, kind: input, shape index: {}]   ;;  %s2412_s3 = inlined_call_operand.hbm [shape: f32[2,4,16,16], index: 3, kind: input, shape index: {}]   ;;  %s2413_s4 = inlined_call_operand.hbm [shape: f32[2,4,16,16], index: 4, kind: output, shape index: {}]  }
   0x1   :  { %2440 = sst [smem:[#allocation31_spill]] %s2409_s0 }
   0x2   :  { %2441 = sst [smem:[#allocation32_spill]] %s2411_s2 }
   0x3   :  { %2442 = sst [smem:[#allocation33_spill]] %s2413_s4 }
   0x4   :  { %9 = vsyncpa [#allocation7], 0 }
   0x5   :  { %10 = vsyncpa [#allocation5], 0 }
   0x6   :  { %12 = vsyncpa [#allocation5 + $0x1], 0 }
   0x7   :  { %13 = vsyncpa [#allocation10], 0 }
   0x8   :  { %15 = vsyncpa [#allocation10 + $0x1], 0 }
   0x9   :  { %16 = vsyncpa [#allocation6], 0 }
   0xa   :  { %18 = vsyncpa [#allocation6 + $0x1], 0  ;;  %s1871_s15 = smov 0   ;;  %s1873_s16 = smov 0  }
   0xb   :  { %s1875_s17 = smov 0   ;;  %s1877_s18 = smov 0  }
   0xc   :  { %s1879_s19 = smov 0   ;;  %s1881_s20 = smov 0  }
   0xd   :  { %s1883_s21 = smov 0   ;;  %s1885_s22 = smov 0  }
   0xe   :  { %s1887_s23 = smov 0   ;;  %s1889_s24 = smov 0  }
   0xf   :  { %s1891_s25 = smov 0   ;;  %s1893_s26 = smov 0  }
  0x10   :  { %s1895_s27 = smov 0   ;;  %s1897_s28 = smov 0  }
  0x11 LB: > { %2443 = sst [smem:[#allocation18_spill]] %s1789_s20  ;;  %s33_s29 = sadd.s32 1, %s1813_s26  ;;  %s1821_s28 = sphi %s1897_s28, %s24_s28   ;;  %s1817_s27 = sphi %s1895_s27, %s2516_s27   ;;  %s1813_s26 = sphi %s1893_s26, %s2515_s26   ;;  %s1809_s25 = sphi %s1891_s25, %s2514_s25   ;;  %s1805_s24 = sphi %s1889_s24, %s2513_s24   ;;  %s1801_s23 = sphi %s1887_s23, %s2501_s23   ;;  %s1797_s22 = sphi %s1885_s22, %s2512_s22   ;;  %s1793_s21 = sphi %s1883_s21, %s2511_s21   ;;  %s1789_s20 = sphi %s1881_s20, %s2510_s20   ;;  %s1785_s19 = sphi %s1879_s19, %s2509_s19   ;;  %s1781_s18 = sphi %s1877_s18, %s2508_s18   ;;  %s1777_s17 = sphi %s1875_s17, %s2507_s17   ;;  %s1773_s16 = sphi %s1873_s16, %s2506_s16   ;;  %s1769_s15 = sphi %s1871_s15, %s2505_s15  }
  0x12   : > { %2444 = sst [smem:[#allocation19_spill]] %s1793_s21  ;;  %s36_s30 = sadd.s32 1, %s1817_s27 }
  0x13   : > { %2445 = sst [smem:[#allocation20_spill]] %s1801_s23  ;;  %p34_p0 = scmp.ge.s32.totalorder %s33_s29, 2 }
  0x14   : > { %2446 = sst [smem:[#allocation21_spill]] %s1805_s24  ;;  %p2420_p1 = scmp.eq.s32.totalorder %s1821_s28, 0 }
  0x15   : > { %2447 = sst [smem:[#allocation22_spill]] %s1809_s25  ;;  %s100_s5 = sadd.s32 1, %s1789_s20 }
  0x16   : > { %s2518_s29 = smov (%p34_p0, %s33_s29), 0  ;;  %s2520_s30 = smov (!%p34_p0, %s36_s30), %s1817_s27 }
  0x17   : > { %2448 = sst [smem:[#allocation23_spill]] %s2518_s29  ;;  %s62_s6 = ssub.s32 %s1813_s26, %s2518_s29 }
  0x18   : > { %p38_p2 = scmp.ge.s32.totalorder %s2520_s30, 2  ;;  %p107_p3 = scmp.ne.s32.totalorder %s1789_s20, %s1785_s19 }
  0x19   : > { %p2419_p6 = scmp.lt.s32.totalorder %s1821_s28, 4  ;;  %s230_s11 = sand.u32 1, %s1821_s28  }
  0x1a   : > { %s2522_s30 = smov (%p38_p2, %s2520_s30), 0  ;;  %p1963_p4 = por %p107_p3, %p2420_p1 }
  0x1b   : > { %2449 = sst [smem:[#allocation24_spill]] %s2522_s30  ;;  %s1956_s7 = ssub.s32 %s1817_s27, %s2522_s30 }
  0x1c   : > { %s1959_s8 = sor.u32 %s62_s6, %s1956_s7  ;;  %p2417_p7 = scmp.eq.s32.totalorder %s1956_s7, 0 }
  0x1d   : > { %s232_s12 = sand.u32 1, %s1789_s20   ;;  %s2418_s30 = sshll.u32 %s1817_s27, 10 }
  0x1e   : > { %s1976_s13 = scalar_select %p2417_p7, %s1789_s20, %s100_s5  }
  0x1f   : > { %s1278_s14 = sshll.u32 %s232_s12, 5  ;;  %s2452_s2 = sld [smem:[#allocation32_spill]] }
  0x20   : > { %2451 = sst [smem:[#allocation25_spill]] %s1976_s13  ;;  %s234_s25 = scalar_lea.vmem [#allocation9], %s1278_s14 }
  0x21   : > { %s245_s24 = sshll.u32 %s234_s25, 4  ;;  %p1992_p8 = pnand %p2419_p6, %p1963_p4  ;;  %s1986_s24 = int_to_ptr.vmem [resolvable:$true] %s245_s24 }
  0x22   : > { %s1996_s12 = scalar_lea.sflag [#allocation10], %s230_s11 }
  0x23   : > { %p1568_p10 = pneg %p1992_p8 }
  0x25   : > { %s1984_s4 = scalar_lea.hbm %s2452_s2, %s2418_s30  ;;  %s1571_s25 = scalar_lea.hbm %s2452_s2, 2048 }
  0x26   : > { %s1566_s10 = scalar_lea.hbm %s1984_s4, 512  ;;  %p1572_p13 = scmp.lt.s32.totalorder %s1984_s4, %s2452_s2 }
  0x27   : > { %p1567_p9 = scmp.ne.s32.totalorder %s1984_s4, %s1566_s10  ;;  %p1573_p0 = scmp.lt.s32.totalorder %s1571_s25, %s1566_s10 }
  0x29   : > { %p1569_p11 = pnand %p1568_p10, %p1567_p9  ;;  %p1574_p2 = por %p1573_p0, %p1572_p13 }
  0x2b   : > { %p1570_p12 = pneg %p1569_p11 }
  0x2d   : > { %p1575_p3 = pnand %p1574_p2, %p1570_p12 }
  0x2f   : > { %1578 = shalt.err (!%p1575_p3)
}
  0x30   : > { %s1579_s11 = scalar_lea.vmem %s1986_s24, 512  ;;  %s1823_s30 = smov [#allocation9]  }
  0x31   : > { %p1580_p4 = scmp.ne.s32.totalorder %s1986_s24, %s1579_s11  ;;  %s1584_s13 = sshll.u32 %s1823_s30, 4  ;;  %s1585_s13 = int_to_ptr.vmem [resolvable:$false] %s1584_s13 }
  0x32   : > { %s1586_s29 = scalar_lea.vmem %s1585_s13, 1024  ;;  %p1587_p11 = scmp.lt.s32.totalorder %s1986_s24, %s1585_s13 }
  0x33   : > { %p1582_p7 = pnand %p1580_p4, %p1568_p10  ;;  %p1588_p6 = scmp.lt.s32.totalorder %s1586_s29, %s1579_s11 }
  0x35   : > { %p1583_p9 = pneg %p1582_p7  ;;  %p1589_p1 = por %p1588_p6, %p1587_p11 }
  0x37   : > { %p1590_p5 = pnand %p1589_p1, %p1583_p9 }
  0x39   : > { %1593 = shalt.err (!%p1590_p5)
}
  0x3a   : > { %s2423_s10 = smov 256   ;;  %s2425_s30 = smov 128  }
  0x3b   : > { %s2427_s13 = smov 8   ;;  %s2021_s14 = sadd.s32 4294967295, %s1821_s28  }
  0x3c   : > { %1419 = dma.hbm_to_vmem [thread:$0]  (!%p1992_p8), %s1984_s4, 512, %s1986_s24, %s1996_s12, %s2423_s10, %s2425_s30, %s2427_s13  }
  0x3d   : > { %s1269_s25 = sadd.s32 4294967294, %s1821_s28   ;;  %s66_s6 = sadd.s32 1, %s1801_s23 }
  0x3e   : > { %p2454_p1 = scmp.eq.s32.totalorder %s1959_s8, 0  ;;  %p73_p5 = scmp.ne.s32.totalorder %s1801_s23, %s1797_s22 }
  0x3f   : > { %p79_p6 = scmp.ne.s32.totalorder %s1797_s22, %s1793_s21  ;;  %p2422_p7 = scmp.eq.s32.totalorder %s2021_s14, 0 }
  0x40   : > { %s2028_s9 = scalar_select %p2454_p1, %s1801_s23, %s66_s6  }
  0x41   : > { %p113_p8 = scmp.ne.s32.totalorder %s1785_s19, %s1781_s18  ;;  %p2456_p10 = scmp.eq.s32.totalorder %s1821_s28, 0 }
  0x42   : > { %2455 = sst [smem:[#allocation26_spill]] %s2028_s9  ;;  %p147_p13 = scmp.ne.s32.totalorder %s1773_s16, %s1769_s15 }
  0x43   : > { %p75_p12 = por %p2456_p10, %p73_p5  ;;  %p2046_p0 = por %p2422_p7, %p79_p6 }
  0x44   : > { %p2052_p2 = por %p113_p8, %p2422_p7  ;;  %p2058_p3 = por %p147_p13, %p2422_p7 }
  0x45   : > { %s2457_s4 = scalar_select %p2046_p0, 1, 0 }
  0x46   : > { %s2458_s24 = scalar_select %p2052_p2, 1, 0 }
  0x47   : > { %s2460_s18 = scalar_select %p2058_p3, 1, 0 }
  0x48   : > { %2459 = sst [smem:[#allocation27_spill]] %s2458_s24  ;;  %p173_p4 = scmp.eq.s32.totalorder %s2021_s14, 3 }
  0x49   : > { %2461 = sst [smem:[#allocation28_spill]] %s2460_s18  ;;  %p179_p9 = scmp.eq.s32.totalorder %s1269_s25, 3 }
  0x4a   : > { %p1272_p11 = scmp.ge.s32.totalorder %s1821_s28, 1  ;;  %p2064_p1 = por %p173_p4, %p73_p5 }
  0x4b   : > { %p186_p10 = scmp.lt.s32.totalorder %s1821_s28, 5  ;;  %p2072_p0 = por %p179_p9, %p79_p6 }
  0x4c   : > { %s2462_s15 = scalar_select %p2064_p1, 1, 0 }
  0x4d   : > { %s2464_s8 = scalar_select %p2072_p0, 1, 0 }
  0x4e   : > { %2463 = sst [smem:[#allocation29_spill]] %s2462_s15  ;;  %p2076_p8 = pnand %p1272_p11, %p186_p10 }
  0x4f   : > { %2465 = sst [smem:[#allocation30_spill]] %s2464_s8  ;;  %p2467_p13 = scmp.lt.s32.totalorder %s1821_s28, 4 }
  0x50   : > { %s208_s29 = sand.u32 1, %s1801_s23   ;;  %p1409_p5 = pneg %p2076_p8 }
  0x51   : > { %p2082_p7 = pnand %p2467_p13, %p75_p12  ;;  %s1275_s25 = sshll.u32 %s208_s29, 5 }
  0x52   : > { %p2469_p4 = scmp.eq.s32.totalorder %s2021_s14, 0  ;;  %s2470_s6 = sshll.u32 %s1817_s27, 3 }
  0x53   : > { %s217_s10 = sadd.s32 %s1813_s26, %s2470_s6  ;;  %s212_s30 = scalar_lea.vmem [#allocation8], %s1275_s25 }
  0x54   : > { %p1410_p6 = pnand %p1409_p5, %p2469_p4  ;;  %s220_s13 = sshll.u32 %s212_s30, 4  ;;  %s221_s13 = int_to_ptr.vmem [resolvable:$true] %s220_s13 }
  0x55   : > { %s1277_s2 = sshll.u32 %s217_s10, 7  ;;  %s1827_s9 = smov [#allocation4]  }
  0x56   : > { %s2471_s0 = sld [smem:[#allocation31_spill]]  ;;  %s219_s18 = scalar_lea.hbm %s2410_s1, %s1277_s2 }
  0x57   : > { %s209_s23 = scalar_lea.sflag [#allocation5], %s208_s29  ;;  %p1607_p12 = pneg %p2082_p7 }
  0x58   : > { %s1618_s24 = scalar_lea.vmem %s221_s13, 512  ;;  %s1828_s25 = smov [#allocation8]  }
  0x59   : > { %p1619_p9 = scmp.ne.s32.totalorder %s221_s13, %s1618_s24  ;;  %s1623_s30 = sshll.u32 %s1828_s25, 4  ;;  %s1624_s30 = int_to_ptr.vmem [resolvable:$false] %s1623_s30 }
  0x5a   : > { %s1625_s10 = scalar_lea.vmem %s1624_s30, 1024  ;;  %p1626_p13 = scmp.lt.s32.totalorder %s221_s13, %s1624_s30 }
  0x5b   : > { %p1621_p11 = pnand %p1619_p9, %p1607_p12  ;;  %p1627_p5 = scmp.lt.s32.totalorder %s1625_s10, %s1618_s24 }
  0x5c   : > { %1412 = dma.hbm_to_smem (!%p1410_p6), %s2471_s0, 16, %s1827_s9, [#allocation7]  }
  0x5d   : > { %p1622_p10 = pneg %p1621_p11  ;;  %p1628_p4 = por %p1627_p5, %p1626_p13 }
  0x5f   : > { %p1629_p6 = pnand %p1628_p4, %p1622_p10 }
  0x61   : > { %1632 = shalt.err (!%p1629_p6)
}
  0x62   : > { %s2472_s2 = smov 8   ;;  %s2473_s20 = smov 128  }
  0x63   : > { %s2474_s21 = smov 256   ;;  %s134_s9 = sadd.s32 1, %s1777_s17 }
  0x64   : > { %1416 = dma.hbm_to_vmem [thread:$0]  (!%p2082_p7), %s219_s18, 512, %s221_s13, %s209_s23, %s2474_s21, %s2473_s20, %s2472_s2  }
  0x65   : > { %p141_p12 = scmp.ne.s32.totalorder %s1777_s17, %s1773_s16  ;;  %s257_s24 = sand.u32 1, %s1777_s17  }
  0x66   : > { %p2475_p9 = scmp.eq.s32.totalorder %s1821_s28, 0  ;;  %s1282_s15 = sshll.u32 %s257_s24, 5 }
  0x67   : > { %s2476_s8 = sshll.u32 %s1817_s27, 10  ;;  %s259_s30 = scalar_lea.vmem [#allocation11], %s1282_s15 }
  0x68   : > { %p143_p11 = por %p141_p12, %p2475_p9  ;;  %s1765_s11 = sadd.s32 128, %s2476_s8 }
  0x69   : > { %s269_s25 = scalar_lea.hbm %s2412_s3, %s1765_s11  ;;  %s270_s10 = sshll.u32 %s259_s30, 4  ;;  %s271_s10 = int_to_ptr.vmem [resolvable:$true] %s270_s10 }
  0x6a   : > { %p2477_p10 = scmp.eq.s32.totalorder %s1956_s7, 0  ;;  %p2478_p13 = scmp.lt.s32.totalorder %s1821_s28, 4 }
  0x6b   : > { %s1646_s13 = scalar_lea.vmem %s271_s10, 512  ;;  %s1829_s18 = smov [#allocation11]  }
  0x6c   : > { %s2121_s0 = scalar_select %p2477_p10, %s1777_s17, %s134_s9  }
  0x6d   : > { %p2125_p7 = pnand %p2478_p13, %p143_p11  ;;  %p1647_p4 = scmp.ne.s32.totalorder %s271_s10, %s1646_s13 }
  0x6e   : > { %s1651_s24 = sshll.u32 %s1829_s18, 4  ;;  %s1652_s24 = int_to_ptr.vmem [resolvable:$false] %s1651_s24 }
  0x6f   : > { %p1635_p5 = pneg %p2125_p7  ;;  %s1653_s15 = scalar_lea.vmem %s1652_s24, 1024 }
  0x70   : > { %p1654_p9 = scmp.lt.s32.totalorder %s271_s10, %s1652_s24  ;;  %p1655_p10 = scmp.lt.s32.totalorder %s1653_s15, %s1646_s13 }
  0x71   : > { %p1649_p6 = pnand %p1647_p4, %p1635_p5 }
  0x72   : > { %p1656_p0 = por %p1655_p10, %p1654_p9 }
  0x73   : > { %p1650_p12 = pneg %p1649_p6 }
  0x75   : > { %p1657_p1 = pnand %p1656_p0, %p1650_p12 }
  0x77   : > { %1660 = shalt.err (!%p1657_p1)
}
  0x78   : > { %1422 = dma.hbm_to_vmem [thread:$0]  (!%p2125_p7), %s269_s25, 512, %s271_s10, %s1996_s12, %s2474_s21, %s2473_s20, %s2472_s2  }
  0x79   : > { %282 = sbr.rel (%p2076_p8) target bundleno = 938 (0x3aa), region = 36  ;;  %p2480_p11 = scmp.eq.s32.totalorder (!%p2076_p8), %s2021_s14, 0 }
  0x7e   : > { %1744 = dma.done.wait (%p2480_p11), [#allocation7], 16   ;;  %p2481_p13 = pmov %p2480_p11 }
  0x7f   : > { %s2144_s7 = sand.u32 1, %s1797_s22   ;;  %p2482_p0 = scmp.ne.s32.totalorder %s2457_s4, 0 }
  0x80   : > { %1746 = vsyncadd (%p2481_p13), [#allocation7], 4294967280  ;;  %s1287_s9 = sshll.u32 %s2144_s7, 5  ;;  %s289_s8 = scalar_lea.sflag [#allocation5], %s2144_s7 }
  0x81   : > { %s292_s12 = scalar_lea.vmem [#allocation8], %s1287_s9 }
  0x82   : > { %1748 = dma.done.wait (%p2482_p0), %s289_s8, 512  }
  0x83   : > { %1750 = vsyncadd (%p2482_p0), %s289_s8, 4294966784  ;;  %s297_s2 = sand.u32 1, %s2021_s14   ;;  %s299_s20 = sand.u32 1, %s1785_s19  }
  0x84   : > { %s1288_s21 = sshll.u32 %s299_s20, 5  ;;  %s298_s11 = scalar_lea.sflag [#allocation10], %s297_s2 }
  0x85   : > { %s2156_s29 = scalar_lea.vmem [#allocation9], %s1288_s21 }
  0x86   : > { %1752 = dma.done.wait (%p2052_p2), %s298_s11, 512  }
  0x87   : > { %1754 = vsyncadd (%p2052_p2), %s298_s11, 4294966784  ;;  %s308_s25 = sand.u32 1, %s1773_s16  }
  0x88   : > { %s1289_s30 = sshll.u32 %s308_s25, 5 }
  0x89   : > { %s2163_s4 = scalar_lea.vmem [#allocation11], %s1289_s30 }
  0x8a   : > { %1756 = dma.done.wait (%p2058_p3), %s298_s11, 512  }
  0x8b   : > { %1758 = vsyncadd (%p2058_p3), %s298_s11, 4294966784 }
  0x8c   : > { %315 = sfence }
  0x8d   : > { %v2169_v0 = vld [vmem:[%s292_s12] sm:$0xff]  ;;  %v2171_v1 = vld [vmem:[%s292_s12 + $0x8] sm:$0xff]  ;;  %v2173_v2 = vld [vmem:[%s292_s12 + $0x10] sm:$0xff]  ;;  %vm356_vm0 = vcmask 130048   ;;  %vm373_vm1 = vcmask 23552   ;;  %vm375_vm2 = vcmask 21504  }
  0x8e   : > { %v2175_v3 = vld [vmem:[%s292_s12 + $0x18] sm:$0xff]  ;;  %v357_v4 = vsel %vm356_vm0, %v2169_v0, 0.0  ;;  %v358_v5 = vsel %vm356_vm0, %v2171_v1, 0.0  ;;  %v360_v6 = vsel %vm356_vm0, %v2173_v2, 0.0  ;;  %v366_v10 = vsel %vm356_vm0, %v2169_v0, -inf  ;;  %s1831_s14 = smov 3  }
  0x8f   : > { %v359_v7 = vadd.f32 %v358_v5, %v357_v4  ;;  %v362_v8 = vsel %vm356_vm0, %v2175_v3, 0.0  ;;  %v369_v9 = vsel %vm356_vm0, %v2175_v3, -inf  ;;  %v367_v11 = vsel %vm356_vm0, %v2171_v1, -inf  ;;  %s2195_s10 = scalar_lea.vmem [#allocation12], %s1287_s9  ;;  %s2485_s23 = sld [smem:[#allocation21_spill]] }
  0x90   : > { %v368_v12 = vsel %vm356_vm0, %v2173_v2, -inf  ;;  %v1830_v14 = vmov 0.0   ;;  %vm377_vm3 = vcmask 179352   ;;  %vm379_vm4 = vcmask 177304  }
  0x91   : > { %v361_v13 = vadd.f32 %v360_v6, %v359_v7  ;;  %374 = vst.msk [vmem:[#allocation2] sm:$0xff] %vm373_vm1, %v1830_v14  ;;  %382 = vst.msk [vmem:[#allocation2 + $0x10] sm:$0xff] %vm373_vm1, %v1830_v14  ;;  %v370_v16 = vmax.f32 %v366_v10, %v367_v11  ;;  %v371_v17 = vmax.f32 %v368_v12, %v369_v9  ;;  %vm390_vm5 = vcmask 154648  }
  0x92   : > { %376 = vst.msk [vmem:[#allocation2 + $0x8] sm:$0x3f] %vm375_vm2, %v1830_v14  ;;  %383 = vst.msk [vmem:[#allocation2 + $0x18] sm:$0x3f] %vm375_vm2, %v1830_v14 }
  0x93   : > { %378 = vst.msk [vmem:[#allocation2] sm:$0xff] %vm377_vm3, %v1830_v14  ;;  %384 = vst.msk [vmem:[#allocation2 + $0x10] sm:$0xff] %vm377_vm3, %v1830_v14  ;;  %v363_v15 = vadd.f32 %v362_v8, %v361_v13  ;;  %v372_v19 = vmax.f32 %v370_v16, %v371_v17 }
  0x94   : > { %380 = vst.msk [vmem:[#allocation2 + $0x8] sm:$0x3f] %vm379_vm4, %v1830_v14  ;;  %385 = vst.msk [vmem:[#allocation2 + $0x18] sm:$0x3f] %vm379_vm4, %v1830_v14 }
  0x95   : > { %v365_v18 = vmul.f32 0.25, %v363_v15  ;;  %p1291_p2 = scmp.ne.s32.totalorder %s2485_s23, 0 }
  0x97   : > { %387 = vrot.lane.b32.xlu0 %v365_v18, %s1831_s14 }
  0x9b   : > { %393 = vrot.lane.b32.xlu0 %v372_v19, %s1831_s14 }
 0x109   : > { %v388_v20 = vpop.permute.xlu0 %387 }
 0x10a   : > { %391 = vst.msk [vmem:[#allocation2 + $0x3] sm:$0xff] %vm390_vm5, %v388_v20  ;;  %400 = sbr.rel (%p1291_p2) target bundleno = 273 (0x111), region = 56 }
 0x10d   : > { %v394_v21 = vpop.permute.xlu0 %393 }
 0x10e   : > { %396 = vst.msk [vmem:[#allocation2 + $0x13] sm:$0xff] %vm390_vm5, %v394_v21 }
 0x10f   : > { %vm401_vm6 = vcmask 149528   ;;  %v1832_v22 = vmov 0.0  }
 0x110   : > { %402 = vst.msk [vmem:[#allocation2] sm:$0x7] %vm401_vm6, %v1832_v22  ;;  %403 = vst.msk [vmem:[#allocation2 + $0x10] sm:$0x7] %vm401_vm6, %v1832_v22 }
 0x111 PF: > { %s2486_s13 = sld [smem:[#allocation21_spill]] }
 0x117   : > { %p1292_p3 = scmp.le.s32.totalorder %s2486_s13, 0 }
 0x118   : > { %s1833_s18 = smov (!%p1292_p3), 3  }
 0x119   : > { %407 = sbr.rel (%p1292_p3) target bundleno = 417 (0x1a1), region = 60 }
 0x11e   : > { %v408_v23 = vld [vmem:[%s2156_s29 + $0x5] sm:$0x7]  ;;  %v409_v24 = vld [vmem:[%s2156_s29 + $0xd] sm:$0x7]  ;;  %v410_v25 = vld [vmem:[%s2156_s29 + $0x15] sm:$0x7] }
 0x11f   : > { %v411_v26 = vld [vmem:[%s2156_s29 + $0x1d] sm:$0x7]  ;;  %vm412_vm7 = vcmask 124928   ;;  %vm425_vm8 = vcmask 149528  }
 0x120   : > { %v413_v27 = vsel %vm412_vm7, %v408_v23, 0.0  ;;  %v414_v28 = vsel %vm412_vm7, %v409_v24, 0.0  ;;  %v416_v29 = vsel %vm412_vm7, %v410_v25, 0.0  ;;  %v418_v31 = vsel %vm412_vm7, %v411_v26, 0.0 }
 0x121   : > { %v415_v30 = vadd.f32 %v414_v28, %v413_v27  ;;  %v430_v32 = vsel %vm412_vm7, %v411_v26, -inf  ;;  %v427_v33 = vsel %vm412_vm7, %v408_v23, -inf  ;;  %v428_v34 = vsel %vm412_vm7, %v409_v24, -inf }
 0x122   : > { %v429_v35 = vsel %vm412_vm7, %v410_v25, -inf  ;;  %v431_v38 = vmax.f32 %v427_v33, %v428_v34 }
 0x123   : > { %v417_v36 = vadd.f32 %v416_v29, %v415_v30  ;;  %v432_v39 = vmax.f32 %v429_v35, %v430_v32 }
 0x125   : > { %v419_v37 = vadd.f32 %v418_v31, %v417_v36  ;;  %v433_v41 = vmax.f32 %v431_v38, %v432_v39 }
 0x127   : > { %v420_v40 = vmul.f32 0.25, %v419_v37 }
 0x129   : > { %422 = vrot.lane.b32.xlu0 %v420_v40, %s1833_s18 }
 0x12d   : > { %435 = vrot.lane.b32.xlu0 %v433_v41, %s1833_s18 }
 0x19b   : > { %v423_v42 = vpop.permute.xlu0 %422 }
 0x19c   : > { %426 = vst.msk [vmem:[#allocation2] sm:$0x7] %vm425_vm8, %v423_v42 }
 0x19f   : > { %v436_v43 = vpop.permute.xlu0 %435 }
 0x1a0   : > { %438 = vst.msk [vmem:[#allocation2 + $0x10] sm:$0x7] %vm425_vm8, %v436_v43 }
 0x1a1 PF: > { %s2487_s24 = sld [smem:[#allocation21_spill]] }
 0x1a7   : > { %p1293_p1 = scmp.ne.s32.totalorder %s2487_s24, 1 }
 0x1a9   : > { %442 = sbr.rel (%p1293_p1) target bundleno = 432 (0x1b0), region = 64 }
 0x1ae   : > { %vm443_vm9 = vcmask 149528   ;;  %v1834_v44 = vmov 0.0  }
 0x1af   : > { %444 = vst.msk [vmem:[#allocation2 + $0xb] sm:$0x7] %vm443_vm9, %v1834_v44  ;;  %445 = vst.msk [vmem:[#allocation2 + $0x1b] sm:$0x7] %vm443_vm9, %v1834_v44 }
 0x1b0 PF: > { %s2488_s15 = sld [smem:[#allocation21_spill]] }
 0x1b6   : > { %p1294_p8 = scmp.ge.s32.totalorder %s2488_s15, 1 }
 0x1b7   : > { %s1835_s9 = smov (!%p1294_p8), 3  }
 0x1b8   : > { %449 = sbr.rel (%p1294_p8) target bundleno = 576 (0x240), region = 68 }
 0x1bd   : > { %v450_v45 = vld [vmem:[%s2163_s4] sm:$0x7]  ;;  %v451_v46 = vld [vmem:[%s2163_s4 + $0x8] sm:$0x7]  ;;  %v452_v47 = vld [vmem:[%s2163_s4 + $0x10] sm:$0x7] }
 0x1be   : > { %v453_v48 = vld [vmem:[%s2163_s4 + $0x18] sm:$0x7]  ;;  %vm454_vm10 = vcmask 124928   ;;  %vm467_vm11 = vcmask 149528  }
 0x1bf   : > { %v455_v49 = vsel %vm454_vm10, %v450_v45, 0.0  ;;  %v456_v50 = vsel %vm454_vm10, %v451_v46, 0.0  ;;  %v458_v51 = vsel %vm454_vm10, %v452_v47, 0.0  ;;  %v460_v53 = vsel %vm454_vm10, %v453_v48, 0.0 }
 0x1c0   : > { %v457_v52 = vadd.f32 %v456_v50, %v455_v49  ;;  %v472_v54 = vsel %vm454_vm10, %v453_v48, -inf  ;;  %v469_v55 = vsel %vm454_vm10, %v450_v45, -inf  ;;  %v470_v56 = vsel %vm454_vm10, %v451_v46, -inf }
 0x1c1   : > { %v471_v57 = vsel %vm454_vm10, %v452_v47, -inf  ;;  %v473_v60 = vmax.f32 %v469_v55, %v470_v56 }
 0x1c2   : > { %v459_v58 = vadd.f32 %v458_v51, %v457_v52  ;;  %v474_v61 = vmax.f32 %v471_v57, %v472_v54 }
 0x1c4   : > { %v461_v59 = vadd.f32 %v460_v53, %v459_v58  ;;  %v475_v63 = vmax.f32 %v473_v60, %v474_v61 }
 0x1c6   : > { %v462_v62 = vmul.f32 0.25, %v461_v59 }
 0x1c8   : > { %464 = vrot.lane.b32.xlu0 %v462_v62, %s1835_s9 }
 0x1cc   : > { %477 = vrot.lane.b32.xlu0 %v475_v63, %s1835_s9 }
 0x23a   : > { %v465_v4 = vpop.permute.xlu0 %464 }
 0x23b   : > { %468 = vst.msk [vmem:[#allocation2 + $0xb] sm:$0x7] %vm467_vm11, %v465_v4 }
 0x23e   : > { %v478_v5 = vpop.permute.xlu0 %477 }
 0x23f   : > { %480 = vst.msk [vmem:[#allocation2 + $0x1b] sm:$0x7] %vm467_vm11, %v478_v5 }
 0x240 PF: > { %v481_v6 = vld [vmem:[#allocation2] sm:$0xff]  ;;  %s1836_s8 = smov 127   ;;  %vm484_vm12 = vcmask 128000   ;;  %s1837_s12 = smov 126   ;;  %v542_v9 = vld [vmem:[#allocation2 + $0x10] sm:$0xff] }
 0x241   : > { %488 = vrot.lane.b32.xlu0 %v481_v6, %s1836_s8  ;;  %483 = vst.msk [vmem:[#allocation3] sm:$0xff] %vm356_vm0, %v481_v6  ;;  %497 = vrot.lane.b32.xlu1 %v481_v6, %s1837_s12  ;;  %545 = vst.msk [vmem:[#allocation3 + $0x70] sm:$0xff] %vm356_vm0, %v542_v9  ;;  %s1838_s5 = smov 125   ;;  %s1839_s2 = smov 124  }
 0x242   : > { %v482_v7 = vld [vmem:[#allocation2 + $0x8] sm:$0x3f]  ;;  %s1840_s20 = smov 123   ;;  %s1841_s21 = smov 122  }
 0x243   : > { %485 = vst.msk [vmem:[#allocation3 + $0x8] sm:$0x3f] %vm484_vm12, %v482_v7  ;;  %s603_s11 = sld [smem:[#allocation4]] }
 0x244   : > { %s1295_s29 = sld [smem:[#allocation4 + $0x7]] }
 0x245   : > { %490 = vrot.lane.b32.xlu0 %v482_v7, %s1836_s8  ;;  %499 = vrot.lane.b32.xlu1 %v482_v7, %s1837_s12  ;;  %s1296_s6 = sld [smem:[#allocation4 + $0xe]] }
 0x246   : > { %v543_v8 = vld [vmem:[#allocation2 + $0x18] sm:$0x3f]  ;;  %s1297_s25 = sld [smem:[#allocation4 + $0x15]] }
 0x247   : > { %546 = vst.msk [vmem:[#allocation3 + $0x78] sm:$0x3f] %vm484_vm12, %v543_v8  ;;  %s1298_s30 = sld [smem:[#allocation4 + $0x1c]] }
 0x248   : > { %v604_v11 = vld [vmem:[#allocation3] sm:$0xff]  ;;  %s1299_s4 = sld [smem:[#allocation4 + $0x23]] }
 0x249   : > { %506 = vrot.lane.b32.xlu0 %v481_v6, %s1838_s5  ;;  %508 = vrot.lane.b32.xlu1 %v482_v7, %s1838_s5  ;;  %v605_v10 = vstv %s603_s11  ;;  %s1300_s14 = sld [smem:[#allocation4 + $0x2a]] }
 0x24a   : > { %v610_v12 = vstv %s1295_s29  ;;  %v609_v13 = vld [vmem:[#allocation3 + $0x1] sm:$0xff]  ;;  %v606_v14 = vmul.f32 %v605_v10, %v604_v11  ;;  %s1301_s23 = sld [smem:[#allocation4 + $0x1]] }
 0x24b   : > { %v611_v15 = vmul.f32 %v610_v12, %v609_v13  ;;  %v615_v16 = vstv %s1296_s6  ;;  %v614_v17 = vld [vmem:[#allocation3 + $0x2] sm:$0xff]  ;;  %s1302_s13 = sld [smem:[#allocation4 + $0x8]] }
 0x24c   : > { %v616_v19 = vmul.f32 %v615_v16, %v614_v17  ;;  %v620_v20 = vstv %s1297_s25  ;;  %v619_v21 = vld [vmem:[#allocation3 + $0x3] sm:$0xff]  ;;  %s2215_s18 = sld [smem:[#allocation4 + $0xf]] }
 0x24d   : > { %515 = vrot.lane.b32.xlu0 %v481_v6, %s1839_s2  ;;  %517 = vrot.lane.b32.xlu1 %v482_v7, %s1839_s2  ;;  %v612_v18 = vadd.f32 %v611_v15, %v606_v14  ;;  %v621_v23 = vmul.f32 %v620_v20, %v619_v21  ;;  %v625_v24 = vstv %s1298_s30  ;;  %v624_v25 = vld [vmem:[#allocation3 + $0x4] sm:$0xff]  ;;  %s2218_s24 = sld [smem:[#allocation4 + $0x16]] }
 0x24e   : > { %v626_v27 = vmul.f32 %v625_v24, %v624_v25  ;;  %v630_v28 = vstv %s1299_s4  ;;  %v629_v29 = vld [vmem:[#allocation3 + $0x5] sm:$0xff]  ;;  %s2221_s15 = sld [smem:[#allocation4 + $0x1d]] }
 0x24f   : > { %v617_v22 = vadd.f32 %v616_v19, %v612_v18  ;;  %v631_v32 = vmul.f32 %v630_v28, %v629_v29  ;;  %v635_v34 = vstv %s1300_s14  ;;  %v634_v35 = vld [vmem:[#allocation3 + $0x6] sm:$0xff]  ;;  %s2224_s9 = sld [smem:[#allocation4 + $0x24]] }
 0x250   : > { %v636_v38 = vmul.f32 %v635_v34, %v634_v35  ;;  %v640_v40 = vstv %s1301_s23  ;;  %s2252_s11 = sld [smem:[#allocation4 + $0x25]] }
 0x251   : > { %524 = vrot.lane.b32.xlu0 %v481_v6, %s1840_s20  ;;  %526 = vrot.lane.b32.xlu1 %v482_v7, %s1840_s20  ;;  %v622_v26 = vadd.f32 %v621_v23, %v617_v22  ;;  %v645_v46 = vstv %s1302_s13  ;;  %s2254_s29 = sld [smem:[#allocation4 + $0x2c]] }
 0x252   : > { %v650_v47 = vstv %s2215_s18  ;;  %s2258_s6 = sld [smem:[#allocation4 + $0x3]] }
 0x253   : > { %v627_v31 = vadd.f32 %v626_v27, %v622_v26  ;;  %v655_v54 = vstv %s2218_s24  ;;  %s2264_s25 = sld [smem:[#allocation4 + $0xa]] }
 0x254   : > { %v660_v58 = vstv %s2221_s15  ;;  %s2268_s30 = sld [smem:[#allocation4 + $0x11]] }
 0x255   : > { %533 = vrot.lane.b32.xlu0 %v481_v6, %s1841_s21  ;;  %535 = vrot.lane.b32.xlu1 %v482_v7, %s1841_s21  ;;  %v632_v37 = vadd.f32 %v631_v32, %v627_v31  ;;  %v665_v4 = vstv %s2224_s9  ;;  %s2273_s4 = sld [smem:[#allocation4 + $0x18]] }
 0x256   : > { %s2276_s14 = sld [smem:[#allocation4 + $0x1f]] }
 0x257   : > { %v637_v43 = vadd.f32 %v636_v38, %v632_v37  ;;  %v700_v38 = vstv %s2252_s11  ;;  %s2280_s23 = sld [smem:[#allocation4 + $0x26]] }
 0x258   : > { %s2283_s13 = sld [smem:[#allocation4 + $0x2d]] }
 0x259   : > { %549 = vrot.lane.b32.xlu0 %v542_v9, %s1836_s8  ;;  %551 = vrot.lane.b32.xlu1 %v543_v8, %s1836_s8  ;;  %s2228_s8 = sld [smem:[#allocation4 + $0x2b]] }
 0x25a   : > { %s2286_s18 = sld [smem:[#allocation4 + $0x4]] }
 0x25b   : > { %s2292_s24 = sld [smem:[#allocation4 + $0xb]] }
 0x25c   : > { %s1324_s15 = sld [smem:[#allocation4 + $0x12]] }
 0x25d   : > { %558 = vrot.lane.b32.xlu0 %v542_v9, %s1837_s12  ;;  %560 = vrot.lane.b32.xlu1 %v543_v8, %s1837_s12  ;;  %s2232_s12 = sld [smem:[#allocation4 + $0x2]] }
 0x25e   : > { %s1325_s9 = sld [smem:[#allocation4 + $0x19]] }
 0x25f   : > { %s1332_s11 = sld [smem:[#allocation4 + $0x1a]] }
 0x261   : > { %567 = vrot.lane.b32.xlu0 %v542_v9, %s1838_s5  ;;  %569 = vrot.lane.b32.xlu1 %v543_v8, %s1838_s5  ;;  %s2236_s5 = sld [smem:[#allocation4 + $0x9]] }
 0x263   : > { %v675_v14 = vstv %s2232_s12  ;;  %s1327_s12 = sld [smem:[#allocation4 + $0x27]] }
 0x265   : > { %576 = vrot.lane.b32.xlu0 %v542_v9, %s1839_s2  ;;  %578 = vrot.lane.b32.xlu1 %v543_v8, %s1839_s2  ;;  %s2240_s2 = sld [smem:[#allocation4 + $0x10]] }
 0x267   : > { %v680_v18 = vstv %s2236_s5  ;;  %s1328_s5 = sld [smem:[#allocation4 + $0x2e]] }
 0x269   : > { %585 = vrot.lane.b32.xlu0 %v542_v9, %s1840_s20  ;;  %587 = vrot.lane.b32.xlu1 %v543_v8, %s1840_s20  ;;  %s2244_s20 = sld [smem:[#allocation4 + $0x17]] }
 0x26b   : > { %v685_v24 = vstv %s2240_s2  ;;  %s1329_s2 = sld [smem:[#allocation4 + $0x5]] }
 0x26d   : > { %594 = vrot.lane.b32.xlu0 %v542_v9, %s1841_s21  ;;  %596 = vrot.lane.b32.xlu1 %v543_v8, %s1841_s21  ;;  %v670_v8 = vstv %s2228_s8  ;;  %s2248_s21 = sld [smem:[#allocation4 + $0x1e]] }
 0x26e   : > { %s1326_s8 = sld [smem:[#allocation4 + $0x20]] }
 0x26f   : > { %v690_v28 = vstv %s2244_s20  ;;  %s1330_s20 = sld [smem:[#allocation4 + $0xc]] }
 0x273   : > { %v695_v34 = vstv %s2248_s21  ;;  %s1331_s21 = sld [smem:[#allocation4 + $0x13]] }
 0x2b3   : > { %v489_v30 = vpop.permute.xlu0 %488  ;;  %v498_v33 = vpop.permute.xlu1 %497 }
 0x2b4   : > { %495 = vst.msk [vmem:[#allocation3 + $0x10] sm:$0xff] %vm356_vm0, %v489_v30  ;;  %504 = vst.msk [vmem:[#allocation3 + $0x20] sm:$0xff] %vm356_vm0, %v498_v33 }
 0x2b7   : > { %v491_v36 = vpop.permute.xlu0 %490  ;;  %v500_v39 = vpop.permute.xlu1 %499 }
 0x2b8   : > { %496 = vst.msk [vmem:[#allocation3 + $0x18] sm:$0x3f] %vm484_vm12, %v491_v36  ;;  %505 = vst.msk [vmem:[#allocation3 + $0x28] sm:$0x3f] %vm484_vm12, %v500_v39 }
 0x2bb   : > { %v639_v41 = vld [vmem:[#allocation3 + $0x10] sm:$0xff]  ;;  %v507_v42 = vpop.permute.xlu0 %506  ;;  %v509_v45 = vpop.permute.xlu1 %508  ;;  %v674_v15 = vld [vmem:[#allocation3 + $0x20] sm:$0xff] }
 0x2bc   : > { %v641_v44 = vmul.f32 %v640_v40, %v639_v41  ;;  %513 = vst.msk [vmem:[#allocation3 + $0x30] sm:$0xff] %vm356_vm0, %v507_v42  ;;  %v676_v22 = vmul.f32 %v675_v14, %v674_v15  ;;  %v735_v14 = vstv %s2280_s23  ;;  %s1339_s23 = sld [smem:[#allocation4 + $0x1b]] }
 0x2bd   : > { %514 = vst.msk [vmem:[#allocation3 + $0x38] sm:$0x3f] %vm484_vm12, %v509_v45 }
 0x2be   : > { %v642_v51 = vadd.f32 %v641_v44, %v637_v43  ;;  %v705_v44 = vstv %s2254_s29  ;;  %s1333_s29 = sld [smem:[#allocation4 + $0x21]] }
 0x2bf   : > { %v644_v48 = vld [vmem:[#allocation3 + $0x11] sm:$0xff]  ;;  %v516_v50 = vpop.permute.xlu0 %515  ;;  %v518_v53 = vpop.permute.xlu1 %517  ;;  %v679_v19 = vld [vmem:[#allocation3 + $0x21] sm:$0xff] }
 0x2c0   : > { %v649_v49 = vld [vmem:[#allocation3 + $0x12] sm:$0xff]  ;;  %v646_v52 = vmul.f32 %v645_v46, %v644_v48  ;;  %522 = vst.msk [vmem:[#allocation3 + $0x40] sm:$0xff] %vm356_vm0, %v516_v50  ;;  %v684_v25 = vld [vmem:[#allocation3 + $0x22] sm:$0xff]  ;;  %v681_v27 = vmul.f32 %v680_v18, %v679_v19  ;;  %v710_v46 = vstv %s2258_s6  ;;  %v740_v18 = vstv %s2283_s13  ;;  %s1334_s6 = sld [smem:[#allocation4 + $0x28]] }
 0x2c1   : > { %v654_v55 = vld [vmem:[#allocation3 + $0x13] sm:$0xff]  ;;  %523 = vst.msk [vmem:[#allocation3 + $0x48] sm:$0x3f] %vm484_vm12, %v518_v53  ;;  %v651_v57 = vmul.f32 %v650_v47, %v649_v49  ;;  %v689_v29 = vld [vmem:[#allocation3 + $0x23] sm:$0xff]  ;;  %v686_v32 = vmul.f32 %v685_v24, %v684_v25  ;;  %s1340_s13 = sld [smem:[#allocation4 + $0x22]] }
 0x2c2   : > { %v647_v56 = vadd.f32 %v646_v52, %v642_v51  ;;  %v659_v59 = vld [vmem:[#allocation3 + $0x14] sm:$0xff]  ;;  %v656_v62 = vmul.f32 %v655_v54, %v654_v55  ;;  %v694_v35 = vld [vmem:[#allocation3 + $0x24] sm:$0xff]  ;;  %v691_v37 = vmul.f32 %v690_v28, %v689_v29  ;;  %v715_v55 = vstv %s2264_s25  ;;  %s1335_s25 = sld [smem:[#allocation4 + $0x2f]] }
 0x2c3   : > { %v525_v60 = vpop.permute.xlu0 %524  ;;  %v527_v63 = vpop.permute.xlu1 %526  ;;  %v664_v5 = vld [vmem:[#allocation3 + $0x15] sm:$0xff]  ;;  %v661_v7 = vmul.f32 %v660_v58, %v659_v59  ;;  %v699_v39 = vld [vmem:[#allocation3 + $0x25] sm:$0xff]  ;;  %v696_v42 = vmul.f32 %v695_v34, %v694_v35  ;;  %v720_v58 = vstv %s2268_s30  ;;  %v760_v34 = vstv %s1325_s9  ;;  %s1336_s30 = sld [smem:[#allocation4 + $0x6]] }
 0x2c4   : > { %v652_v61 = vadd.f32 %v651_v57, %v647_v56  ;;  %531 = vst.msk [vmem:[#allocation3 + $0x50] sm:$0xff] %vm356_vm0, %v525_v60  ;;  %v669_v9 = vld [vmem:[#allocation3 + $0x16] sm:$0xff]  ;;  %v666_v12 = vmul.f32 %v665_v4, %v664_v5  ;;  %v704_v45 = vld [vmem:[#allocation3 + $0x26] sm:$0xff]  ;;  %v701_v49 = vmul.f32 %v700_v38, %v699_v39  ;;  %v725_v4 = vstv %s2273_s4  ;;  %s1337_s4 = sld [smem:[#allocation4 + $0xd]] }
 0x2c5   : > { %532 = vst.msk [vmem:[#allocation3 + $0x58] sm:$0x3f] %vm484_vm12, %v527_v63  ;;  %v671_v17 = vmul.f32 %v670_v8, %v669_v9  ;;  %v709_v47 = vld [vmem:[#allocation3 + $0x30] sm:$0xff]  ;;  %v706_v52 = vmul.f32 %v705_v44, %v704_v45  ;;  %v730_v8 = vstv %s2276_s14  ;;  %v765_v38 = vstv %s1326_s8  ;;  %s1338_s14 = sld [smem:[#allocation4 + $0x14]] }
 0x2c6   : > { %v657_v6 = vadd.f32 %v656_v62, %v652_v61  ;;  %v711_v53 = vmul.f32 %v710_v46, %v709_v47  ;;  %v714_v56 = vld [vmem:[#allocation3 + $0x31] sm:$0xff]  ;;  %v775_v46 = vstv %s1328_s5  ;;  %s2302_s9 = sld [smem:[#allocation4 + $0x38]] }
 0x2c7   : > { %v534_v10 = vpop.permute.xlu0 %533  ;;  %v536_v13 = vpop.permute.xlu1 %535  ;;  %v719_v59 = vld [vmem:[#allocation3 + $0x32] sm:$0xff]  ;;  %v716_v62 = vmul.f32 %v715_v55, %v714_v56  ;;  %v785_v55 = vstv %s1330_s20  ;;  %s2304_s8 = sld [smem:[#allocation4 + $0x3f]] }
 0x2c8   : > { %v662_v11 = vadd.f32 %v661_v7, %v657_v6  ;;  %540 = vst.msk [vmem:[#allocation3 + $0x60] sm:$0xff] %vm356_vm0, %v534_v10  ;;  %v724_v5 = vld [vmem:[#allocation3 + $0x33] sm:$0xff]  ;;  %v721_v7 = vmul.f32 %v720_v58, %v719_v59  ;;  %v749_v28 = vld [vmem:[#allocation3 + $0x41] sm:$0xff]  ;;  %v790_v58 = vstv %s1331_s21  ;;  %s1347_s5 = sld [smem:[#allocation4 + $0x4d]] }
 0x2c9   : > { %541 = vst.msk [vmem:[#allocation3 + $0x68] sm:$0x3f] %vm484_vm12, %v536_v13  ;;  %v729_v9 = vld [vmem:[#allocation3 + $0x34] sm:$0xff]  ;;  %v759_v35 = vld [vmem:[#allocation3 + $0x43] sm:$0xff]  ;;  %s1349_s20 = sld [smem:[#allocation4 + $0x5b]] }
 0x2ca   : > { %v667_v16 = vadd.f32 %v666_v12, %v662_v11  ;;  %v726_v12 = vmul.f32 %v725_v4, %v724_v5  ;;  %v734_v15 = vld [vmem:[#allocation3 + $0x35] sm:$0xff]  ;;  %v764_v39 = vld [vmem:[#allocation3 + $0x44] sm:$0xff]  ;;  %s1350_s21 = sld [smem:[#allocation4 + $0x32]] }
 0x2cb   : > { %v550_v20 = vpop.permute.xlu0 %549  ;;  %v552_v23 = vpop.permute.xlu1 %551  ;;  %v739_v19 = vld [vmem:[#allocation3 + $0x36] sm:$0xff]  ;;  %v766_v45 = vmul.f32 %v765_v38, %v764_v39  ;;  %v774_v47 = vld [vmem:[#allocation3 + $0x46] sm:$0xff] }
 0x2cc   : > { %v672_v21 = vadd.f32 %v671_v17, %v667_v16  ;;  %556 = vst.msk [vmem:[#allocation3 + $0x80] sm:$0xff] %vm356_vm0, %v550_v20  ;;  %v731_v17 = vmul.f32 %v730_v8, %v729_v9  ;;  %v745_v20 = vstv %s2286_s18  ;;  %v741_v25 = vmul.f32 %v740_v18, %v739_v19  ;;  %v784_v56 = vld [vmem:[#allocation3 + $0x51] sm:$0xff]  ;;  %s1341_s18 = sld [smem:[#allocation4 + $0x29]] }
 0x2cd   : > { %557 = vst.msk [vmem:[#allocation3 + $0x88] sm:$0x3f] %vm484_vm12, %v552_v23  ;;  %v736_v23 = vmul.f32 %v735_v14, %v734_v15  ;;  %v789_v59 = vld [vmem:[#allocation3 + $0x52] sm:$0xff]  ;;  %v810_v14 = vstv %s1335_s25  ;;  %s1354_s25 = sld [smem:[#allocation4 + $0x4e]] }
 0x2ce   : > { %v677_v26 = vadd.f32 %v676_v22, %v672_v21  ;;  %v744_v21 = vld [vmem:[#allocation3 + $0x40] sm:$0xff]  ;;  %v791_v5 = vmul.f32 %v790_v58, %v789_v59  ;;  %v809_v15 = vld [vmem:[#allocation3 + $0x56] sm:$0xff] }
 0x2cf   : > { %v559_v30 = vpop.permute.xlu0 %558  ;;  %v561_v33 = vpop.permute.xlu1 %560 }
 0x2d0   : > { %v682_v31 = vadd.f32 %v681_v27, %v677_v26  ;;  %565 = vst.msk [vmem:[#allocation3 + $0x90] sm:$0xff] %vm356_vm0, %v559_v30  ;;  %v746_v26 = vmul.f32 %v745_v20, %v744_v21  ;;  %v750_v27 = vstv %s2292_s24  ;;  %v755_v30 = vstv %s1324_s15  ;;  %s2300_s24 = sld [smem:[#allocation4 + $0x30]]  ;;  %v839_v39 = vld [vmem:[#allocation3 + $0x65] sm:$0xff] }
 0x2d1   : > { %566 = vst.msk [vmem:[#allocation3 + $0x98] sm:$0x3f] %vm484_vm12, %v561_v33  ;;  %v751_v33 = vmul.f32 %v750_v27, %v749_v28  ;;  %v811_v21 = vmul.f32 %v810_v14, %v809_v15  ;;  %s1343_s15 = sld [smem:[#allocation4 + $0x31]]  ;;  %v824_v27 = vld [vmem:[#allocation3 + $0x62] sm:$0xff] }
 0x2d2   : > { %v687_v36 = vadd.f32 %v686_v32, %v682_v31  ;;  %v754_v31 = vld [vmem:[#allocation3 + $0x42] sm:$0xff]  ;;  %v840_v38 = vstv %s1341_s18  ;;  %s1360_s18 = sld [smem:[#allocation4 + $0x48]] }
 0x2d3   : > { %v568_v40 = vpop.permute.xlu0 %567  ;;  %v570_v43 = vpop.permute.xlu1 %569  ;;  %v884_v14 = vld [vmem:[#allocation3 + $0x80] sm:$0xff] }
 0x2d4   : > { %v692_v41 = vadd.f32 %v691_v37, %v687_v36  ;;  %574 = vst.msk [vmem:[#allocation3 + $0xa0] sm:$0xff] %vm356_vm0, %v568_v40  ;;  %v756_v37 = vmul.f32 %v755_v30, %v754_v31  ;;  %v830_v30 = vstv %s1339_s23  ;;  %v829_v31 = vld [vmem:[#allocation3 + $0x63] sm:$0xff]  ;;  %s1358_s23 = sld [smem:[#allocation4 + $0x3a]] }
 0x2d5   : > { %575 = vst.msk [vmem:[#allocation3 + $0xa8] sm:$0x3f] %vm484_vm12, %v570_v43  ;;  %v769_v43 = vld [vmem:[#allocation3 + $0x45] sm:$0xff] }
 0x2d6   : > { %v697_v48 = vadd.f32 %v696_v42, %v692_v41  ;;  %v761_v41 = vmul.f32 %v760_v34, %v759_v35  ;;  %v770_v42 = vstv %s1327_s12  ;;  %v835_v34 = vstv %s1340_s13  ;;  %v834_v35 = vld [vmem:[#allocation3 + $0x64] sm:$0xff]  ;;  %s2306_s12 = sld [smem:[#allocation4 + $0x46]] }
 0x2d7   : > { %v577_v50 = vpop.permute.xlu0 %576  ;;  %v579_v54 = vpop.permute.xlu1 %578  ;;  %s1359_s13 = sld [smem:[#allocation4 + $0x41]] }
 0x2d8   : > { %v702_v51 = vadd.f32 %v701_v49, %v697_v48  ;;  %583 = vst.msk [vmem:[#allocation3 + $0xb0] sm:$0xff] %vm356_vm0, %v577_v50  ;;  %v780_v48 = vstv %s1329_s2  ;;  %v779_v49 = vld [vmem:[#allocation3 + $0x50] sm:$0xff]  ;;  %s1348_s2 = sld [smem:[#allocation4 + $0x54]] }
 0x2d9   : > { %584 = vst.msk [vmem:[#allocation3 + $0xb8] sm:$0x3f] %vm484_vm12, %v579_v54  ;;  %v781_v54 = vmul.f32 %v780_v48, %v779_v49  ;;  %v854_v48 = vld [vmem:[#allocation3 + $0x71] sm:$0xff]  ;;  %v855_v49 = vstv %s2302_s9  ;;  %s1363_s9 = sld [smem:[#allocation4 + $0x5d]] }
 0x2da   : > { %v707_v57 = vadd.f32 %v706_v52, %v702_v51  ;;  %v771_v51 = vmul.f32 %v770_v42, %v769_v43  ;;  %v845_v42 = vstv %s2300_s24  ;;  %v849_v43 = vld [vmem:[#allocation3 + $0x70] sm:$0xff]  ;;  %s1361_s24 = sld [smem:[#allocation4 + $0x4f]] }
 0x2db   : > { %v586_v60 = vpop.permute.xlu0 %585  ;;  %v588_v63 = vpop.permute.xlu1 %587 }
 0x2dc   : > { %v712_v61 = vadd.f32 %v711_v53, %v707_v57  ;;  %592 = vst.msk [vmem:[#allocation3 + $0xc0] sm:$0xff] %vm356_vm0, %v586_v60  ;;  %v776_v53 = vmul.f32 %v775_v46, %v774_v47  ;;  %v841_v47 = vmul.f32 %v840_v38, %v839_v39  ;;  %v865_v58 = vstv %s2306_s12  ;;  %v914_v39 = vld [vmem:[#allocation3 + $0x86] sm:$0xff]  ;;  %s1365_s12 = sld [smem:[#allocation4 + $0x3b]] }
 0x2dd   : > { %593 = vst.msk [vmem:[#allocation3 + $0xc8] sm:$0x3f] %vm484_vm12, %v588_v63  ;;  %v794_v63 = vld [vmem:[#allocation3 + $0x53] sm:$0xff] }
 0x2de   : > { %v717_v6 = vadd.f32 %v716_v62, %v712_v61  ;;  %v786_v61 = vmul.f32 %v785_v55, %v784_v56  ;;  %v795_v62 = vstv %s1332_s11  ;;  %v856_v55 = vmul.f32 %v855_v49, %v854_v48  ;;  %s1351_s11 = sld [smem:[#allocation4 + $0x39]]  ;;  %v924_v48 = vld [vmem:[#allocation3 + $0x91] sm:$0xff] }
 0x2df   : > { %v595_v10 = vpop.permute.xlu0 %594  ;;  %v597_v13 = vpop.permute.xlu1 %596  ;;  %v796_v9 = vmul.f32 %v795_v62, %v794_v63  ;;  %v870_v62 = vstv %s1347_s5  ;;  %s1366_s5 = sld [smem:[#allocation4 + $0x42]] }
 0x2e0   : > { %v722_v11 = vadd.f32 %v721_v7, %v717_v6  ;;  %601 = vst.msk [vmem:[#allocation3 + $0xd0] sm:$0xff] %vm356_vm0, %v595_v10  ;;  %v800_v6 = vstv %s1333_s29  ;;  %v799_v7 = vld [vmem:[#allocation3 + $0x54] sm:$0xff]  ;;  %v805_v10 = vstv %s1334_s6  ;;  %s1352_s29 = sld [smem:[#allocation4 + $0x40]] }
 0x2e1   : > { %602 = vst.msk [vmem:[#allocation3 + $0xd8] sm:$0x3f] %vm484_vm12, %v597_v13  ;;  %v801_v13 = vmul.f32 %v800_v6, %v799_v7  ;;  %v875_v6 = vstv %s1348_s2  ;;  %s1353_s6 = sld [smem:[#allocation4 + $0x47]] }
 0x2e2   : > { %v727_v16 = vadd.f32 %v726_v12, %v722_v11  ;;  %v804_v11 = vld [vmem:[#allocation3 + $0x55] sm:$0xff]  ;;  %s1367_s2 = sld [smem:[#allocation4 + $0x49]] }
 0x2e3   : > { %v806_v19 = vmul.f32 %v805_v10, %v804_v11  ;;  %v880_v10 = vstv %s1349_s20  ;;  %s1368_s20 = sld [smem:[#allocation4 + $0x50]] }
 0x2e4   : > { %v732_v22 = vadd.f32 %v731_v17, %v727_v16  ;;  %v815_v16 = vstv %s1336_s30  ;;  %v814_v17 = vld [vmem:[#allocation3 + $0x60] sm:$0xff]  ;;  %s1355_s30 = sld [smem:[#allocation4 + $0x55]] }
 0x2e6   : > { %v737_v24 = vadd.f32 %v736_v23, %v732_v22  ;;  %v816_v22 = vmul.f32 %v815_v16, %v814_v17  ;;  %v820_v23 = vstv %s1337_s4  ;;  %s1356_s4 = sld [smem:[#allocation4 + $0x5c]] }
 0x2e8   : > { %v742_v29 = vadd.f32 %v741_v25, %v737_v24  ;;  %v819_v24 = vld [vmem:[#allocation3 + $0x61] sm:$0xff] }
 0x2ea   : > { %v747_v32 = vadd.f32 %v746_v26, %v742_v29  ;;  %v825_v26 = vstv %s1338_s14  ;;  %v821_v29 = vmul.f32 %v820_v23, %v819_v24  ;;  %v894_v23 = vld [vmem:[#allocation3 + $0x82] sm:$0xff]  ;;  %s1357_s14 = sld [smem:[#allocation4 + $0x33]] }
 0x2ec   : > { %v752_v36 = vadd.f32 %v751_v33, %v747_v32  ;;  %v826_v33 = vmul.f32 %v825_v26, %v824_v27  ;;  %v900_v26 = vstv %s1353_s6  ;;  %v899_v27 = vld [vmem:[#allocation3 + $0x83] sm:$0xff]  ;;  %v915_v38 = vstv %s1356_s4  ;;  %s1372_s6 = sld [smem:[#allocation4 + $0x3c]] }
 0x2ed   : > { %s1375_s4 = sld [smem:[#allocation4 + $0x51]] }
 0x2ee   : > { %v757_v40 = vadd.f32 %v756_v37, %v752_v36  ;;  %v831_v37 = vmul.f32 %v830_v30, %v829_v31  ;;  %v905_v30 = vstv %s1354_s25  ;;  %v904_v31 = vld [vmem:[#allocation3 + $0x84] sm:$0xff]  ;;  %s1373_s25 = sld [smem:[#allocation4 + $0x43]] }
 0x2f0   : > { %v762_v44 = vadd.f32 %v761_v41, %v757_v40  ;;  %v836_v41 = vmul.f32 %v835_v34, %v834_v35  ;;  %v910_v34 = vstv %s1355_s30  ;;  %v909_v35 = vld [vmem:[#allocation3 + $0x85] sm:$0xff]  ;;  %s1374_s30 = sld [smem:[#allocation4 + $0x4a]] }
 0x2f2   : > { %v767_v50 = vadd.f32 %v766_v45, %v762_v44  ;;  %v850_v44 = vstv %s1343_s15  ;;  %v844_v45 = vld [vmem:[#allocation3 + $0x66] sm:$0xff]  ;;  %s1362_s15 = sld [smem:[#allocation4 + $0x56]] }
 0x2f4   : > { %v772_v52 = vadd.f32 %v771_v51, %v767_v50  ;;  %v851_v50 = vmul.f32 %v850_v44, %v849_v43  ;;  %v911_v43 = vmul.f32 %v910_v34, %v909_v35  ;;  %v984_v35 = vld [vmem:[#allocation3 + $0xa6] sm:$0xff] }
 0x2f6   : > { %v777_v57 = vadd.f32 %v776_v53, %v772_v52  ;;  %v846_v52 = vmul.f32 %v845_v42, %v844_v45  ;;  %v859_v53 = vld [vmem:[#allocation3 + $0x72] sm:$0xff]  ;;  %v916_v45 = vmul.f32 %v915_v38, %v914_v39 }
 0x2f8   : > { %v782_v60 = vadd.f32 %v781_v54, %v777_v57  ;;  %v860_v54 = vstv %s2304_s8  ;;  %v864_v57 = vld [vmem:[#allocation3 + $0x73] sm:$0xff]  ;;  %s1364_s8 = sld [smem:[#allocation4 + $0x34]] }
 0x2f9   : > { %v861_v59 = vmul.f32 %v860_v54, %v859_v53  ;;  %v866_v63 = vmul.f32 %v865_v58, %v864_v57  ;;  %v935_v54 = vstv %s1360_s18  ;;  %v940_v58 = vstv %s1361_s24  ;;  %s1379_s18 = sld [smem:[#allocation4 + $0x3d]] }
 0x2fa   : > { %v787_v4 = vadd.f32 %v786_v61, %v782_v60  ;;  %v869_v61 = vld [vmem:[#allocation3 + $0x74] sm:$0xff]  ;;  %s1380_s24 = sld [smem:[#allocation4 + $0x44]] }
 0x2fb   : > { %v871_v7 = vmul.f32 %v870_v62, %v869_v61  ;;  %v945_v62 = vstv %s1362_s15  ;;  %s1381_s15 = sld [smem:[#allocation4 + $0x4b]] }
 0x2fc   : > { %v792_v8 = vadd.f32 %v791_v5, %v787_v4  ;;  %v874_v5 = vld [vmem:[#allocation3 + $0x75] sm:$0xff] }
 0x2fd   : > { %v876_v11 = vmul.f32 %v875_v6, %v874_v5  ;;  %v950_v6 = vstv %s1363_s9  ;;  %s1382_s9 = sld [smem:[#allocation4 + $0x52]] }
 0x2fe   : > { %v797_v12 = vadd.f32 %v796_v9, %v792_v8  ;;  %v879_v9 = vld [vmem:[#allocation3 + $0x76] sm:$0xff] }
 0x2ff   : > { %v881_v15 = vmul.f32 %v880_v10, %v879_v9  ;;  %v954_v9 = vld [vmem:[#allocation3 + $0xa0] sm:$0xff] }
 0x300   : > { %v802_v18 = vadd.f32 %v801_v13, %v797_v12  ;;  %v885_v13 = vstv %s1350_s21  ;;  %s1369_s21 = sld [smem:[#allocation4 + $0x57]] }
 0x302   : > { %v807_v20 = vadd.f32 %v806_v19, %v802_v18  ;;  %v886_v18 = vmul.f32 %v885_v13, %v884_v14  ;;  %v890_v19 = vstv %s1351_s11  ;;  %s1370_s11 = sld [smem:[#allocation4 + $0x5e]] }
 0x304   : > { %v812_v25 = vadd.f32 %v811_v21, %v807_v20  ;;  %v889_v20 = vld [vmem:[#allocation3 + $0x81] sm:$0xff] }
 0x306   : > { %v817_v28 = vadd.f32 %v816_v22, %v812_v25  ;;  %v895_v22 = vstv %s1352_s29  ;;  %v891_v25 = vmul.f32 %v890_v19, %v889_v20  ;;  %v964_v19 = vld [vmem:[#allocation3 + $0xa2] sm:$0xff]  ;;  %s1371_s29 = sld [smem:[#allocation4 + $0x35]] }
 0x308   : > { %v822_v32 = vadd.f32 %v821_v29, %v817_v28  ;;  %v896_v29 = vmul.f32 %v895_v22, %v894_v23  ;;  %v970_v22 = vstv %s1367_s2  ;;  %v969_v23 = vld [vmem:[#allocation3 + $0xa3] sm:$0xff]  ;;  %v985_v34 = vstv %s1370_s11  ;;  %s1386_s2 = sld [smem:[#allocation4 + $0x3e]] }
 0x309   : > { %s1389_s11 = sld [smem:[#allocation4 + $0x53]] }
 0x30a   : > { %v827_v36 = vadd.f32 %v826_v33, %v822_v32  ;;  %v901_v33 = vmul.f32 %v900_v26, %v899_v27  ;;  %v975_v26 = vstv %s1368_s20  ;;  %v974_v27 = vld [vmem:[#allocation3 + $0xa4] sm:$0xff]  ;;  %s1387_s20 = sld [smem:[#allocation4 + $0x45]] }
 0x30c   : > { %v832_v40 = vadd.f32 %v831_v37, %v827_v36  ;;  %v906_v37 = vmul.f32 %v905_v30, %v904_v31  ;;  %v980_v30 = vstv %s1369_s21  ;;  %v979_v31 = vld [vmem:[#allocation3 + $0xa5] sm:$0xff]  ;;  %s1388_s21 = sld [smem:[#allocation4 + $0x4c]] }
 0x30d   : > { %v981_v39 = vmul.f32 %v980_v30, %v979_v31  ;;  %v1054_v31 = vld [vmem:[#allocation3 + $0xc6] sm:$0xff] }
 0x30e   : > { %v837_v46 = vadd.f32 %v836_v41, %v832_v40  ;;  %v920_v40 = vstv %s1357_s14  ;;  %v919_v41 = vld [vmem:[#allocation3 + $0x90] sm:$0xff]  ;;  %s1376_s14 = sld [smem:[#allocation4 + $0x58]] }
 0x310   : > { %v842_v51 = vadd.f32 %v841_v47, %v837_v46  ;;  %v921_v46 = vmul.f32 %v920_v40, %v919_v41  ;;  %v925_v47 = vstv %s1358_s23  ;;  %v986_v41 = vmul.f32 %v985_v34, %v984_v35  ;;  %s1377_s23 = sld [smem:[#allocation4 + $0x5f]] }
 0x311   : > { %v926_v53 = vmul.f32 %v925_v47, %v924_v48  ;;  %v999_v47 = vld [vmem:[#allocation3 + $0xb2] sm:$0xff] }
 0x312   : > { %v847_v56 = vadd.f32 %v846_v52, %v842_v51  ;;  %v929_v51 = vld [vmem:[#allocation3 + $0x92] sm:$0xff] }
 0x314   : > { %v852_v60 = vadd.f32 %v851_v50, %v847_v56  ;;  %v930_v50 = vstv %s1359_s13  ;;  %s1378_s13 = sld [smem:[#allocation4 + $0x36]] }
 0x315   : > { %v931_v57 = vmul.f32 %v930_v50, %v929_v51  ;;  %v1005_v50 = vstv %s1374_s30  ;;  %v1004_v51 = vld [vmem:[#allocation3 + $0xb3] sm:$0xff]  ;;  %s2490_s30 = sld [smem:[#allocation21_spill]] }
 0x316   : > { %v857_v4 = vadd.f32 %v856_v55, %v852_v60  ;;  %v934_v55 = vld [vmem:[#allocation3 + $0x93] sm:$0xff] }
 0x317   : > { %v936_v61 = vmul.f32 %v935_v54, %v934_v55  ;;  %v1010_v54 = vstv %s1375_s4  ;;  %v1009_v55 = vld [vmem:[#allocation3 + $0xb4] sm:$0xff] }
 0x318   : > { %v862_v8 = vadd.f32 %v861_v59, %v857_v4  ;;  %v939_v59 = vld [vmem:[#allocation3 + $0x94] sm:$0xff] }
 0x319   : > { %v941_v5 = vmul.f32 %v940_v58, %v939_v59  ;;  %v1015_v58 = vstv %s1376_s14  ;;  %v1014_v59 = vld [vmem:[#allocation3 + $0xb5] sm:$0xff] }
 0x31a   : > { %v867_v12 = vadd.f32 %v866_v63, %v862_v8  ;;  %v944_v63 = vld [vmem:[#allocation3 + $0x95] sm:$0xff]  ;;  %v955_v8 = vstv %s1364_s8  ;;  %s1383_s8 = sld [smem:[#allocation4 + $0x59]] }
 0x31b   : > { %v956_v14 = vmul.f32 %v955_v8, %v954_v9 }
 0x31c   : > { %v872_v16 = vadd.f32 %v871_v7, %v867_v12  ;;  %v949_v7 = vld [vmem:[#allocation3 + $0x96] sm:$0xff] }
 0x31d   : > { %v951_v13 = vmul.f32 %v950_v6, %v949_v7  ;;  %v1016_v7 = vmul.f32 %v1015_v58, %v1014_v59  ;;  %v1089_v59 = vld [vmem:[#allocation3 + $0xd6] sm:$0xff] }
 0x31e   : > { %v877_v17 = vadd.f32 %v876_v11, %v872_v16  ;;  %v946_v11 = vmul.f32 %v945_v62, %v944_v63  ;;  %v959_v16 = vld [vmem:[#allocation3 + $0xa1] sm:$0xff]  ;;  %v1020_v62 = vstv %s1377_s23  ;;  %v1019_v63 = vld [vmem:[#allocation3 + $0xb6] sm:$0xff] }
 0x31f   : > { %v1021_v9 = vmul.f32 %v1020_v62, %v1019_v63 }
 0x320   : > { %v882_v21 = vadd.f32 %v881_v15, %v877_v17  ;;  %v960_v15 = vstv %s1365_s12  ;;  %s1384_s12 = sld [smem:[#allocation4 + $0x60]] }
 0x322   : > { %v887_v24 = vadd.f32 %v886_v18, %v882_v21  ;;  %v965_v18 = vstv %s1366_s5  ;;  %v961_v21 = vmul.f32 %v960_v15, %v959_v16  ;;  %v1034_v15 = vld [vmem:[#allocation3 + $0xc2] sm:$0xff]  ;;  %s1385_s5 = sld [smem:[#allocation4 + $0x37]] }
 0x324   : > { %v892_v28 = vadd.f32 %v891_v25, %v887_v24  ;;  %v966_v25 = vmul.f32 %v965_v18, %v964_v19  ;;  %v1040_v18 = vstv %s1381_s15  ;;  %v1039_v19 = vld [vmem:[#allocation3 + $0xc3] sm:$0xff] }
 0x326   : > { %v897_v32 = vadd.f32 %v896_v29, %v892_v28  ;;  %v971_v29 = vmul.f32 %v970_v22, %v969_v23  ;;  %v1045_v22 = vstv %s1382_s9  ;;  %v1044_v23 = vld [vmem:[#allocation3 + $0xc4] sm:$0xff]  ;;  %v1055_v30 = vstv %s1384_s12  ;;  %s2492_s9 = sld [smem:[#allocation33_spill]]  ;;  %s1107_s12 = scalar_lea.sflag [#allocation6], %s2144_s7 }
 0x328   : > { %v902_v36 = vadd.f32 %v901_v33, %v897_v32  ;;  %v976_v33 = vmul.f32 %v975_v26, %v974_v27  ;;  %v1050_v26 = vstv %s1383_s8  ;;  %v1049_v27 = vld [vmem:[#allocation3 + $0xc5] sm:$0xff] }
 0x329   : > { %v1051_v35 = vmul.f32 %v1050_v26, %v1049_v27 }
 0x32a   : > { %v907_v42 = vadd.f32 %v906_v37, %v902_v36  ;;  %v990_v36 = vstv %s1371_s29  ;;  %v989_v37 = vld [vmem:[#allocation3 + $0xb0] sm:$0xff]  ;;  %s1390_s29 = sld [smem:[#allocation4 + $0x5a]] }
 0x32c   : > { %v912_v44 = vadd.f32 %v911_v43, %v907_v42  ;;  %v991_v42 = vmul.f32 %v990_v36, %v989_v37  ;;  %v995_v43 = vstv %s1372_s6  ;;  %v1056_v37 = vmul.f32 %v1055_v30, %v1054_v31  ;;  %s1391_s6 = sld [smem:[#allocation4 + $0x61]] }
 0x32e   : > { %v917_v49 = vadd.f32 %v916_v45, %v912_v44  ;;  %v994_v44 = vld [vmem:[#allocation3 + $0xb1] sm:$0xff] }
 0x330   : > { %v922_v52 = vadd.f32 %v921_v46, %v917_v49  ;;  %v1000_v46 = vstv %s1373_s25  ;;  %v996_v49 = vmul.f32 %v995_v43, %v994_v44  ;;  %v1069_v43 = vld [vmem:[#allocation3 + $0xd2] sm:$0xff]  ;;  %s2489_s25 = sld [smem:[#allocation22_spill]] }
 0x332   : > { %v927_v56 = vadd.f32 %v926_v53, %v922_v52  ;;  %v1001_v53 = vmul.f32 %v1000_v46, %v999_v47  ;;  %v1075_v46 = vstv %s1388_s21  ;;  %v1074_v47 = vld [vmem:[#allocation3 + $0xd3] sm:$0xff]  ;;  %v1090_v58 = vstv %s1391_s6 }
 0x333   : > { %v1091_v63 = vmul.f32 %v1090_v58, %v1089_v59 }
 0x334   : > { %v932_v60 = vadd.f32 %v931_v57, %v927_v56  ;;  %v1006_v57 = vmul.f32 %v1005_v50, %v1004_v51  ;;  %v1080_v50 = vstv %s1389_s11  ;;  %v1079_v51 = vld [vmem:[#allocation3 + $0xd4] sm:$0xff] }
 0x336   : > { %v937_v4 = vadd.f32 %v936_v61, %v932_v60  ;;  %v1011_v61 = vmul.f32 %v1010_v54, %v1009_v55  ;;  %v1085_v54 = vstv %s1390_s29  ;;  %v1084_v55 = vld [vmem:[#allocation3 + $0xd5] sm:$0xff]  ;;  %s1393_s4 = sshll.u32 %s2489_s25, 3 }
 0x337   : > { %s1118_s14 = sadd.s32 %s2490_s30, %s1393_s4 }
 0x338   : > { %v942_v10 = vadd.f32 %v941_v5, %v937_v4  ;;  %v1025_v4 = vstv %s1378_s13  ;;  %v1024_v5 = vld [vmem:[#allocation3 + $0xc0] sm:$0xff]  ;;  %s1394_s23 = sshll.u32 %s1118_s14, 7  ;;  %s2491_s13 = sld [smem:[#allocation29_spill]] }
 0x339   : > { %s2318_s8 = scalar_lea.hbm %s2492_s9, %s1394_s23 }
 0x33a   : > { %v947_v12 = vadd.f32 %v946_v11, %v942_v10  ;;  %v1026_v10 = vmul.f32 %v1025_v4, %v1024_v5  ;;  %v1030_v11 = vstv %s1379_s18  ;;  %s1121_s18 = sshll.u32 %s2195_s10, 4  ;;  %s2320_s18 = int_to_ptr.vmem [resolvable:$true] %s1121_s18 }
 0x33c   : > { %v952_v17 = vadd.f32 %v951_v13, %v947_v12  ;;  %v1029_v12 = vld [vmem:[#allocation3 + $0xc1] sm:$0xff] }
 0x33e   : > { %v957_v20 = vadd.f32 %v956_v14, %v952_v17  ;;  %v1035_v14 = vstv %s1380_s24  ;;  %v1031_v17 = vmul.f32 %v1030_v11, %v1029_v12  ;;  %p2493_p5 = scmp.ne.s32.totalorder %s2491_s13, 0 }
 0x340   : > { %v962_v24 = vadd.f32 %v961_v21, %v957_v20  ;;  %v1036_v21 = vmul.f32 %v1035_v14, %v1034_v15 }
 0x342   : > { %v967_v28 = vadd.f32 %v966_v25, %v962_v24  ;;  %v1041_v25 = vmul.f32 %v1040_v18, %v1039_v19 }
 0x344   : > { %v972_v32 = vadd.f32 %v971_v29, %v967_v28  ;;  %v1046_v29 = vmul.f32 %v1045_v22, %v1044_v23 }
 0x346   : > { %v977_v38 = vadd.f32 %v976_v33, %v972_v32  ;;  %v1060_v32 = vstv %s1385_s5  ;;  %v1059_v33 = vld [vmem:[#allocation3 + $0xd0] sm:$0xff]  ;;  %s1661_s5 = scalar_lea.vmem %s2320_s18, 512 }
 0x347   : > { %p1662_p7 = scmp.ne.s32.totalorder %s2320_s18, %s1661_s5 }
 0x348   : > { %v982_v40 = vadd.f32 %v981_v39, %v977_v38  ;;  %v1061_v38 = vmul.f32 %v1060_v32, %v1059_v33  ;;  %v1065_v39 = vstv %s1386_s2  ;;  %s1842_s2 = smov [#allocation12]  }
 0x349   : > { %p1663_p4 = pnand %p1662_p7, %p2493_p5 }
 0x34a   : > { %v987_v45 = vadd.f32 %v986_v41, %v982_v40  ;;  %v1064_v40 = vld [vmem:[#allocation3 + $0xd1] sm:$0xff] }
 0x34b   : > { %p1664_p6 = pneg %p1663_p4 }
 0x34c   : > { %v992_v48 = vadd.f32 %v991_v42, %v987_v45  ;;  %v1070_v42 = vstv %s1387_s20  ;;  %v1066_v45 = vmul.f32 %v1065_v39, %v1064_v40  ;;  %s1665_s20 = sshll.u32 %s1842_s2, 4  ;;  %s1666_s20 = int_to_ptr.vmem [resolvable:$false] %s1665_s20 }
 0x34d   : > { %s1667_s21 = scalar_lea.vmem %s1666_s20, 1024  ;;  %p1668_p12 = scmp.lt.s32.totalorder %s2320_s18, %s1666_s20 }
 0x34e   : > { %v997_v52 = vadd.f32 %v996_v49, %v992_v48  ;;  %v1071_v49 = vmul.f32 %v1070_v42, %v1069_v43  ;;  %p1669_p9 = scmp.lt.s32.totalorder %s1667_s21, %s1661_s5 }
 0x350   : > { %v1002_v56 = vadd.f32 %v1001_v53, %v997_v52  ;;  %v1076_v53 = vmul.f32 %v1075_v46, %v1074_v47  ;;  %p1670_p10 = por %p1669_p9, %p1668_p12 }
 0x352   : > { %v1007_v60 = vadd.f32 %v1006_v57, %v1002_v56  ;;  %v1081_v57 = vmul.f32 %v1080_v50, %v1079_v51  ;;  %p1671_p11 = pnand %p1670_p10, %p1664_p6 }
 0x354   : > { %v1012_v6 = vadd.f32 %v1011_v61, %v1007_v60  ;;  %v1086_v61 = vmul.f32 %v1085_v54, %v1084_v55 }
 0x356   : > { %v1017_v8 = vadd.f32 %v1016_v7, %v1012_v6 }
 0x358   : > { %v1022_v13 = vadd.f32 %v1021_v9, %v1017_v8 }
 0x35a   : > { %v1027_v16 = vadd.f32 %v1026_v10, %v1022_v13 }
 0x35c   : > { %v1032_v20 = vadd.f32 %v1031_v17, %v1027_v16 }
 0x35e   : > { %v1037_v24 = vadd.f32 %v1036_v21, %v1032_v20 }
 0x360   : > { %v1042_v28 = vadd.f32 %v1041_v25, %v1037_v24 }
 0x362   : > { %v1047_v34 = vadd.f32 %v1046_v29, %v1042_v28 }
 0x364   : > { %v1052_v36 = vadd.f32 %v1051_v35, %v1047_v34 }
 0x366   : > { %v1057_v41 = vadd.f32 %v1056_v37, %v1052_v36 }
 0x368   : > { %v1062_v44 = vadd.f32 %v1061_v38, %v1057_v41 }
 0x36a   : > { %v1067_v48 = vadd.f32 %v1066_v45, %v1062_v44 }
 0x36c   : > { %v1072_v52 = vadd.f32 %v1071_v49, %v1067_v48 }
 0x36e   : > { %v1077_v56 = vadd.f32 %v1076_v53, %v1072_v52 }
 0x370   : > { %v1082_v60 = vadd.f32 %v1081_v57, %v1077_v56 }
 0x372   : > { %v1087_v62 = vadd.f32 %v1086_v61, %v1082_v60 }
 0x374   : > { %v1092_v4 = vadd.f32 %v1091_v63, %v1087_v62 }
 0x376   : > { %v1093_v5 = vsub.f32 0.0, %v1092_v4 }
 0x378   : > { %v1094_v6 = vmul.f32 1.442695, %v1093_v5 }
 0x37a   : > { %1562 = vpow2.f32 %v1094_v6 }
 0x387   : > { %v1563_v7 = vpop.eup %1562 }
 0x388   : > { %v1096_v8 = vadd.f32 1.0, %v1563_v7 }
 0x38a   : > { %1564 = vrcp.f32 %v1096_v8 }
 0x397   : > { %v1565_v9 = vpop.eup %1564 }
 0x398   : > { %v1098_v10 = vmul.f32 %v1565_v9, %v2169_v0  ;;  %v1099_v11 = vmul.f32 %v1565_v9, %v2171_v1  ;;  %v1100_v12 = vmul.f32 %v1565_v9, %v2173_v2  ;;  %v1101_v13 = vmul.f32 %v1565_v9, %v2175_v3 }
 0x39a   : > { %1102 = vst.msk [vmem:[%s2195_s10] sm:$0xff] %vm356_vm0, %v1098_v10  ;;  %1103 = vst.msk [vmem:[%s2195_s10 + $0x8] sm:$0xff] %vm356_vm0, %v1099_v11 }
 0x39b   : > { %1104 = vst.msk [vmem:[%s2195_s10 + $0x10] sm:$0xff] %vm356_vm0, %v1100_v12  ;;  %1105 = vst.msk [vmem:[%s2195_s10 + $0x18] sm:$0xff] %vm356_vm0, %v1101_v13 }
 0x39c   : > { %1674 = shalt.err (!%p1671_p11)
}
 0x39d   : > { %s1675_s10 = scalar_lea.hbm %s2318_s8, 512  ;;  %s1679_s6 = scalar_lea.hbm %s2492_s9, 2048 }
 0x39e   : > { %p1676_p13 = scmp.ne.s32.totalorder %s2318_s8, %s1675_s10  ;;  %p1680_p3 = scmp.lt.s32.totalorder %s2318_s8, %s2492_s9 }
 0x39f   : > { %p1681_p1 = scmp.lt.s32.totalorder %s1679_s6, %s1675_s10 }
 0x3a0   : > { %p1677_p0 = pnand %p1676_p13, %p2493_p5 }
 0x3a1   : > { %p1682_p8 = por %p1681_p1, %p1680_p3 }
 0x3a2   : > { %p1678_p2 = pneg %p1677_p0 }
 0x3a4   : > { %p1683_p7 = pnand %p1682_p8, %p1678_p2 }
 0x3a6   : > { %1686 = shalt.err (!%p1683_p7)
}
 0x3a7   : > { %s1843_s4 = smov 128   ;;  %s1844_s14 = smov 256  }
 0x3a8   : > { %s1845_s23 = smov 8  }
 0x3a9   : > { %1407 = dma.vmem_to_hbm [thread:$0]  (%p2493_p5), %s2320_s18, 512, %s2318_s8, %s1107_s12, %s1843_s4, %s1844_s14, %s1845_s23  }
 0x3aa PF: > { %s2494_s24 = sld [smem:[#allocation19_spill]]  ;;  %p1430_p4 = scmp.ge.s32.totalorder %s1821_s28, 2 }
 0x3ab   : > { %s2495_s15 = sld [smem:[#allocation30_spill]] }
 0x3b0   : > { %s1136_s5 = sand.u32 1, %s2494_s24  }
 0x3b1   : > { %p2496_p6 = scmp.ne.s32.totalorder %s2495_s15, 0  ;;  %s1137_s2 = scalar_lea.sflag [#allocation6], %s1136_s5 }
 0x3b3   : > { %p1424_p12 = pnand %p1430_p4, %p2496_p6 }
 0x3b5   : > { %p1425_p9 = pneg %p1424_p12 }
 0x3b7   : > { %1760 = dma.done.wait (%p1425_p9), %s1137_s2, 512  }
 0x3b8   : > { %1762 = vsyncadd (%p1425_p9), %s1137_s2, 4294966784  ;;  %s24_s28 = sadd.s32 1, %s1821_s28   ;;  %s2498_s7 = sld [smem:[#allocation18_spill]] }
 0x3b9   : > { %p2362_p10 = scmp.ge.s32.totalorder %s24_s28, 6   ;;  %s2499_s13 = sld [smem:[#allocation25_spill]] }
 0x3ba   : > { %s2500_s8 = sld [smem:[#allocation20_spill]]  ;;  %s2505_s15 = smov %s1773_s16 }
 0x3bb   : > { %s2501_s23 = sld [smem:[#allocation26_spill]]  ;;  %s2506_s16 = smov %s1777_s17 }
 0x3bc   : > { %s2502_s12 = sld [smem:[#allocation23_spill]]  ;;  %s2507_s17 = smov %s2121_s0 }
 0x3bd   : > { %s2503_s10 = sld [smem:[#allocation24_spill]]  ;;  %s2508_s18 = smov %s1785_s19 }
 0x3be   : > { %s2509_s19 = smov %s2498_s7  ;;  %s2511_s21 = smov %s1797_s22 }
 0x3bf   : > { %s2510_s20 = smov %s2499_s13  ;;  %s2513_s24 = smov %s1813_s26 }
 0x3c0   : > { %s2512_s22 = smov %s2500_s8  ;;  %s2514_s25 = smov %s1817_s27 }
 0x3c1   :  { %23 = sbr.rel (!%p2362_p10) target bundleno = 17 (0x11), region = 140 }
 0x3c2   : > { %s2515_s26 = smov %s2502_s12 }
 0x3c3   : > { %s2516_s27 = smov %s2503_s10 }
 0x3c6   :  { %1142 = vsyncpa [#allocation5], 1 }
 0x3c7   :  { %1144 = vsyncpa [#allocation5 + $0x1], 1 }
 0x3c8   :  { %1145 = vsyncpa [#allocation10], 1 }
 0x3c9   :  { %1147 = vsyncpa [#allocation10 + $0x1], 1 }
 0x3ca   :  { %1148 = vsyncpa [#allocation6], 1 }
 0x3cb   :  { %1150 = vsyncpa [#allocation6 + $0x1], 1 }
 0x3cc   :  { %1151 = vsyncpa [#allocation7], 1 }
 0x3cd   :  { %1153 = vsyncpa [#allocation7 + $0x1], 1 }

</bundles_post_ra>
